<compile_context>
chip_gen: v7x
topology: tpu7x:2x2x1
jax: 0.10.0
libtpu: 0.0.40
codegen_flags: <defaults>
</compile_context>

<pallas_src>
import functools

import jax
import jax.numpy as jnp
import numpy as np
from jax import lax
from jax.experimental import pallas as pl
from jax.experimental.pallas import tpu as pltpu


def _round_up(x, m):
    return (x + m - 1) // m * m


def _pad2(x, rows, cols):
    out = jnp.zeros((rows, cols), jnp.float32)
    return out.at[:x.shape[0], :x.shape[1]].set(x)


# --------------------------------------------------------------------------
# Kernel A: streaming edge loop (message_fn hidden layer + scatter-sum).
# grid = (num_shards [parallel], tiles_per_shard [arbitrary])
# --------------------------------------------------------------------------
def mpnn_edge_kernel(src_ref, dst_ref, e_ref, hw1sd_ref, w1e_ref, b1_ref,
                     ssum_ref, deg_ref):
    t = pl.program_id(1)
    n2 = hw1sd_ref.shape[0]          # 2 * Np
    npad = n2 // 2
    t_e = src_ref.shape[1]

    @pl.when(t == 0)
    def _init():
        # per-shard partial accumulators live in the (shard-indexed) output refs
        ssum_ref[...] = jnp.zeros_like(ssum_ref)
        deg_ref[...] = jnp.zeros_like(deg_ref)

    src = src_ref[...]               # [1, tE] int32
    dst = dst_ref[...]               # [1, tE] int32

    # Stacked one-hot incidence: rows [:Np] match src, rows [Np:] match dst+Np.
    # Padded edges (src = -1, dst = -(Np+1)) give all-zero columns.
    iota2 = lax.broadcasted_iota(jnp.int32, (n2, t_e), 0)
    g2 = jnp.logical_or(iota2 == src, iota2 == dst + npad).astype(jnp.bfloat16)

    # Fused gather of the pre-projected src+dst node states: one K=2*Np
    # contraction on the MXU -> [tE, Cp].
    contract0 = (((0,), (0,)), ((), ()))
    gathered = lax.dot_general(g2, hw1sd_ref[...], contract0,
                               preferred_element_type=jnp.float32)

    # message_fn hidden: gather + e @ W1_e + b1, ReLU.  (W2/b2 deferred.)
    hid = gathered + jnp.dot(e_ref[...], w1e_ref[...],
                             preferred_element_type=jnp.float32) + b1_ref[...]
    hid = jnp.maximum(hid, 0.0)

    # Scatter-sum over destination nodes (fn.sum('m','m_sum') reassociated):
    # the tile-aligned lower half of g2 is the destination one-hot.
    g_dst = g2[npad:, :]                                              # [Np, tE]
    ssum_ref[...] += jnp.dot(g_dst, hid.astype(jnp.bfloat16),
                             preferred_element_type=jnp.float32)      # [Np, Cp]
    # per-node in-degree (needed to scatter b2 at finalize); XLU lane reduce.
    deg_ref[...] = deg_ref[...] + jnp.sum(g_dst.astype(jnp.float32),
                                          axis=-1, keepdims=True)


# --------------------------------------------------------------------------
# Kernel B: finalize — sum shard partials, deferred W2/b2, update_fn.
# grid = (node blocks [parallel])
# --------------------------------------------------------------------------
def mpnn_finalize_kernel(ssum_ref, deg_ref, h_ref, w2_ref, b2_ref,
                         u1m_ref, u1h_ref, c1_ref, u2_ref, c2_ref,
                         h_new_ref):
    s_sum = jnp.sum(ssum_ref[...], axis=0)                 # [nt, Cp] f32
    deg = jnp.sum(deg_ref[...], axis=0)                    # [nt, Cp] f32

    # Deferred second message linear: m_sum = (sum hid) @ W2 + deg * b2.
    m_sum = (jnp.dot(s_sum.astype(jnp.bfloat16), w2_ref[...],
                     preferred_element_type=jnp.float32)
             + deg * b2_ref[...])

    # update_fn: (split first linear) -> ReLU -> Linear(C->C)
    hid2 = (jnp.dot(m_sum.astype(jnp.bfloat16), u1m_ref[...],
                    preferred_element_type=jnp.float32)
            + jnp.dot(h_ref[...], u1h_ref[...],
                      preferred_element_type=jnp.float32)
            + c1_ref[...])
    hid2 = jnp.maximum(hid2, 0.0)
    h_new_ref[...] = (jnp.dot(hid2.astype(jnp.bfloat16), u2_ref[...],
                              preferred_element_type=jnp.float32)
                      + c2_ref[...])


@functools.partial(jax.jit, static_argnames=("edge_tile", "num_shards"))
def mpnn_layer_forward(h, rnf, e, src, dst, params, *, edge_tile=512, num_shards=2):
    """Pallas forward for MPNNLayer (rnf=True). Returns (h_new, e)."""
    N, C = h.shape
    E = e.shape[0]
    Cp = _round_up(C, 128)                 # lane-dense feature width
    Np = _round_up(N, 128)                 # node rows (sublane / contraction dim)
    chunk = edge_tile * num_shards
    Ep = _round_up(E, chunk)
    tps = Ep // chunk                      # edge tiles per shard

    f32, bf = jnp.float32, jnp.bfloat16

    w1, b1, w2, b2 = params["w1"], params["b1"], params["w2"], params["b2"]
    u1, c1, u2, c2 = params["u1"], params["c1"], params["u2"], params["c2"]

    # ---- hoisted pre-projection: node states through message_fn's first linear ----
    h2 = jnp.concatenate([h, rnf], axis=-1)                       # [N, 2C] f32
    hw1s = h2 @ w1[0:2 * C]                                       # [N, C]
    hw1d = h2 @ w1[3 * C:5 * C]                                   # [N, C]
    hw1sd = (jnp.zeros((2 * Np, Cp), f32)
             .at[:N, :C].set(hw1s)
             .at[Np:Np + N, :C].set(hw1d)).astype(bf)             # [2Np, Cp] bf16

    # ---- activations (lane-dense, bf16 MXU operands) ----
    e_bf = _pad2(e, Ep, Cp).astype(bf)
    h_bf = _pad2(h, Np, Cp).astype(bf)
    src2 = jnp.full((1, Ep), -1, jnp.int32).at[0, :E].set(src.astype(jnp.int32))
    dst2 = jnp.full((1, Ep), -(Np + 1), jnp.int32).at[0, :E].set(dst.astype(jnp.int32))

    # ---- weights (concat-free split), bf16 weights / f32 biases ----
    w1e = _pad2(w1[2 * C:3 * C], Cp, Cp).astype(bf)
    b1p = _pad2(b1, 1, Cp)
    w2p = _pad2(w2, Cp, Cp).astype(bf)
    b2p = _pad2(b2, 1, Cp)
    u1m = _pad2(u1[0:C], Cp, Cp).astype(bf)
    u1h = _pad2(u1[C:2 * C], Cp, Cp).astype(bf)
    c1p = _pad2(c1, 1, Cp)
    u2p = _pad2(u2, Cp, Cp).astype(bf)
    c2p = _pad2(c2, 1, Cp)

    edge_idx = lambda s, t: (0, s * tps + t)

    flops_a = 2 * Ep * Cp * (3 * Np + Cp)
    bytes_a = (2 * Ep * 4 + Ep * Cp * 2 + 2 * Np * Cp * 2 + Cp * Cp * 2 + Cp * 4
               + 2 * num_shards * Np * Cp * 4)

    # ---- Kernel A: edge loop -> per-shard partial (s_sum, deg) slabs ----
    ssum_part, deg_part = pl.pallas_call(
        mpnn_edge_kernel,
        out_shape=(jax.ShapeDtypeStruct((num_shards, Np, Cp), f32),
                   jax.ShapeDtypeStruct((num_shards, Np, Cp), f32)),
        grid=(num_shards, tps),
        in_specs=[
            pl.BlockSpec((1, edge_tile), edge_idx),                        # src tile
            pl.BlockSpec((1, edge_tile), edge_idx),                        # dst tile
            pl.BlockSpec((edge_tile, Cp), lambda s, t: (s * tps + t, 0)),  # e tile
            pl.BlockSpec((2 * Np, Cp), lambda s, t: (0, 0)),               # hw1sd
            pl.BlockSpec((Cp, Cp), lambda s, t: (0, 0)),                   # w1e
            pl.BlockSpec((1, Cp), lambda s, t: (0, 0)),                    # b1
        ],
        out_specs=(pl.BlockSpec((None, Np, Cp), lambda s, t: (s, 0, 0)),
                   pl.BlockSpec((None, Np, Cp), lambda s, t: (s, 0, 0))),
        compiler_params=pltpu.CompilerParams(
            dimension_semantics=("parallel", "arbitrary"),   # shards x edge tiles
            vmem_limit_bytes=32 * 1024 * 1024),
        cost_estimate=pl.CostEstimate(flops=int(flops_a), transcendentals=0,
                                      bytes_accessed=int(bytes_a)),
    )(src2, dst2, e_bf, hw1sd, w1e, b1p)

    # ---- Kernel B: finalize (shard reduce + deferred W2/b2 + update_fn) ----
    nt = 128
    h_new_pad = pl.pallas_call(
        mpnn_finalize_kernel,
        out_shape=jax.ShapeDtypeStruct((Np, Cp), f32),
        grid=(Np // nt,),
        in_specs=[
            pl.BlockSpec((num_shards, nt, Cp), lambda i: (0, i, 0)),   # s_sum parts
            pl.BlockSpec((num_shards, nt, Cp), lambda i: (0, i, 0)),   # deg parts
            pl.BlockSpec((nt, Cp), lambda i: (i, 0)),                  # h
            pl.BlockSpec((Cp, Cp), lambda i: (0, 0)),                  # w2
            pl.BlockSpec((1, Cp), lambda i: (0, 0)),                   # b2
            pl.BlockSpec((Cp, Cp), lambda i: (0, 0)),                  # u1m
            pl.BlockSpec((Cp, Cp), lambda i: (0, 0)),                  # u1h
            pl.BlockSpec((1, Cp), lambda i: (0, 0)),                   # c1
            pl.BlockSpec((Cp, Cp), lambda i: (0, 0)),                  # u2
            pl.BlockSpec((1, Cp), lambda i: (0, 0)),                   # c2
        ],
        out_specs=pl.BlockSpec((nt, Cp), lambda i: (i, 0)),
        compiler_params=pltpu.CompilerParams(
            dimension_semantics=("parallel",),
            vmem_limit_bytes=32 * 1024 * 1024),
    )(ssum_part, deg_part, h_bf, w2p, b2p, u1m, u1h, c1p, u2p, c2p)

    return h_new_pad[:N, :C], e


def mpnn_reference(h, rnf, e, src, dst, p):
    """Pure-JAX f32 reference mirroring the PyTorch/DGL forward."""
    h2 = jnp.concatenate([h, rnf], axis=-1)
    msg_in = jnp.concatenate([h2[src], e, h2[dst]], axis=-1)
    hid = jax.nn.relu(msg_in @ p["w1"] + p["b1"][0])
    m = hid @ p["w2"] + p["b2"][0]
    m_sum = jnp.zeros_like(h).at[dst].add(m)
    upd_in = jnp.concatenate([m_sum, h], axis=-1)
    hid2 = jax.nn.relu(upd_in @ p["u1"] + p["c1"][0])
    return hid2 @ p["u2"] + p["c2"][0]


def init_params(key, in_channels):
    """Deterministic synthetic init matching nn.Linear shapes (rnf=True)."""
    C = in_channels
    ks = jax.random.split(key, 4)

    def lin(k, fan_in, fan_out):
        kw, kb = jax.random.split(k)
        bound = 1.0 / np.sqrt(fan_in)
        w = jax.random.uniform(kw, (fan_in, fan_out), jnp.float32, -bound, bound)
        b = jax.random.uniform(kb, (1, fan_out), jnp.float32, -bound, bound)
        return w, b

    w1, b1 = lin(ks[0], 5 * C, C)   # message_fn[0]
    w2, b2 = lin(ks[1], C, C)       # message_fn[2]
    u1, c1 = lin(ks[2], 2 * C, C)   # update_fn[0]
    u2, c2 = lin(ks[3], C, C)       # update_fn[2]
    return {"w1": w1, "b1": b1, "w2": w2, "b2": b2,
            "u1": u1, "c1": c1, "u2": u2, "c2": c2}


if __name__ == "__main__":
    C = 32        # in_channels
    N = 64        # number of nodes
    E = 640       # number of edges

    key = jax.random.PRNGKey(0)
    k_h, k_e, k_src, k_dst, k_rnf, k_p = jax.random.split(key, 6)

    h = jax.random.normal(k_h, (N, C), jnp.float32)
    e = jax.random.normal(k_e, (E, C), jnp.float32)
    src = jax.random.randint(k_src, (E,), 0, N, jnp.int32)
    dst = jax.random.randint(k_dst, (E,), 0, N, jnp.int32)
    rnf = jax.random.normal(k_rnf, (N, C), jnp.float32)

    params = init_params(k_p, C)

    h_new, e_out = mpnn_layer_forward(h, rnf, e, src, dst, params)
    h_new = jax.block_until_ready(h_new)

    h_ref = mpnn_reference(h, rnf, e, src, dst, params)
    # bf16 MXU operands with f32 accumulation -> ~1e-2-level relative error.
    np.testing.assert_allclose(np.asarray(h_new), np.asarray(h_ref),
                               rtol=3e-2, atol=3e-2)
    assert e_out.shape == e.shape

    print("KERNEL_OK")
</pallas_src>

<mosaic_0001>
module attributes {stable_mosaic.version = 11 : i64} {
  func.func @mpnn_edge_kernel(%arg0: i32, %arg1: i32, %arg2: memref<1x512xi32, #tpu.memory_space<vmem>>, %arg3: memref<1x512xi32, #tpu.memory_space<vmem>>, %arg4: memref<512x128xbf16, #tpu.memory_space<vmem>>, %arg5: memref<256x128xbf16, #tpu.memory_space<vmem>>, %arg6: memref<128x128xbf16, #tpu.memory_space<vmem>>, %arg7: memref<1x128xf32, #tpu.memory_space<vmem>>, %arg8: memref<1x128x128xf32, #tpu.memory_space<vmem>>, %arg9: memref<1x128x128xf32, #tpu.memory_space<vmem>>) attributes {dimension_semantics = [#tpu.dimension_semantics<parallel>, #tpu.dimension_semantics<arbitrary>], iteration_bounds = array<i64: 2, 1>, scalar_prefetch = 0 : i64, scratch_operands = 0 : i64, tpu.core_type = #tpu.core_type<tc>, window_params = [{transform_indices = @transform_0, window_bounds = array<i64: 1, 512>}, {transform_indices = @transform_1, window_bounds = array<i64: 1, 512>}, {transform_indices = @transform_2, window_bounds = array<i64: 512, 128>}, {pipeline_mode = #tpu.pipeline_mode<synchronous>, transform_indices = @transform_3, window_bounds = array<i64: 256, 128>}, {pipeline_mode = #tpu.pipeline_mode<synchronous>, transform_indices = @transform_4, window_bounds = array<i64: 128, 128>}, {pipeline_mode = #tpu.pipeline_mode<synchronous>, transform_indices = @transform_5, window_bounds = array<i64: 1, 128>}, {transform_indices = @transform_6, window_bounds = array<i64: 1, 128, 128>}, {transform_indices = @transform_7, window_bounds = array<i64: 1, 128, 128>}]} {
    %c0_i32 = arith.constant 0 : i32
    %0 = arith.cmpi eq, %arg1, %c0_i32 : i32
    %1 = arith.extui %0 : i1 to i32
    %c0_i32_0 = arith.constant 0 : i32
    %2 = arith.cmpi ne, %1, %c0_i32_0 : i32
    scf.if %2 {
      %cst_28 = arith.constant 0.000000e+00 : f32
      %46 = vector.broadcast %cst_28 : f32 to vector<128x128xf32>
      %c0_29 = arith.constant 0 : index
      %c0_30 = arith.constant 0 : index
      %c0_31 = arith.constant 0 : index
      %47 = vector.load %arg8[%c0_29, %c0_30, %c0_31] : memref<1x128x128xf32, #tpu.memory_space<vmem>>, vector<1x128x128xf32>
      %48 = vector.shape_cast %47 : vector<1x128x128xf32> to vector<128x128xf32>
      %49 = vector.shape_cast %46 : vector<128x128xf32> to vector<1x128x128xf32>
      tpu.vector_store %arg8[%c0_29, %c0_30, %c0_31], %49 {strides = array<i32>} : memref<1x128x128xf32, #tpu.memory_space<vmem>>, vector<1x128x128xf32>,
      %cst_32 = arith.constant 0.000000e+00 : f32
      %50 = vector.broadcast %cst_32 : f32 to vector<128x128xf32>
      %c0_33 = arith.constant 0 : index
      %c0_34 = arith.constant 0 : index
      %c0_35 = arith.constant 0 : index
      %51 = vector.load %arg9[%c0_33, %c0_34, %c0_35] : memref<1x128x128xf32, #tpu.memory_space<vmem>>, vector<1x128x128xf32>
      %52 = vector.shape_cast %51 : vector<1x128x128xf32> to vector<128x128xf32>
      %53 = vector.shape_cast %50 : vector<128x128xf32> to vector<1x128x128xf32>
      tpu.vector_store %arg9[%c0_33, %c0_34, %c0_35], %53 {strides = array<i32>} : memref<1x128x128xf32, #tpu.memory_space<vmem>>, vector<1x128x128xf32>,
    } else {
    }
    %c0 = arith.constant 0 : index
    %c0_1 = arith.constant 0 : index
    %3 = vector.load %arg2[%c0, %c0_1] : memref<1x512xi32, #tpu.memory_space<vmem>>, vector<1x512xi32>
    %c0_2 = arith.constant 0 : index
    %c0_3 = arith.constant 0 : index
    %4 = vector.load %arg3[%c0_2, %c0_3] : memref<1x512xi32, #tpu.memory_space<vmem>>, vector<1x512xi32>
    %5 = tpu.iota {dimensions = array<i32: 0>} : vector<256x512xi32>
    %6 = vector.broadcast %3 : vector<1x512xi32> to vector<256x512xi32>
    %7 = arith.cmpi eq, %5, %6 : vector<256x512xi32>
    %c128_i32 = arith.constant 128 : i32
    %8 = vector.broadcast %c128_i32 : i32 to vector<1x512xi32>
    %9 = arith.addi %4, %8 : vector<1x512xi32>
    %10 = vector.broadcast %9 : vector<1x512xi32> to vector<256x512xi32>
    %11 = arith.cmpi eq, %5, %10 : vector<256x512xi32>
    %12 = arith.ori %7, %11 : vector<256x512xi1>
    %13 = arith.extui %12 : vector<256x512xi1> to vector<256x512xi32>
    %14 = arith.sitofp %13 : vector<256x512xi32> to vector<256x512xf32>
    %15 = arith.truncf %14 : vector<256x512xf32> to vector<256x512xbf16>
    %c0_4 = arith.constant 0 : index
    %c0_5 = arith.constant 0 : index
    %16 = vector.load %arg5[%c0_4, %c0_5] : memref<256x128xbf16, #tpu.memory_space<vmem>>, vector<256x128xbf16>
    %cst = arith.constant dense<0.000000e+00> : vector<512x128xf32>
    %17 = tpu.matmul %15, %16, %cst {dimension_numbers = #tpu.dot_dimension_numbers<[0], [0], [1], [1], [0, 1, 1, 1], [], []>} : vector<256x512xbf16>, vector<256x128xbf16>, vector<512x128xf32> -> vector<512x128xf32>
    %c0_6 = arith.constant 0 : index
    %c0_7 = arith.constant 0 : index
    %18 = vector.load %arg4[%c0_6, %c0_7] : memref<512x128xbf16, #tpu.memory_space<vmem>>, vector<512x128xbf16>
    %c0_8 = arith.constant 0 : index
    %c0_9 = arith.constant 0 : index
    %19 = vector.load %arg6[%c0_8, %c0_9] : memref<128x128xbf16, #tpu.memory_space<vmem>>, vector<128x128xbf16>
    %cst_10 = arith.constant dense<0.000000e+00> : vector<512x128xf32>
    %20 = tpu.matmul %18, %19, %cst_10 {dimension_numbers = #tpu.dot_dimension_numbers<[1], [0], [0], [1], [0, 0, 1, 1], [], []>} : vector<512x128xbf16>, vector<128x128xbf16>, vector<512x128xf32> -> vector<512x128xf32>
    %21 = arith.addf %17, %20 : vector<512x128xf32>
    %c0_11 = arith.constant 0 : index
    %c0_12 = arith.constant 0 : index
    %22 = vector.load %arg7[%c0_11, %c0_12] : memref<1x128xf32, #tpu.memory_space<vmem>>, vector<1x128xf32>
    %23 = vector.broadcast %22 : vector<1x128xf32> to vector<512x128xf32>
    %24 = arith.addf %21, %23 : vector<512x128xf32>
    %cst_13 = arith.constant 0.000000e+00 : f32
    %25 = vector.broadcast %cst_13 : f32 to vector<512x128xf32>
    %26 = arith.maximumf %24, %25 : vector<512x128xf32>
    %27 = vector.extract_strided_slice %15 {offsets = [128, 0], sizes = [128, 512], strides = [1, 1]} : vector<256x512xbf16> to vector<128x512xbf16>
    %c0_14 = arith.constant 0 : index
    %c0_15 = arith.constant 0 : index
    %c0_16 = arith.constant 0 : index
    %28 = vector.load %arg8[%c0_14, %c0_15, %c0_16] : memref<1x128x128xf32, #tpu.memory_space<vmem>>, vector<1x128x128xf32>
    %29 = vector.shape_cast %28 : vector<1x128x128xf32> to vector<128x128xf32>
    %30 = arith.truncf %26 : vector<512x128xf32> to vector<512x128xbf16>
    %cst_17 = arith.constant dense<0.000000e+00> : vector<128x128xf32>
    %31 = tpu.matmul %27, %30, %cst_17 {dimension_numbers = #tpu.dot_dimension_numbers<[1], [0], [0], [1], [0, 0, 1, 1], [], []>} : vector<128x512xbf16>, vector<512x128xbf16>, vector<128x128xf32> -> vector<128x128xf32>
    %32 = arith.addf %29, %31 : vector<128x128xf32>
    %c0_18 = arith.constant 0 : index
    %c0_19 = arith.constant 0 : index
    %c0_20 = arith.constant 0 : index
    %33 = vector.load %arg8[%c0_18, %c0_19, %c0_20] : memref<1x128x128xf32, #tpu.memory_space<vmem>>, vector<1x128x128xf32>
    %34 = vector.shape_cast %33 : vector<1x128x128xf32> to vector<128x128xf32>
    %35 = vector.shape_cast %32 : vector<128x128xf32> to vector<1x128x128xf32>
    tpu.vector_store %arg8[%c0_18, %c0_19, %c0_20], %35 {strides = array<i32>} : memref<1x128x128xf32, #tpu.memory_space<vmem>>, vector<1x128x128xf32>,
    %c0_21 = arith.constant 0 : index
    %c0_22 = arith.constant 0 : index
    %c0_23 = arith.constant 0 : index
    %36 = vector.load %arg9[%c0_21, %c0_22, %c0_23] : memref<1x128x128xf32, #tpu.memory_space<vmem>>, vector<1x128x128xf32>
    %37 = vector.shape_cast %36 : vector<1x128x128xf32> to vector<128x128xf32>
    %38 = arith.extf %27 : vector<128x512xbf16> to vector<128x512xf32>
    %cst_24 = arith.constant dense<0.000000e+00> : vector<128xf32>
    %39 = vector.multi_reduction <add>, %38, %cst_24 [1] : vector<128x512xf32> to vector<128xf32>
    %40 = vector.shape_cast %39 : vector<128xf32> to vector<128x1xf32>
    %41 = vector.broadcast %40 : vector<128x1xf32> to vector<128x128xf32>
    %42 = arith.addf %37, %41 : vector<128x128xf32>
    %c0_25 = arith.constant 0 : index
    %c0_26 = arith.constant 0 : index
    %c0_27 = arith.constant 0 : index
    %43 = vector.load %arg9[%c0_25, %c0_26, %c0_27] : memref<1x128x128xf32, #tpu.memory_space<vmem>>, vector<1x128x128xf32>
    %44 = vector.shape_cast %43 : vector<1x128x128xf32> to vector<128x128xf32>
    %45 = vector.shape_cast %42 : vector<128x128xf32> to vector<1x128x128xf32>
    tpu.vector_store %arg9[%c0_25, %c0_26, %c0_27], %45 {strides = array<i32>} : memref<1x128x128xf32, #tpu.memory_space<vmem>>, vector<1x128x128xf32>,
    return
  }
  func.func @transform_0(%arg0: i32, %arg1: i32) -> (i32, i32) {
    %c1_i32 = arith.constant 1 : i32
    %0 = arith.muli %arg0, %c1_i32 : i32
    %1 = arith.addi %0, %arg1 : i32
    %c0_i32 = arith.constant 0 : i32
    %c0_i32_0 = arith.constant 0 : i32
    return %c0_i32, %1 : i32, i32
  }
  func.func @transform_1(%arg0: i32, %arg1: i32) -> (i32, i32) {
    %c1_i32 = arith.constant 1 : i32
    %0 = arith.muli %arg0, %c1_i32 : i32
    %1 = arith.addi %0, %arg1 : i32
    %c0_i32 = arith.constant 0 : i32
    %c0_i32_0 = arith.constant 0 : i32
    return %c0_i32, %1 : i32, i32
  }
  func.func @transform_2(%arg0: i32, %arg1: i32) -> (i32, i32) {
    %c1_i32 = arith.constant 1 : i32
    %0 = arith.muli %arg0, %c1_i32 : i32
    %1 = arith.addi %0, %arg1 : i32
    %c0_i32 = arith.constant 0 : i32
    %c0_i32_0 = arith.constant 0 : i32
    return %1, %c0_i32 : i32, i32
  }
  func.func @transform_3(%arg0: i32, %arg1: i32) -> (i32, i32) {
    %c0_i32 = arith.constant 0 : i32
    %c0_i32_0 = arith.constant 0 : i32
    %c0_i32_1 = arith.constant 0 : i32
    return %c0_i32, %c0_i32_0 : i32, i32
  }
  func.func @transform_4(%arg0: i32, %arg1: i32) -> (i32, i32) {
    %c0_i32 = arith.constant 0 : i32
    %c0_i32_0 = arith.constant 0 : i32
    %c0_i32_1 = arith.constant 0 : i32
    return %c0_i32, %c0_i32_0 : i32, i32
  }
  func.func @transform_5(%arg0: i32, %arg1: i32) -> (i32, i32) {
    %c0_i32 = arith.constant 0 : i32
    %c0_i32_0 = arith.constant 0 : i32
    %c0_i32_1 = arith.constant 0 : i32
    return %c0_i32, %c0_i32_0 : i32, i32
  }
  func.func @transform_6(%arg0: i32, %arg1: i32) -> (i32, i32, i32) {
    %c0_i32 = arith.constant 0 : i32
    %c0_i32_0 = arith.constant 0 : i32
    %c0_i32_1 = arith.constant 0 : i32
    return %arg0, %c0_i32, %c0_i32_0 : i32, i32, i32
  }
  func.func @transform_7(%arg0: i32, %arg1: i32) -> (i32, i32, i32) {
    %c0_i32 = arith.constant 0 : i32
    %c0_i32_0 = arith.constant 0 : i32
    %c0_i32_1 = arith.constant 0 : i32
    return %arg0, %c0_i32, %c0_i32_0 : i32, i32, i32
  }
}

module attributes {stable_mosaic.version = 11 : i64} {
  func.func @mpnn_finalize_kernel(%arg0: i32, %arg1: memref<2x128x128xf32, #tpu.memory_space<vmem>>, %arg2: memref<2x128x128xf32, #tpu.memory_space<vmem>>, %arg3: memref<128x128xbf16, #tpu.memory_space<vmem>>, %arg4: memref<128x128xbf16, #tpu.memory_space<vmem>>, %arg5: memref<1x128xf32, #tpu.memory_space<vmem>>, %arg6: memref<128x128xbf16, #tpu.memory_space<vmem>>, %arg7: memref<128x128xbf16, #tpu.memory_space<vmem>>, %arg8: memref<1x128xf32, #tpu.memory_space<vmem>>, %arg9: memref<128x128xbf16, #tpu.memory_space<vmem>>, %arg10: memref<1x128xf32, #tpu.memory_space<vmem>>, %arg11: memref<128x128xf32, #tpu.memory_space<vmem>>) attributes {dimension_semantics = [#tpu.dimension_semantics<parallel>], iteration_bounds = array<i64: 1>, scalar_prefetch = 0 : i64, scratch_operands = 0 : i64, tpu.core_type = #tpu.core_type<tc>, window_params = [{transform_indices = @transform_0, window_bounds = array<i64: 2, 128, 128>}, {transform_indices = @transform_1, window_bounds = array<i64: 2, 128, 128>}, {transform_indices = @transform_2, window_bounds = array<i64: 128, 128>}, {pipeline_mode = #tpu.pipeline_mode<synchronous>, transform_indices = @transform_3, window_bounds = array<i64: 128, 128>}, {pipeline_mode = #tpu.pipeline_mode<synchronous>, transform_indices = @transform_4, window_bounds = array<i64: 1, 128>}, {pipeline_mode = #tpu.pipeline_mode<synchronous>, transform_indices = @transform_5, window_bounds = array<i64: 128, 128>}, {pipeline_mode = #tpu.pipeline_mode<synchronous>, transform_indices = @transform_6, window_bounds = array<i64: 128, 128>}, {pipeline_mode = #tpu.pipeline_mode<synchronous>, transform_indices = @transform_7, window_bounds = array<i64: 1, 128>}, {pipeline_mode = #tpu.pipeline_mode<synchronous>, transform_indices = @transform_8, window_bounds = array<i64: 128, 128>}, {pipeline_mode = #tpu.pipeline_mode<synchronous>, transform_indices = @transform_9, window_bounds = array<i64: 1, 128>}, {transform_indices = @transform_10, window_bounds = array<i64: 128, 128>}]} {
    %c0 = arith.constant 0 : index
    %c0_0 = arith.constant 0 : index
    %c0_1 = arith.constant 0 : index
    %0 = vector.load %arg1[%c0, %c0_0, %c0_1] : memref<2x128x128xf32, #tpu.memory_space<vmem>>, vector<2x128x128xf32>
    %cst = arith.constant dense<0.000000e+00> : vector<128x128xf32>
    %1 = vector.multi_reduction <add>, %0, %cst [0] : vector<2x128x128xf32> to vector<128x128xf32>
    %c0_2 = arith.constant 0 : index
    %c0_3 = arith.constant 0 : index
    %c0_4 = arith.constant 0 : index
    %2 = vector.load %arg2[%c0_2, %c0_3, %c0_4] : memref<2x128x128xf32, #tpu.memory_space<vmem>>, vector<2x128x128xf32>
    %cst_5 = arith.constant dense<0.000000e+00> : vector<128x128xf32>
    %3 = vector.multi_reduction <add>, %2, %cst_5 [0] : vector<2x128x128xf32> to vector<128x128xf32>
    %4 = arith.truncf %1 : vector<128x128xf32> to vector<128x128xbf16>
    %c0_6 = arith.constant 0 : index
    %c0_7 = arith.constant 0 : index
    %5 = vector.load %arg4[%c0_6, %c0_7] : memref<128x128xbf16, #tpu.memory_space<vmem>>, vector<128x128xbf16>
    %cst_8 = arith.constant dense<0.000000e+00> : vector<128x128xf32>
    %6 = tpu.matmul %4, %5, %cst_8 {dimension_numbers = #tpu.dot_dimension_numbers<[1], [0], [0], [1], [0, 0, 1, 1], [], []>} : vector<128x128xbf16>, vector<128x128xbf16>, vector<128x128xf32> -> vector<128x128xf32>
    %c0_9 = arith.constant 0 : index
    %c0_10 = arith.constant 0 : index
    %7 = vector.load %arg5[%c0_9, %c0_10] : memref<1x128xf32, #tpu.memory_space<vmem>>, vector<1x128xf32>
    %8 = vector.broadcast %7 : vector<1x128xf32> to vector<128x128xf32>
    %9 = arith.mulf %3, %8 : vector<128x128xf32>
    %10 = arith.addf %6, %9 : vector<128x128xf32>
    %11 = arith.truncf %10 : vector<128x128xf32> to vector<128x128xbf16>
    %c0_11 = arith.constant 0 : index
    %c0_12 = arith.constant 0 : index
    %12 = vector.load %arg6[%c0_11, %c0_12] : memref<128x128xbf16, #tpu.memory_space<vmem>>, vector<128x128xbf16>
    %cst_13 = arith.constant dense<0.000000e+00> : vector<128x128xf32>
    %13 = tpu.matmul %11, %12, %cst_13 {dimension_numbers = #tpu.dot_dimension_numbers<[1], [0], [0], [1], [0, 0, 1, 1], [], []>} : vector<128x128xbf16>, vector<128x128xbf16>, vector<128x128xf32> -> vector<128x128xf32>
    %c0_14 = arith.constant 0 : index
    %c0_15 = arith.constant 0 : index
    %14 = vector.load %arg3[%c0_14, %c0_15] : memref<128x128xbf16, #tpu.memory_space<vmem>>, vector<128x128xbf16>
    %c0_16 = arith.constant 0 : index
    %c0_17 = arith.constant 0 : index
    %15 = vector.load %arg7[%c0_16, %c0_17] : memref<128x128xbf16, #tpu.memory_space<vmem>>, vector<128x128xbf16>
    %cst_18 = arith.constant dense<0.000000e+00> : vector<128x128xf32>
    %16 = tpu.matmul %14, %15, %cst_18 {dimension_numbers = #tpu.dot_dimension_numbers<[1], [0], [0], [1], [0, 0, 1, 1], [], []>} : vector<128x128xbf16>, vector<128x128xbf16>, vector<128x128xf32> -> vector<128x128xf32>
    %17 = arith.addf %13, %16 : vector<128x128xf32>
    %c0_19 = arith.constant 0 : index
    %c0_20 = arith.constant 0 : index
    %18 = vector.load %arg8[%c0_19, %c0_20] : memref<1x128xf32, #tpu.memory_space<vmem>>, vector<1x128xf32>
    %19 = vector.broadcast %18 : vector<1x128xf32> to vector<128x128xf32>
    %20 = arith.addf %17, %19 : vector<128x128xf32>
    %cst_21 = arith.constant 0.000000e+00 : f32
    %21 = vector.broadcast %cst_21 : f32 to vector<128x128xf32>
    %22 = arith.maximumf %20, %21 : vector<128x128xf32>
    %23 = arith.truncf %22 : vector<128x128xf32> to vector<128x128xbf16>
    %c0_22 = arith.constant 0 : index
    %c0_23 = arith.constant 0 : index
    %24 = vector.load %arg9[%c0_22, %c0_23] : memref<128x128xbf16, #tpu.memory_space<vmem>>, vector<128x128xbf16>
    %cst_24 = arith.constant dense<0.000000e+00> : vector<128x128xf32>
    %25 = tpu.matmul %23, %24, %cst_24 {dimension_numbers = #tpu.dot_dimension_numbers<[1], [0], [0], [1], [0, 0, 1, 1], [], []>} : vector<128x128xbf16>, vector<128x128xbf16>, vector<128x128xf32> -> vector<128x128xf32>
    %c0_25 = arith.constant 0 : index
    %c0_26 = arith.constant 0 : index
    %26 = vector.load %arg10[%c0_25, %c0_26] : memref<1x128xf32, #tpu.memory_space<vmem>>, vector<1x128xf32>
    %27 = vector.broadcast %26 : vector<1x128xf32> to vector<128x128xf32>
    %28 = arith.addf %25, %27 : vector<128x128xf32>
    %c0_27 = arith.constant 0 : index
    %c0_28 = arith.constant 0 : index
    %29 = vector.load %arg11[%c0_27, %c0_28] : memref<128x128xf32, #tpu.memory_space<vmem>>, vector<128x128xf32>
    tpu.vector_store %arg11[%c0_27, %c0_28], %28 {strides = array<i32>} : memref<128x128xf32, #tpu.memory_space<vmem>>, vector<128x128xf32>,
    return
  }
  func.func @transform_0(%arg0: i32) -> (i32, i32, i32) {
    %c0_i32 = arith.constant 0 : i32
    %c0_i32_0 = arith.constant 0 : i32
    %c0_i32_1 = arith.constant 0 : i32
    return %c0_i32, %arg0, %c0_i32_0 : i32, i32, i32
  }
  func.func @transform_1(%arg0: i32) -> (i32, i32, i32) {
    %c0_i32 = arith.constant 0 : i32
    %c0_i32_0 = arith.constant 0 : i32
    %c0_i32_1 = arith.constant 0 : i32
    return %c0_i32, %arg0, %c0_i32_0 : i32, i32, i32
  }
  func.func @transform_2(%arg0: i32) -> (i32, i32) {
    %c0_i32 = arith.constant 0 : i32
    %c0_i32_0 = arith.constant 0 : i32
    return %arg0, %c0_i32 : i32, i32
  }
  func.func @transform_3(%arg0: i32) -> (i32, i32) {
    %c0_i32 = arith.constant 0 : i32
    %c0_i32_0 = arith.constant 0 : i32
    %c0_i32_1 = arith.constant 0 : i32
    return %c0_i32, %c0_i32_0 : i32, i32
  }
  func.func @transform_4(%arg0: i32) -> (i32, i32) {
    %c0_i32 = arith.constant 0 : i32
    %c0_i32_0 = arith.constant 0 : i32
    %c0_i32_1 = arith.constant 0 : i32
    return %c0_i32, %c0_i32_0 : i32, i32
  }
  func.func @transform_5(%arg0: i32) -> (i32, i32) {
    %c0_i32 = arith.constant 0 : i32
    %c0_i32_0 = arith.constant 0 : i32
    %c0_i32_1 = arith.constant 0 : i32
    return %c0_i32, %c0_i32_0 : i32, i32
  }
  func.func @transform_6(%arg0: i32) -> (i32, i32) {
    %c0_i32 = arith.constant 0 : i32
    %c0_i32_0 = arith.constant 0 : i32
    %c0_i32_1 = arith.constant 0 : i32
    return %c0_i32, %c0_i32_0 : i32, i32
  }
  func.func @transform_7(%arg0: i32) -> (i32, i32) {
    %c0_i32 = arith.constant 0 : i32
    %c0_i32_0 = arith.constant 0 : i32
    %c0_i32_1 = arith.constant 0 : i32
    return %c0_i32, %c0_i32_0 : i32, i32
  }
  func.func @transform_8(%arg0: i32) -> (i32, i32) {
    %c0_i32 = arith.constant 0 : i32
    %c0_i32_0 = arith.constant 0 : i32
    %c0_i32_1 = arith.constant 0 : i32
    return %c0_i32, %c0_i32_0 : i32, i32
  }
  func.func @transform_9(%arg0: i32) -> (i32, i32) {
    %c0_i32 = arith.constant 0 : i32
    %c0_i32_0 = arith.constant 0 : i32
    %c0_i32_1 = arith.constant 0 : i32
    return %c0_i32, %c0_i32_0 : i32, i32
  }
  func.func @transform_10(%arg0: i32) -> (i32, i32) {
    %c0_i32 = arith.constant 0 : i32
    %c0_i32_0 = arith.constant 0 : i32
    return %arg0, %c0_i32 : i32, i32
  }
}

</mosaic_0001>

<bundles_post_ra>
// kernel: mpnn_layer_forward.3
= control target key start
LH: loop header
LB: loop body
LE: loop exit
PB: predicated region body
PF: predicated region fallthrough
CT: control target
= control target key end

     0   :  { %s1686_s3 = inlined_call_operand.vmem [shape: bf16[128,128], index: 3, kind: input, shape index: {}]   ;;  %s1687_s0 = inlined_call_operand.vmem [shape: f32[2,128,128], index: 0, kind: input, shape index: {}]   ;;  %s1688_s6 = inlined_call_operand.vmem [shape: bf16[128,128], index: 6, kind: input, shape index: {}]   ;;  %s1689_s2 = inlined_call_operand.vmem [shape: bf16[128,128], index: 2, kind: input, shape index: {}]   ;;  %s1690_s5 = inlined_call_operand.vmem [shape: bf16[128,128], index: 5, kind: input, shape index: {}]   ;;  %s1691_s8 = inlined_call_operand.vmem [shape: bf16[128,128], index: 8, kind: input, shape index: {}]   ;;  %s1692_s1 = inlined_call_operand.vmem [shape: f32[2,128,128], index: 1, kind: input, shape index: {}]   ;;  %s1693_s4 = inlined_call_operand.vmem [shape: f32[1,128], index: 4, kind: input, shape index: {}]   ;;  %s1694_s7 = inlined_call_operand.vmem [shape: f32[1,128], index: 7, kind: input, shape index: {}]   ;;  %s1695_s9 = inlined_call_operand.vmem [shape: f32[1,128], index: 9, kind: input, shape index: {}]   ;;  %s1696_s10 = inlined_call_operand.vmem [shape: f32[128,128], index: 10, kind: output, shape index: {}]  }
   0x1   :  { %v1204_v0 = vld [vmem:[%s1686_s3] sm:$0xff]   ;;  %v1205_v1 = vld [vmem:[%s1686_s3 + $0x8] sm:$0xff]   ;;  %v1206_v2 = vld [vmem:[%s1686_s3 + $0x10] sm:$0xff]  }
   0x2   :  { %1060 = vmatprep.subr.bf16.mxu0 %v1204_v0  ;;  %v1207_v3 = vld [vmem:[%s1686_s3 + $0x18] sm:$0xff]   ;;  %v36_v4 = vld [vmem:[%s1687_s0] sm:$0xff]  ;;  %v37_v5 = vld [vmem:[%s1687_s0 + $0x8] sm:$0xff] }
   0x3   :  { %1061 = vmatpush3.bf16.msra.mxu0 %v1204_v0  ;;  %v52_v6 = vld [vmem:[%s1687_s0 + $0x80] sm:$0xff]  ;;  %v53_v7 = vld [vmem:[%s1687_s0 + $0x88] sm:$0xff]  ;;  %v1210_v13 = vld [vmem:[%s1686_s3 + $0x30] sm:$0xff]  }
   0x4   :  { %1062 = vmatprep.subr.bf16.mxu0 %v1205_v1  ;;  %v68_v8 = vadd.f32 %v52_v6, %v36_v4  ;;  %v69_v9 = vadd.f32 %v53_v7, %v37_v5  ;;  %v1208_v10 = vld [vmem:[%s1686_s3 + $0x20] sm:$0xff]   ;;  %v1209_v12 = vld [vmem:[%s1686_s3 + $0x28] sm:$0xff]   ;;  %v38_v16 = vld [vmem:[%s1687_s0 + $0x10] sm:$0xff] }
   0x5   :  { %v1212_v14 = vld [vmem:[%s1688_s6] sm:$0xff]   ;;  %v1213_v15 = vld [vmem:[%s1688_s6 + $0x8] sm:$0xff]   ;;  %v39_v17 = vld [vmem:[%s1687_s0 + $0x18] sm:$0xff] }
   0x6   :  { %v132_v11 = vpack.c.bf16 %v69_v9, %v68_v8  ;;  %v54_v18 = vld [vmem:[%s1687_s0 + $0x90] sm:$0xff]  ;;  %v55_v19 = vld [vmem:[%s1687_s0 + $0x98] sm:$0xff]  ;;  %1092 = vmatprep.subr.bf16.mxu1 %v1212_v14  ;;  %v40_v21 = vld [vmem:[%s1687_s0 + $0x20] sm:$0xff] }
   0x7   :  { %1063 = vmatpush3.bf16.msra.mxu0 %v1205_v1  ;;  %v1211_v20 = vld [vmem:[%s1686_s3 + $0x38] sm:$0xff]   ;;  %v41_v22 = vld [vmem:[%s1687_s0 + $0x28] sm:$0xff]  ;;  %v56_v23 = vld [vmem:[%s1687_s0 + $0xa0] sm:$0xff]  ;;  %1093 = vmatpush3.bf16.msra.mxu1 %v1212_v14  ;;  %v70_v26 = vadd.f32 %v54_v18, %v38_v16  ;;  %v71_v27 = vadd.f32 %v55_v19, %v39_v17 }
   0x8   :  { %1064 = vmatprep.subr.bf16.mxu0 %v1206_v2  ;;  %1076 = vmatprep.mubr.bf16.mxu0 %v132_v11  ;;  %v1214_v24 = vld [vmem:[%s1688_s6 + $0x10] sm:$0xff]   ;;  %v57_v25 = vld [vmem:[%s1687_s0 + $0xa8] sm:$0xff]  ;;  %v1215_v28 = vld [vmem:[%s1688_s6 + $0x18] sm:$0xff]   ;;  %v72_v29 = vadd.f32 %v56_v23, %v40_v21 }
   0x9   :  { %1094 = vmatprep.subr.bf16.mxu1 %v1213_v15  ;;  %v73_v30 = vadd.f32 %v57_v25, %v41_v22  ;;  %v1220_v31 = vld [vmem:[%s1689_s2] sm:$0xff]   ;;  %v42_v32 = vld [vmem:[%s1687_s0 + $0x30] sm:$0xff]  ;;  %v43_v33 = vld [vmem:[%s1687_s0 + $0x38] sm:$0xff]  ;;  %v133_v36 = vpack.c.bf16 %v71_v27, %v70_v26 }
   0xa   :  { %v58_v34 = vld [vmem:[%s1687_s0 + $0xb0] sm:$0xff]  ;;  %v59_v35 = vld [vmem:[%s1687_s0 + $0xb8] sm:$0xff]  ;;  %1108 = vmatprep.mubr.bf16.mxu1 %v1220_v31  ;;  %v44_v37 = vld [vmem:[%s1687_s0 + $0x40] sm:$0xff] }
   0xb   :  { %1065 = vmatpush3.bf16.msra.mxu0 %v1206_v2  ;;  %1095 = vmatpush3.bf16.msra.mxu1 %v1213_v15  ;;  %v45_v38 = vld [vmem:[%s1687_s0 + $0x48] sm:$0xff]  ;;  %v60_v39 = vld [vmem:[%s1687_s0 + $0xc0] sm:$0xff]  ;;  %v134_v40 = vpack.c.bf16 %v73_v30, %v72_v29  ;;  %v74_v43 = vadd.f32 %v58_v34, %v42_v32  ;;  %v75_v44 = vadd.f32 %v59_v35, %v43_v33  ;;  %v46_v48 = vld [vmem:[%s1687_s0 + $0x50] sm:$0xff] }
   0xc   :  { %1066 = vmatprep.subr.bf16.mxu0 %v1207_v3  ;;  %1096 = vmatprep.subr.bf16.mxu1 %v1214_v24  ;;  %v1216_v41 = vld [vmem:[%s1688_s6 + $0x20] sm:$0xff]   ;;  %v61_v42 = vld [vmem:[%s1687_s0 + $0xc8] sm:$0xff]  ;;  %v76_v45 = vadd.f32 %v60_v39, %v44_v37  ;;  %v47_v49 = vld [vmem:[%s1687_s0 + $0x58] sm:$0xff] }
   0xd   :  { %v77_v46 = vadd.f32 %v61_v42, %v45_v38  ;;  %v1217_v47 = vld [vmem:[%s1688_s6 + $0x28] sm:$0xff]   ;;  %v62_v50 = vld [vmem:[%s1687_s0 + $0xd0] sm:$0xff]  ;;  %v63_v51 = vld [vmem:[%s1687_s0 + $0xd8] sm:$0xff]  ;;  %v135_v52 = vpack.c.bf16 %v75_v44, %v74_v43 }
   0xe   :  { %v48_v53 = vld [vmem:[%s1687_s0 + $0x60] sm:$0xff]  ;;  %v49_v54 = vld [vmem:[%s1687_s0 + $0x68] sm:$0xff]  ;;  %v1218_v58 = vld [vmem:[%s1688_s6 + $0x30] sm:$0xff]   ;;  %v78_v59 = vadd.f32 %v62_v50, %v46_v48  ;;  %v79_v60 = vadd.f32 %v63_v51, %v47_v49 }
   0xf   :  { %1067 = vmatpush3.bf16.msra.mxu0 %v1207_v3  ;;  %1097 = vmatpush3.bf16.msra.mxu1 %v1214_v24  ;;  %v64_v55 = vld [vmem:[%s1687_s0 + $0xe0] sm:$0xff]  ;;  %v136_v56 = vpack.c.bf16 %v77_v46, %v76_v45  ;;  %v65_v57 = vld [vmem:[%s1687_s0 + $0xe8] sm:$0xff]  ;;  %v1219_v63 = vld [vmem:[%s1688_s6 + $0x38] sm:$0xff]  }
  0x10   :  { %1068 = vmatprep.subr.bf16.mxu0 %v1208_v10  ;;  %1098 = vmatprep.subr.bf16.mxu1 %v1215_v28  ;;  %v80_v61 = vadd.f32 %v64_v55, %v48_v53  ;;  %v81_v62 = vadd.f32 %v65_v57, %v49_v54  ;;  %v137_v0 = vpack.c.bf16 %v79_v60, %v78_v59  ;;  %v50_v1 = vld [vmem:[%s1687_s0 + $0x70] sm:$0xff]  ;;  %v51_v2 = vld [vmem:[%s1687_s0 + $0x78] sm:$0xff]  ;;  %v1221_v6 = vld [vmem:[%s1690_s5] sm:$0xff]  }
  0x11   :  { %v66_v4 = vld [vmem:[%s1687_s0 + $0xf0] sm:$0xff]  ;;  %v67_v5 = vld [vmem:[%s1687_s0 + $0xf8] sm:$0xff]  ;;  %v1222_v7 = vld [vmem:[%s1689_s2 + $0x8] sm:$0xff]  }
  0x12   :  { %v138_v3 = vpack.c.bf16 %v81_v62, %v80_v61  ;;  %v82_v8 = vadd.f32 %v66_v4, %v50_v1  ;;  %v83_v9 = vadd.f32 %v67_v5, %v51_v2  ;;  %v1223_v11 = vld [vmem:[%s1690_s5 + $0x8] sm:$0xff]   ;;  %v1226_v14 = vld [vmem:[%s1689_s2 + $0x18] sm:$0xff]   ;;  %v1228_v15 = vld [vmem:[%s1689_s2 + $0x20] sm:$0xff]  }
  0x13   :  { %1069 = vmatpush3.bf16.msra.mxu0 %v1208_v10  ;;  %1099 = vmatpush3.bf16.msra.mxu1 %v1215_v28  ;;  %v1224_v10 = vld [vmem:[%s1689_s2 + $0x10] sm:$0xff]   ;;  %v1227_v16 = vld [vmem:[%s1690_s5 + $0x18] sm:$0xff]   ;;  %v1229_v17 = vld [vmem:[%s1690_s5 + $0x20] sm:$0xff]  }
  0x14   :  { %1070 = vmatprep.subr.bf16.mxu0 %v1209_v12  ;;  %1100 = vmatprep.subr.bf16.mxu1 %v1216_v41  ;;  %v1230_v18 = vld [vmem:[%s1689_s2 + $0x28] sm:$0xff]   ;;  %v1233_v21 = vld [vmem:[%s1690_s5 + $0x30] sm:$0xff]   ;;  %v1234_v22 = vld [vmem:[%s1689_s2 + $0x38] sm:$0xff]  }
  0x15   :  { %v1231_v19 = vld [vmem:[%s1690_s5 + $0x28] sm:$0xff]   ;;  %v1235_v23 = vld [vmem:[%s1690_s5 + $0x38] sm:$0xff]   ;;  %v1236_v24 = vld [vmem:[%s1691_s8] sm:$0xff]  }
  0x16   :  { %v1237_v25 = vld [vmem:[%s1691_s8 + $0x8] sm:$0xff]   ;;  %v1238_v26 = vld [vmem:[%s1691_s8 + $0x10] sm:$0xff]   ;;  %v1239_v27 = vld [vmem:[%s1691_s8 + $0x18] sm:$0xff]  }
  0x17   :  { %1071 = vmatpush3.bf16.msra.mxu0 %v1209_v12  ;;  %1101 = vmatpush3.bf16.msra.mxu1 %v1216_v41  ;;  %v139_v12 = vpack.c.bf16 %v83_v9, %v82_v8  ;;  %v1240_v28 = vld [vmem:[%s1691_s8 + $0x20] sm:$0xff]   ;;  %v1241_v29 = vld [vmem:[%s1691_s8 + $0x28] sm:$0xff]   ;;  %v86_v30 = vld [vmem:[%s1692_s1 + $0x10] sm:$0xff] }
  0x18   :  { %1072 = vmatprep.subr.bf16.mxu0 %v1210_v13  ;;  %1102 = vmatprep.subr.bf16.mxu1 %v1217_v47  ;;  %v102_v31 = vld [vmem:[%s1692_s1 + $0x90] sm:$0xff]  ;;  %v84_v32 = vld [vmem:[%s1692_s1] sm:$0xff]  ;;  %v87_v33 = vld [vmem:[%s1692_s1 + $0x18] sm:$0xff] }
  0x19   :  { %v103_v34 = vld [vmem:[%s1692_s1 + $0x98] sm:$0xff]  ;;  %v100_v35 = vld [vmem:[%s1692_s1 + $0x80] sm:$0xff]  ;;  %v101_v37 = vld [vmem:[%s1692_s1 + $0x88] sm:$0xff]  ;;  %v118_v38 = vadd.f32 %v102_v31, %v86_v30 }
  0x1a   :  { %v119_v39 = vadd.f32 %v103_v34, %v87_v33  ;;  %v116_v41 = vadd.f32 %v100_v35, %v84_v32  ;;  %v90_v45 = vld [vmem:[%s1692_s1 + $0x30] sm:$0xff]  ;;  %v88_v50 = vld [vmem:[%s1692_s1 + $0x20] sm:$0xff]  ;;  %v91_v51 = vld [vmem:[%s1692_s1 + $0x38] sm:$0xff] }
  0x1b   :  { %1073 = vmatpush3.bf16.msra.mxu0 %v1210_v13  ;;  %1103 = vmatpush3.bf16.msra.mxu1 %v1217_v47  ;;  %v1225_v13 = vld [vmem:[%s1690_s5 + $0x10] sm:$0xff]   ;;  %v104_v54 = vld [vmem:[%s1692_s1 + $0xa0] sm:$0xff]  ;;  %v89_v55 = vld [vmem:[%s1692_s1 + $0x28] sm:$0xff] }
  0x1c   :  { %1074 = vmatprep.subr.bf16.mxu0 %v1211_v20  ;;  %1104 = vmatprep.subr.bf16.mxu1 %v1218_v58  ;;  %v106_v46 = vld [vmem:[%s1692_s1 + $0xb0] sm:$0xff]  ;;  %v120_v1 = vadd.f32 %v104_v54, %v88_v50 }
  0x1d   :  { %v122_v61 = vadd.f32 %v106_v46, %v90_v45  ;;  %v110_v8 = vld [vmem:[%s1692_s1 + $0xd0] sm:$0xff]  ;;  %v113_v45 = vld [vmem:[%s1692_s1 + $0xe8] sm:$0xff] }
  0x1e   :  { %v98_v33 = vld [vmem:[%s1692_s1 + $0x70] sm:$0xff] }
  0x1f   :  { %1075 = vmatpush3.bf16.msra.mxu0 %v1211_v20  ;;  %1105 = vmatpush3.bf16.msra.mxu1 %v1218_v58  ;;  %v1232_v20 = vld [vmem:[%s1689_s2 + $0x30] sm:$0xff]  }
  0x20   :  { %1106 = vmatprep.subr.bf16.mxu1 %v1219_v63  ;;  %1156 = vmatprep.subr.bf16.mxu0 %v1236_v24  ;;  %v114_v34 = vld [vmem:[%s1692_s1 + $0xf0] sm:$0xff] }
  0x21   :  { %v130_v50 = vadd.f32 %v114_v34, %v98_v33 }
  0x22   :  { %1077 = vmatmul.mubr.bf16.vlgmr.msra.gmra.mrb[0].mxu0 %v133_v36  ;;  %v85_v36 = vld [vmem:[%s1692_s1 + $0x8] sm:$0xff] }
  0x23   :  { %1080 = vmatprep.mubr.bf16.mxu0 %v134_v40  ;;  %1107 = vmatpush3.bf16.msra.mxu1 %v1219_v63  ;;  %v1536_v40 = vld [vmem:[%s1693_s4] ss:$0 sm:$0xff]  ;;  %v117_v42 = vadd.f32 %v101_v37, %v85_v36 }
  0x24   :  { %1124 = vmatprep.subr.bf16.mxu1 %v1221_v6  ;;  %1157 = vmatpush3.bf16.msra.mxu0 %v1236_v24  ;;  %v165_v43 = vmul.f32 %v1536_v40, %v118_v38  ;;  %v166_v44 = vmul.f32 %v1536_v40, %v119_v39  ;;  %v163_v48 = vmul.f32 %v1536_v40, %v116_v41  ;;  %v96_v38 = vld [vmem:[%s1692_s1 + $0x60] sm:$0xff]  ;;  %v99_v39 = vld [vmem:[%s1692_s1 + $0x78] sm:$0xff] }
  0x25   :  { %1158 = vmatprep.subr.bf16.mxu0 %v1237_v25  ;;  %v164_v49 = vmul.f32 %v1536_v40, %v117_v42  ;;  %v169_v5 = vmul.f32 %v1536_v40, %v122_v61  ;;  %v115_v41 = vld [vmem:[%s1692_s1 + $0xf8] sm:$0xff] }
  0x26   :  { %1109 = vmatmul.mubr.bf16.vlgmr.msra.gmra.mrb[0].mxu1 %v1222_v7  ;;  %v94_v7 = vld [vmem:[%s1692_s1 + $0x50] sm:$0xff] }
  0x27   :  { %1125 = vmatpush3.bf16.msra.mxu1 %v1221_v6  ;;  %1112 = vmatprep.mubr.bf16.mxu1 %v1224_v10  ;;  %v167_v10 = vmul.f32 %v1536_v40, %v120_v1 }
  0x28   :  { %1126 = vmatprep.subr.bf16.mxu1 %v1223_v11  ;;  %1159 = vmatpush3.bf16.msra.mxu0 %v1237_v25 }
  0x29   :  { %1160 = vmatprep.subr.bf16.mxu0 %v1238_v26 }
  0x2a   :  { %1081 = vmatmul.mubr.bf16.gmra.mrb[4].mxu0 %v135_v52  ;;  %v107_v52 = vld [vmem:[%s1692_s1 + $0xb8] sm:$0xff] }
  0x2b   :  { %1084 = vmatprep.mubr.bf16.mxu0 %v136_v56  ;;  %1127 = vmatpush3.bf16.msra.mxu1 %v1223_v11  ;;  %v105_v56 = vld [vmem:[%s1692_s1 + $0xa8] sm:$0xff]  ;;  %v123_v62 = vadd.f32 %v107_v52, %v91_v51  ;;  %v131_v51 = vadd.f32 %v115_v41, %v99_v39 }
  0x2c   :  { %1128 = vmatprep.subr.bf16.mxu1 %v1225_v13  ;;  %1161 = vmatpush3.bf16.msra.mxu0 %v1238_v26  ;;  %v121_v2 = vadd.f32 %v105_v56, %v89_v55 }
  0x2d   :  { %1162 = vmatprep.subr.bf16.mxu0 %v1239_v27  ;;  %v170_v6 = vmul.f32 %v1536_v40, %v123_v62 }
  0x2e   :  { %1113 = vmatmul.mubr.bf16.gmra.mrb[4].mxu1 %v1226_v14  ;;  %v168_v11 = vmul.f32 %v1536_v40, %v121_v2  ;;  %v111_v14 = vld [vmem:[%s1692_s1 + $0xd8] sm:$0xff] }
  0x2f   :  { %1129 = vmatpush3.bf16.msra.mxu1 %v1225_v13  ;;  %1116 = vmatprep.mubr.bf16.mxu1 %v1228_v15  ;;  %v95_v13 = vld [vmem:[%s1692_s1 + $0x58] sm:$0xff] }
  0x30   :  { %1130 = vmatprep.subr.bf16.mxu1 %v1227_v16  ;;  %1163 = vmatpush3.bf16.msra.mxu0 %v1239_v27  ;;  %v127_v24 = vadd.f32 %v111_v14, %v95_v13 }
  0x31   :  { %1164 = vmatprep.subr.bf16.mxu0 %v1240_v28 }
  0x32   :  { %1085 = vmatmul.mubr.bf16.gmra.mrb[8].mxu0 %v137_v0  ;;  %v174_v32 = vmul.f32 %v1536_v40, %v127_v24 }
  0x33   :  { %1088 = vmatprep.mubr.bf16.mxu0 %v138_v3  ;;  %1131 = vmatpush3.bf16.msra.mxu1 %v1227_v16  ;;  %v108_v16 = vld [vmem:[%s1692_s1 + $0xc0] sm:$0xff] }
  0x34   :  { %1132 = vmatprep.subr.bf16.mxu1 %v1229_v17  ;;  %1165 = vmatpush3.bf16.msra.mxu0 %v1240_v28 }
  0x35   :  { %1166 = vmatprep.subr.bf16.mxu0 %v1241_v29 }
  0x36   :  { %1117 = vmatmul.mubr.bf16.gmra.mrb[8].mxu1 %v1230_v18  ;;  %v109_v18 = vld [vmem:[%s1692_s1 + $0xc8] sm:$0xff] }
  0x37   :  { %1133 = vmatpush3.bf16.msra.mxu1 %v1229_v17  ;;  %1120 = vmatprep.mubr.bf16.mxu1 %v1232_v20  ;;  %v93_v17 = vld [vmem:[%s1692_s1 + $0x48] sm:$0xff] }
  0x38   :  { %1134 = vmatprep.subr.bf16.mxu1 %v1231_v19  ;;  %1167 = vmatpush3.bf16.msra.mxu0 %v1241_v29  ;;  %v125_v28 = vadd.f32 %v109_v18, %v93_v17 }
  0x3a   :  { %1089 = vmatmul.mubr.bf16.gmra.mrb[12].mxu0 %v139_v12  ;;  %v92_v12 = vld [vmem:[%s1692_s1 + $0x40] sm:$0xff]  ;;  %v172_v37 = vmul.f32 %v1536_v40, %v125_v28 }
  0x3b   :  { %1135 = vmatpush3.bf16.msra.mxu1 %v1231_v19  ;;  %v124_v27 = vadd.f32 %v108_v16, %v92_v12 }
  0x3c   :  { %1136 = vmatprep.subr.bf16.mxu1 %v1233_v21 }
  0x3d   :  { %v171_v36 = vmul.f32 %v1536_v40, %v124_v27 }
  0x3e   :  { %1121 = vmatmul.mubr.bf16.gmra.mrb[12].mxu1 %v1234_v22 }
  0x3f   :  { %1137 = vmatpush3.bf16.msra.mxu1 %v1233_v21 }
  0x40   :  { %1138 = vmatprep.subr.bf16.mxu1 %v1235_v23 }
  0x43   :  { %1139 = vmatpush3.bf16.msra.mxu1 %v1235_v23  ;;  %v126_v23 = vadd.f32 %v110_v8, %v94_v7  ;;  %v1242_v8 = vld [vmem:[%s1691_s8 + $0x30] sm:$0xff]  }
  0x44   :  { %1168 = vmatprep.subr.bf16.mxu0 %v1242_v8 }
  0x45   :  { %v173_v31 = vmul.f32 %v1536_v40, %v126_v23  ;;  %1169 = vmatpush3.bf16.msra.mxu0 %v1242_v8 }
  0xf5   :  { %v1078_v47 = vpop.f32.mrb[0].mxu0 }
  0xf6   :  { %v261_v53 = vpop.f32.mrb[1].mxu0  ;;  %v270_v58 = vadd.f32 %v1078_v47, %v165_v43  ;;  %v112_v43 = vld [vmem:[%s1692_s1 + $0xe0] sm:$0xff] }
  0xf7   :  { %v1079_v57 = vpop.f32.mrb[2].mxu0  ;;  %v262_v63 = vadd.f32 %v261_v53, %v163_v48  ;;  %v128_v54 = vadd.f32 %v112_v43, %v96_v38 }
  0xf8   :  { %v273_v59 = vadd.f32 %v1079_v57, %v166_v44  ;;  %v264_v60 = vpop.f32.mrb[3].mxu0  ;;  %v97_v44 = vld [vmem:[%s1692_s1 + $0x68] sm:$0xff] }
  0xf9   :  { %v265_v0 = vadd.f32 %v264_v60, %v164_v49  ;;  %v129_v55 = vadd.f32 %v113_v45, %v97_v44  ;;  %v175_v61 = vmul.f32 %v1536_v40, %v128_v54 }
  0xfa   :  { %v325_v3 = vpack.c.bf16 %v273_v59, %v270_v58  ;;  %v177_v58 = vmul.f32 %v1536_v40, %v130_v50  ;;  %v178_v59 = vmul.f32 %v1536_v40, %v131_v51 }
  0xfb   :  { %v324_v4 = vpack.c.bf16 %v265_v0, %v262_v63  ;;  %v176_v62 = vmul.f32 %v1536_v40, %v129_v55  ;;  %v1243_v40 = vld [vmem:[%s1691_s8 + $0x38] sm:$0xff]  }
  0xfc   :  { %1170 = vmatprep.subr.bf16.mxu0 %v1243_v40 }
  0xfd   :  { %v1082_v9 = vpop.f32.mrb[4].mxu0  ;;  %1140 = vmatprep.mubr.bf16.mxu1 %v324_v4  ;;  %1171 = vmatpush3.bf16.msra.mxu0 %v1243_v40 }
  0xfe   :  { %v277_v15 = vpop.f32.mrb[5].mxu0  ;;  %1141 = vmatmul.mubr.bf16.vlgmr.msra.gmra.mrb[0].mxu1 %v325_v3  ;;  %v286_v20 = vadd.f32 %v1082_v9, %v169_v5  ;;  %v986_v9 = vld [vmem:[%s1694_s7] ss:$0 sm:$0xff] }
  0xff   :  { %v1083_v19 = vpop.f32.mrb[6].mxu0  ;;  %v278_v25 = vadd.f32 %v277_v15, %v167_v10 }
 0x100   :  { %v289_v21 = vadd.f32 %v1083_v19, %v170_v6  ;;  %v280_v22 = vpop.f32.mrb[7].mxu0 }
 0x101   :  { %v281_v26 = vadd.f32 %v280_v22, %v168_v11 }
 0x102   :  { %v327_v29 = vpack.c.bf16 %v289_v21, %v286_v20 }
 0x103   :  { %v326_v30 = vpack.c.bf16 %v281_v26, %v278_v25 }
 0x105   :  { %v1086_v35 = vpop.f32.mrb[8].mxu0  ;;  %1144 = vmatprep.mubr.bf16.mxu1 %v326_v30 }
 0x106   :  { %v293_v42 = vpop.f32.mrb[9].mxu0  ;;  %1145 = vmatmul.mubr.bf16.gmra.mrb[4].mxu1 %v327_v29  ;;  %v302_v47 = vadd.f32 %v1086_v35, %v173_v31 }
 0x107   :  { %v1087_v46 = vpop.f32.mrb[10].mxu0  ;;  %v294_v52 = vadd.f32 %v293_v42, %v171_v36 }
 0x108   :  { %v305_v48 = vadd.f32 %v1087_v46, %v174_v32  ;;  %v296_v49 = vpop.f32.mrb[11].mxu0 }
 0x109   :  { %v297_v53 = vadd.f32 %v296_v49, %v172_v37 }
 0x10a   :  { %v329_v56 = vpack.c.bf16 %v305_v48, %v302_v47 }
 0x10b   :  { %v328_v57 = vpack.c.bf16 %v297_v53, %v294_v52 }
 0x10d   :  { %v1090_v60 = vpop.f32.mrb[12].mxu0  ;;  %1148 = vmatprep.mubr.bf16.mxu1 %v328_v57 }
 0x10e   :  { %v309_v63 = vpop.f32.mrb[13].mxu0  ;;  %1149 = vmatmul.mubr.bf16.gmra.mrb[8].mxu1 %v329_v56  ;;  %v318_v1 = vadd.f32 %v1090_v60, %v177_v58 }
 0x10f   :  { %v1091_v0 = vpop.f32.mrb[14].mxu0  ;;  %v310_v4 = vadd.f32 %v309_v63, %v175_v61 }
 0x110   :  { %v321_v2 = vadd.f32 %v1091_v0, %v178_v59  ;;  %v312_v3 = vpop.f32.mrb[15].mxu0 }
 0x111   :  { %v313_v5 = vadd.f32 %v312_v3, %v176_v62  ;;  %v987_v3 = vld [vmem:[%s1695_s9] ss:$0 sm:$0xff] }
 0x112   :  { %v331_v6 = vpack.c.bf16 %v321_v2, %v318_v1 }
 0x113   :  { %v330_v7 = vpack.c.bf16 %v313_v5, %v310_v4 }
 0x115   :  { %1152 = vmatprep.mubr.bf16.mxu1 %v330_v7 }
 0x116   :  { %1153 = vmatmul.mubr.bf16.gmra.mrb[12].mxu1 %v331_v6 }
 0x1d1   :  { %v1142_v10 = vpop.f32.mrb[0].mxu1 }
 0x1d2   :  { %v727_v11 = vadd.f32 %v1142_v10, %v986_v9  ;;  %v655_v12 = vpop.f32.mrb[1].mxu1 }
 0x1d3   :  { %v725_v13 = vadd.f32 %v986_v9, %v655_v12  ;;  %v1143_v14 = vpop.f32.mrb[2].mxu1 }
 0x1d4   :  { %v728_v15 = vadd.f32 %v1143_v14, %v986_v9  ;;  %v658_v16 = vpop.f32.mrb[3].mxu1  ;;  %v743_v18 = vmax.f32 %v727_v11, 0.0 }
 0x1d5   :  { %v726_v17 = vadd.f32 %v986_v9, %v658_v16  ;;  %v741_v20 = vmax.f32 %v725_v13, 0.0 }
 0x1d6   :  { %v744_v19 = vmax.f32 %v728_v15, 0.0 }
 0x1d7   :  { %v742_v21 = vmax.f32 %v726_v17, 0.0 }
 0x1d8   :  { %v758_v22 = vpack.c.bf16 %v744_v19, %v743_v18 }
 0x1d9   :  { %v757_v23 = vpack.c.bf16 %v742_v21, %v741_v20  ;;  %v1146_v24 = vpop.f32.mrb[4].mxu1 }
 0x1da   :  { %v731_v25 = vadd.f32 %v1146_v24, %v986_v9  ;;  %v671_v26 = vpop.f32.mrb[5].mxu1 }
 0x1db   :  { %v729_v27 = vadd.f32 %v986_v9, %v671_v26  ;;  %v1147_v28 = vpop.f32.mrb[6].mxu1  ;;  %1172 = vmatprep.mubr.bf16.mxu0 %v757_v23 }
 0x1dc   :  { %v732_v29 = vadd.f32 %v1147_v28, %v986_v9  ;;  %v674_v30 = vpop.f32.mrb[7].mxu1  ;;  %1173 = vmatmul.mubr.bf16.vlgmr.msra.gmra.mrb[16].mxu0 %v758_v22  ;;  %v747_v32 = vmax.f32 %v731_v25, 0.0 }
 0x1dd   :  { %v730_v31 = vadd.f32 %v986_v9, %v674_v30  ;;  %v745_v34 = vmax.f32 %v729_v27, 0.0 }
 0x1de   :  { %v748_v33 = vmax.f32 %v732_v29, 0.0 }
 0x1df   :  { %v746_v35 = vmax.f32 %v730_v31, 0.0 }
 0x1e0   :  { %v760_v36 = vpack.c.bf16 %v748_v33, %v747_v32 }
 0x1e1   :  { %v759_v37 = vpack.c.bf16 %v746_v35, %v745_v34  ;;  %v1150_v38 = vpop.f32.mrb[8].mxu1 }
 0x1e2   :  { %v735_v39 = vadd.f32 %v1150_v38, %v986_v9  ;;  %v687_v41 = vpop.f32.mrb[9].mxu1 }
 0x1e3   :  { %v733_v42 = vadd.f32 %v986_v9, %v687_v41  ;;  %v1151_v43 = vpop.f32.mrb[10].mxu1  ;;  %1176 = vmatprep.mubr.bf16.mxu0 %v759_v37 }
 0x1e4   :  { %v736_v44 = vadd.f32 %v1151_v43, %v986_v9  ;;  %v690_v45 = vpop.f32.mrb[11].mxu1  ;;  %1177 = vmatmul.mubr.bf16.gmra.mrb[20].mxu0 %v760_v36  ;;  %v751_v47 = vmax.f32 %v735_v39, 0.0 }
 0x1e5   :  { %v734_v46 = vadd.f32 %v986_v9, %v690_v45  ;;  %v749_v49 = vmax.f32 %v733_v42, 0.0 }
 0x1e6   :  { %v752_v48 = vmax.f32 %v736_v44, 0.0 }
 0x1e7   :  { %v750_v50 = vmax.f32 %v734_v46, 0.0 }
 0x1e8   :  { %v762_v51 = vpack.c.bf16 %v752_v48, %v751_v47 }
 0x1e9   :  { %v761_v52 = vpack.c.bf16 %v750_v50, %v749_v49  ;;  %v1154_v53 = vpop.f32.mrb[12].mxu1 }
 0x1ea   :  { %v739_v54 = vadd.f32 %v1154_v53, %v986_v9  ;;  %v703_v55 = vpop.f32.mrb[13].mxu1 }
 0x1eb   :  { %v737_v56 = vadd.f32 %v986_v9, %v703_v55  ;;  %v1155_v57 = vpop.f32.mrb[14].mxu1  ;;  %1180 = vmatprep.mubr.bf16.mxu0 %v761_v52 }
 0x1ec   :  { %v740_v58 = vadd.f32 %v1155_v57, %v986_v9  ;;  %v706_v59 = vpop.f32.mrb[15].mxu1  ;;  %1181 = vmatmul.mubr.bf16.gmra.mrb[24].mxu0 %v762_v51  ;;  %v755_v61 = vmax.f32 %v739_v54, 0.0 }
 0x1ed   :  { %v738_v60 = vadd.f32 %v986_v9, %v706_v59  ;;  %v753_v63 = vmax.f32 %v737_v56, 0.0 }
 0x1ee   :  { %v756_v62 = vmax.f32 %v740_v58, 0.0 }
 0x1ef   :  { %v754_v0 = vmax.f32 %v738_v60, 0.0 }
 0x1f0   :  { %v764_v1 = vpack.c.bf16 %v756_v62, %v755_v61 }
 0x1f1   :  { %v763_v2 = vpack.c.bf16 %v754_v0, %v753_v63 }
 0x1f3   :  { %1184 = vmatprep.mubr.bf16.mxu0 %v763_v2 }
 0x1f4   :  { %1185 = vmatmul.mubr.bf16.gmra.mrb[28].mxu0 %v764_v1 }
 0x2af   :  { %v1174_v4 = vpop.f32.mrb[16].mxu0 }
 0x2b0   :  { %v879_v5 = vadd.f32 %v1174_v4, %v987_v3  ;;  %v870_v6 = vpop.f32.mrb[17].mxu0 }
 0x2b1   :  { %v871_v7 = vadd.f32 %v987_v3, %v870_v6  ;;  %v1175_v8 = vpop.f32.mrb[18].mxu0 }
 0x2b2   :  { %935 = vst [vmem:[%s1696_s10 + $0x10] sm:$0xff] %v879_v5  ;;  %v882_v40 = vadd.f32 %v1175_v8, %v987_v3  ;;  %v873_v9 = vpop.f32.mrb[19].mxu0 }
 0x2b3   :  { %933 = vst [vmem:[%s1696_s10] sm:$0xff] %v871_v7  ;;  %v874_v10 = vadd.f32 %v987_v3, %v873_v9 }
 0x2b4   :  { %936 = vst [vmem:[%s1696_s10 + $0x18] sm:$0xff] %v882_v40 }
 0x2b5   :  { %934 = vst [vmem:[%s1696_s10 + $0x8] sm:$0xff] %v874_v10 }
 0x2b7   :  { %v1178_v11 = vpop.f32.mrb[20].mxu0 }
 0x2b8   :  { %v895_v12 = vadd.f32 %v1178_v11, %v987_v3  ;;  %v886_v13 = vpop.f32.mrb[21].mxu0 }
 0x2b9   :  { %v887_v14 = vadd.f32 %v987_v3, %v886_v13  ;;  %v1179_v15 = vpop.f32.mrb[22].mxu0 }
 0x2ba   :  { %939 = vst [vmem:[%s1696_s10 + $0x30] sm:$0xff] %v895_v12  ;;  %v898_v16 = vadd.f32 %v1179_v15, %v987_v3  ;;  %v889_v17 = vpop.f32.mrb[23].mxu0 }
 0x2bb   :  { %937 = vst [vmem:[%s1696_s10 + $0x20] sm:$0xff] %v887_v14  ;;  %v890_v18 = vadd.f32 %v987_v3, %v889_v17 }
 0x2bc   :  { %940 = vst [vmem:[%s1696_s10 + $0x38] sm:$0xff] %v898_v16 }
 0x2bd   :  { %938 = vst [vmem:[%s1696_s10 + $0x28] sm:$0xff] %v890_v18 }
 0x2bf   :  { %v1182_v19 = vpop.f32.mrb[24].mxu0 }
 0x2c0   :  { %v911_v20 = vadd.f32 %v1182_v19, %v987_v3  ;;  %v902_v21 = vpop.f32.mrb[25].mxu0 }
 0x2c1   :  { %v903_v22 = vadd.f32 %v987_v3, %v902_v21  ;;  %v1183_v23 = vpop.f32.mrb[26].mxu0 }
 0x2c2   :  { %943 = vst [vmem:[%s1696_s10 + $0x50] sm:$0xff] %v911_v20  ;;  %v914_v24 = vadd.f32 %v1183_v23, %v987_v3  ;;  %v905_v25 = vpop.f32.mrb[27].mxu0 }
 0x2c3   :  { %941 = vst [vmem:[%s1696_s10 + $0x40] sm:$0xff] %v903_v22  ;;  %v906_v26 = vadd.f32 %v987_v3, %v905_v25 }
 0x2c4   :  { %944 = vst [vmem:[%s1696_s10 + $0x58] sm:$0xff] %v914_v24 }
 0x2c5   :  { %942 = vst [vmem:[%s1696_s10 + $0x48] sm:$0xff] %v906_v26 }
 0x2c7   :  { %v1186_v27 = vpop.f32.mrb[28].mxu0 }
 0x2c8   :  { %v927_v28 = vadd.f32 %v1186_v27, %v987_v3  ;;  %v918_v29 = vpop.f32.mrb[29].mxu0 }
 0x2c9   :  { %v919_v30 = vadd.f32 %v987_v3, %v918_v29  ;;  %v1187_v31 = vpop.f32.mrb[30].mxu0 }
 0x2ca   :  { %947 = vst [vmem:[%s1696_s10 + $0x70] sm:$0xff] %v927_v28  ;;  %v930_v32 = vadd.f32 %v1187_v31, %v987_v3  ;;  %v921_v33 = vpop.f32.mrb[31].mxu0 }
 0x2cb   :  { %945 = vst [vmem:[%s1696_s10 + $0x60] sm:$0xff] %v919_v30  ;;  %v922_v34 = vadd.f32 %v987_v3, %v921_v33 }
 0x2cc   :  { %948 = vst [vmem:[%s1696_s10 + $0x78] sm:$0xff] %v930_v32 }
 0x2cd   :  { %946 = vst [vmem:[%s1696_s10 + $0x68] sm:$0xff] %v922_v34 }

// kernel: mpnn_layer_forward.2
= control target key start
LH: loop header
LB: loop body
LE: loop exit
PB: predicated region body
PF: predicated region fallthrough
CT: control target
= control target key end

     0   :  { %s3708_s24 = smov 0   ;;  %s3710_s25 = smov 0   ;;  %s6605_s0 = inlined_call_operand.vmem [shape: s32[1,1024], index: 0, kind: input, shape index: {}]   ;;  %s6606_s1 = inlined_call_operand.vmem [shape: s32[1,1024], index: 1, kind: input, shape index: {}]   ;;  %s6607_s2 = inlined_call_operand.vmem [shape: bf16[1024,128], index: 2, kind: input, shape index: {}]   ;;  %s6608_s3 = inlined_call_operand.vmem [shape: bf16[256,128], index: 3, kind: input, shape index: {}]   ;;  %s6609_s4 = inlined_call_operand.vmem [shape: bf16[128,128], index: 4, kind: input, shape index: {}]   ;;  %s6610_s5 = inlined_call_operand.vmem [shape: f32[1,128], index: 5, kind: input, shape index: {}]   ;;  %s6611_s6 = inlined_call_operand.vmem [shape: f32[2,128,128], index: 6, kind: output, shape index: {0}]   ;;  %s6612_s7 = inlined_call_operand.vmem [shape: f32[2,128,128], index: 7, kind: output, shape index: {1}]  }
   0x1   :  { %s3712_s26 = smov 0  }
   0x2 LB: > { %s30_s27 = sadd.s32 1, %s3659_s25  ;;  %p3047_p0 = scmp.ge.s32.totalorder %s3663_s26, 1  ;;  %s3663_s26 = sphi %s3712_s26, %s18_s26   ;;  %s3659_s25 = sphi %s3710_s25, %s7355_s25   ;;  %s3655_s24 = sphi %s3708_s24, %s7354_s24  }
   0x3   : > { %p32_p1 = scmp.ge.s32.totalorder %s30_s27, 2  ;;  %p285_p2 = scmp.lt.s32.totalorder %s3663_s26, 3 }
   0x5   : > { %s7357_s27 = smov (%p32_p1, %s30_s27), 0  ;;  %p286_p3 = pnand %p3047_p0, %p285_p2 }
   0x7   : > { %289 = sbr.rel (%p286_p3) target bundleno = 918 (0x396), region = 44 }
   0xe   : > { %s3048_s28 = sshll.u32 %s3655_s24, 2  ;;  %v404_v0 = vlaneseq  ;;  %v3584_v1 = vld [vmem:[%s6608_s3] sm:$0xff]   ;;  %v6617_v2 = vmov 0   ;;  %v3585_v4 = vld [vmem:[%s6608_s3 + $0x8] sm:$0xff]   ;;  %v3586_v8 = vld [vmem:[%s6608_s3 + $0x10] sm:$0xff]   ;;  %v6766_v28 = vmov 0 }
   0xf   : > { %p335_p4 = scmp.lt.s32.totalorder %s3048_s28, 7  ;;  %2039 = vmatprep.subr.bf16.mxu1 %v6617_v2  ;;  %v3587_v24 = vld [vmem:[%s6608_s3 + $0x18] sm:$0xff]   ;;  %v3592_v27 = vld [vmem:[%s6609_s4] sm:$0xff]   ;;  %v6769_v32 = vmov 0  ;;  %v6619_v33 = vmov 0.0   ;;  %v3594_v35 = vld [vmem:[%s6609_s4 + $0x8] sm:$0xff]  }
  0x10   : > { %v3733_v3 = vshrl.u32 %v404_v0, 7  ;;  %2040 = vmatpush1.bf16.msra.mxu1 %v3584_v1  ;;  %v3588_v31 = vld [vmem:[%s6608_s3 + $0x20] sm:$0xff]   ;;  %3477 = vmatprep.subr.bf16.mxu0 %v3592_v27  ;;  %v6772_v36 = vmov 0  ;;  %v6775_v38 = vmov 0  ;;  %v3589_v41 = vld [vmem:[%s6608_s3 + $0x28] sm:$0xff]   ;;  %v3596_v44 = vld [vmem:[%s6609_s4 + $0x10] sm:$0xff]  }
  0x11   : > { %s7359_s28 = smov (!%p335_p4, %s3048_s28), 7  ;;  %2041 = vmatprep.subr.bf16.mxu1 %v6617_v2  ;;  %3478 = vmatpush3.bf16.msra.mxu0 %v3592_v27  ;;  %s3050_s11 = sshll.u32 %s3655_s24, 6  ;;  %v6780_v48 = vmov 0  ;;  %v3598_v49 = vld [vmem:[%s6609_s4 + $0x18] sm:$0xff]   ;;  %v6784_v51 = vmov 0  ;;  %v6789_v53 = vmov 0 }
  0x12   : > { %v439_v5 = vsub.s32 0, %v3733_v3  ;;  %v443_v6 = vsub.s32 1, %v3733_v3  ;;  %s3744_s12 = scalar_lea.vmem %s6605_s0, %s7359_s28  ;;  %s344_s15 = scalar_lea.vmem %s6606_s1, %s7359_s28  ;;  %v3750_v7 = vadd.s32 128, %v3733_v3  ;;  %v3759_v11 = vadd.s32 136, %v3733_v3  ;;  %3479 = vmatprep.subr.bf16.mxu0 %v3594_v35  ;;  %v3590_v55 = vld [vmem:[%s6608_s3 + $0x30] sm:$0xff]   ;;  %v3591_v61 = vld [vmem:[%s6608_s3 + $0x38] sm:$0xff]  }
  0x13   : > { %v3756_v9 = vld [vmem:[%s3744_s12] sm:$0xf]  ;;  %v3762_v12 = vadd.s32 8, %v3733_v3  ;;  %v3773_v16 = vadd.s32 144, %v3733_v3  ;;  %v3777_v17 = vadd.s32 152, %v3733_v3  ;;  %v3780_v18 = vadd.s32 16, %v3733_v3 }
  0x14   : > { %v403_v10 = vld [vmem:[%s344_s15] sm:$0xf]  ;;  %2042 = vmatpush1.bf16.msra.mxu1 %v3585_v4  ;;  %v3765_v13 = vrot.slane %v3756_v9, %v439_v5  ;;  %v3768_v14 = vrot.slane %v3756_v9, %v443_v6  ;;  %v3783_v19 = vadd.s32 24, %v3733_v3  ;;  %v3786_v20 = vadd.s32 160, %v3733_v3  ;;  %p3991_p5 = scmp.lt.s32.totalorder %s3050_s11, 127  ;;  %p355_p6 = scmp.lt.s32.totalorder %s3655_s24, 1 }
  0x15   : > { %v3770_v15 = vadd.s32 128, %v403_v10  ;;  %2043 = vmatprep.subr.bf16.mxu1 %v6617_v2  ;;  %v3797_v23 = vadd.s32 168, %v3733_v3  ;;  %v3805_v25 = vadd.s32 32, %v3733_v3  ;;  %v3808_v26 = vadd.s32 40, %v3733_v3  ;;  %3480 = vmatpush3.bf16.msra.mxu0 %v3594_v35  ;;  %v3600_v1 = vld [vmem:[%s6609_s4 + $0x20] sm:$0xff]  }
  0x16   : > { %vm517_vm0 = vcmp.eq.s32.totalorder %v3750_v7, %v3765_v13  ;;  %vm518_vm1 = vcmp.eq.s32.totalorder %v3750_v7, %v3768_v14  ;;  %vm521_vm2 = vcmp.eq.s32.totalorder %v3759_v11, %v3765_v13  ;;  %vm522_vm6 = vcmp.eq.s32.totalorder %v3759_v11, %v3768_v14  ;;  %3481 = vmatprep.subr.bf16.mxu0 %v3596_v44  ;;  %s7361_s11 = smov (!%p3991_p5, %s3050_s11), 127  ;;  %s7363_s24 = smov (!%p355_p6, %s3655_s24), 1 }
  0x17   : > { %v3791_v21 = vrot.slane %v3770_v15, %v439_v5  ;;  %v3794_v22 = vrot.slane %v3770_v15, %v443_v6  ;;  %v3834_v29 = vadd.s32 176, %v3733_v3  ;;  %v3837_v30 = vadd.s32 184, %v3733_v3  ;;  %s3051_s30 = sshll.u32 %s7361_s11, 2 }
  0x18   : > { %2044 = vmatpush1.bf16.msra.mxu1 %v3586_v8  ;;  %vm453_vm10 = vcmp.eq.s32.totalorder %v3733_v3, %v3765_v13  ;;  %vm457_vm11 = vcmp.eq.s32.totalorder %v3762_v12, %v3765_v13  ;;  %vm525_vm12 = vcmp.eq.s32.totalorder %v3773_v16, %v3765_v13  ;;  %v6793_v56 = vmov 0  ;;  %s4239_s13 = scalar_lea.vmem %s6607_s2, %s3051_s30 }
  0x19   : > { %2045 = vmatprep.subr.bf16.mxu1 %v6617_v2  ;;  %vm662_vm3 = vcmp.eq.s32.totalorder %v3750_v7, %v3791_v21  ;;  %vm663_vm4 = vcmp.eq.s32.totalorder %v3750_v7, %v3794_v22  ;;  %vm666_vm5 = vcmp.eq.s32.totalorder %v3759_v11, %v3791_v21  ;;  %vm667_vm7 = vcmp.eq.s32.totalorder %v3759_v11, %v3794_v22 }
  0x1a   : > { %vm3829_vm8 = vmor %vm517_vm0, %vm662_vm3  ;;  %vm598_vm14 = vcmp.eq.s32.totalorder %v3733_v3, %v3791_v21  ;;  %vm675_vm3 = vcmp.eq.s32.totalorder %v3777_v17, %v3794_v22  ;;  %vm610_vm0 = vcmp.eq.s32.totalorder %v3783_v19, %v3791_v21  ;;  %3482 = vmatpush3.bf16.msra.mxu0 %v3596_v44  ;;  %v4071_v0 = vadd.s32 48, %v3733_v3 }
  0x1b   : > { %v6767_v28 = vsel %vm3829_vm8, 4294967295, %v6766_v28  ;;  %vm3845_vm9 = vmor %vm518_vm1, %vm663_vm4  ;;  %v3120_v34 = vsel %vm3829_vm8, 1.0, %v6619_v33  ;;  %vm674_vm4 = vcmp.eq.s32.totalorder %v3777_v17, %v3791_v21  ;;  %3483 = vmatprep.subr.bf16.mxu0 %v3598_v49  ;;  %v6801_v5 = vmov 0 }
  0x1c   : > { %6768 = vst [vmem:[#allocation2_spill] sm:$0xff] %v6767_v28  ;;  %v6770_v32 = vsel %vm3845_vm9, 4294967295, %v6769_v32  ;;  %2046 = vmatpush1.bf16.msra.mxu1 %v3587_v24  ;;  %vm3867_vm13 = vmor %vm521_vm2, %vm666_vm5  ;;  %v3874_v37 = vsel %vm3845_vm9, 1.0, %v6619_v33  ;;  %vm602_vm2 = vcmp.eq.s32.totalorder %v3762_v12, %v3791_v21  ;;  %vm670_vm5 = vcmp.eq.s32.totalorder %v3773_v16, %v3791_v21  ;;  %v3612_v28 = vld [vmem:[%s4239_s13 + $0x20] sm:$0xff]  }
  0x1d   : > { %6771 = vst [vmem:[#allocation3_spill] sm:$0xff] %v6770_v32  ;;  %v6773_v36 = vsel %vm3867_vm13, 4294967295, %v6772_v36  ;;  %2047 = vmatprep.subr.bf16.mxu1 %v6617_v2  ;;  %vm3889_vm1 = vmor %vm522_vm6, %vm667_vm7  ;;  %v3124_v39 = vsel %vm3867_vm13, 1.0, %v6619_v33  ;;  %v3897_v40 = vadd.f32 %v3874_v37, %v3120_v34  ;;  %vm671_vm6 = vcmp.eq.s32.totalorder %v3773_v16, %v3794_v22 }
  0x1e   : > { %6774 = vst [vmem:[#allocation4_spill] sm:$0xff] %v6773_v36  ;;  %v6776_v38 = vsel %vm3889_vm1, 4294967295, %v6775_v38  ;;  %v3909_v42 = vsel %vm3889_vm1, 1.0, %v6619_v33  ;;  %v1142_v43 = vpack.c.bf16 %v3124_v39, %v3120_v34  ;;  %vm726_vm7 = vmor %vm453_vm10, %vm598_vm14  ;;  %vm606_vm14 = vcmp.eq.s32.totalorder %v3780_v18, %v3791_v21  ;;  %3484 = vmatpush3.bf16.msra.mxu0 %v3598_v49 }
  0x1f   : > { %6777 = vst [vmem:[#allocation5_spill] sm:$0xff] %v6776_v38  ;;  %6778 = vst [vmem:[#allocation6_spill] sm:$0xff] %v3897_v40  ;;  %v3923_v45 = vadd.f32 %v3909_v42, %v3124_v39  ;;  %v3056_v46 = vsel %vm726_vm7, 1.0, %v6619_v33  ;;  %vm678_vm10 = vcmp.eq.s32.totalorder %v3786_v20, %v3791_v21  ;;  %v4098_v6 = vadd.s32 56, %v3733_v3  ;;  %v3593_v39 = vld [vmem:[%s6608_s3 + $0x40] sm:$0xff]   ;;  %3485 = vmatprep.subr.bf16.mxu0 %v3600_v1 }
  0x20   : > { %2048 = vmatpush1.bf16.msra.mxu1 %v3588_v31  ;;  %1879 = vxpose.xlu0.c.b16.start [1/8] %v1142_v43, 128  ;;  %vm730_vm15 = vmor %vm457_vm11, %vm602_vm2  ;;  %v6805_v10 = vmov 0  ;;  %v6810_v27 = vmov 0  ;;  %v4136_v34 = vadd.s32 192, %v3733_v3  ;;  %v4139_v35 = vadd.s32 200, %v3733_v3 }
  0x21   : > { %6779 = vst [vmem:[#allocation7_spill] sm:$0xff] %v3923_v45  ;;  %2049 = vmatprep.subr.bf16.mxu1 %v6617_v2  ;;  %v3060_v47 = vsel %vm730_vm15, 1.0, %v6619_v33  ;;  %vm3959_vm11 = vmor %vm525_vm12, %vm670_vm5  ;;  %vm6783_vm12 = vcmp.eq.s32.totalorder %v3773_v16, %v3768_v14  ;;  %vm679_vm5 = vcmp.eq.s32.totalorder %v3786_v20, %v3794_v22  ;;  %vm6825_vm7 = vcmp.eq.s32.totalorder %v3834_v29, %v3765_v13 }
  0x22   : > { %v6781_v48 = vsel %vm3959_vm11, 4294967295, %v6780_v48  ;;  %v1110_v50 = vpack.c.bf16 %v3060_v47, %v3056_v46  ;;  %vm3978_vm15 = vmor %vm6783_vm12, %vm671_vm6  ;;  %v3128_v52 = vsel %vm3959_vm11, 1.0, %v6619_v33  ;;  %vm6788_vm6 = vcmp.eq.s32.totalorder %v3777_v17, %v3765_v13  ;;  %v3602_v46 = vld [vmem:[%s6609_s4 + $0x28] sm:$0xff]   ;;  %3486 = vmatpush3.bf16.msra.mxu0 %v3600_v1 }
  0x23   : > { %6782 = vst [vmem:[#allocation8_spill] sm:$0xff] %v6781_v48  ;;  %v6785_v51 = vsel %vm3978_vm15, 4294967295, %v6784_v51  ;;  %vm4001_vm12 = vmor %vm6788_vm6, %vm674_vm4  ;;  %v4008_v54 = vsel %vm3978_vm15, 1.0, %v6619_v33  ;;  %vm6792_vm4 = vcmp.eq.s32.totalorder %v3777_v17, %v3768_v14  ;;  %v4231_v1 = vadd.s32 64, %v3733_v3  ;;  %3487 = vmatprep.subr.bf16.mxu0 %v3602_v46  ;;  %v3611_v48 = vld [vmem:[%s4239_s13 + $0x18] sm:$0xff]  }
  0x24   : > { %6786 = vst [vmem:[#allocation9_spill] sm:$0xff] %v6785_v51  ;;  %v6790_v53 = vsel %vm4001_vm12, 4294967295, %v6789_v53  ;;  %2050 = vmatpush1.bf16.msra.mxu1 %v3589_v41  ;;  %1815 = vxpose.xlu1.c.b16.start [1/8] %v1110_v50, 128  ;;  %vm4025_vm6 = vmor %vm6792_vm4, %vm675_vm3  ;;  %v3132_v57 = vsel %vm4001_vm12, 1.0, %v6619_v33  ;;  %v4033_v58 = vadd.f32 %v4008_v54, %v3128_v52  ;;  %vm6797_vm3 = vcmp.eq.s32.totalorder %v3780_v18, %v3765_v13 }
  0x25   : > { %6791 = vst [vmem:[#allocation10_spill] sm:$0xff] %v6790_v53  ;;  %v6794_v56 = vsel %vm4025_vm6, 4294967295, %v6793_v56  ;;  %2051 = vmatprep.subr.bf16.mxu1 %v6617_v2  ;;  %v4043_v59 = vsel %vm4025_vm6, 1.0, %v6619_v33  ;;  %v1146_v60 = vpack.c.bf16 %v3132_v57, %v3128_v52  ;;  %vm734_vm4 = vmor %vm6797_vm3, %vm606_vm14  ;;  %vm6799_vm14 = vcmp.eq.s32.totalorder %v3783_v19, %v3765_v13 }
  0x26   : > { %6795 = vst [vmem:[#allocation11_spill] sm:$0xff] %v6794_v56  ;;  %6796 = vst [vmem:[#allocation12_spill] sm:$0xff] %v4033_v58  ;;  %v4059_v62 = vadd.f32 %v4043_v59, %v3132_v57  ;;  %v3064_v63 = vsel %vm734_vm4, 1.0, %v6619_v33  ;;  %v6815_v41 = vmov 0  ;;  %v6826_v57 = vmov 0  ;;  %3488 = vmatpush3.bf16.msra.mxu0 %v3602_v46  ;;  %v3606_v46 = vld [vmem:[%s6609_s4 + $0x38] sm:$0xff]  }
  0x27   : > { %vm738_vm3 = vmor %vm6799_vm14, %vm610_vm0  ;;  %1880 = vxpose.xlu0.c.b16.cont [2/8] %v1146_v60, 128  ;;  %vm6800_vm0 = vcmp.eq.s32.totalorder %v3786_v20, %v3765_v13  ;;  %vm6808_vm14 = vcmp.eq.s32.totalorder %v3797_v23, %v3791_v21  ;;  %v4321_v45 = vadd.s32 80, %v3733_v3  ;;  %v6857_v40 = vmov 0 }
  0x28   : > { %6798 = vst [vmem:[#allocation13_spill] sm:$0xff] %v4059_v62  ;;  %v3068_v4 = vsel %vm738_vm3, 1.0, %v6619_v33  ;;  %vm4089_vm4 = vmor %vm6800_vm0, %vm678_vm10  ;;  %2052 = vmatpush1.bf16.msra.mxu1 %v3590_v55  ;;  %vm6804_vm10 = vcmp.eq.s32.totalorder %v3786_v20, %v3768_v14  ;;  %v6849_v62 = vmov 0.0   ;;  %vm470_vm11 = vcmp.eq.s32.totalorder %v3805_v25, %v3768_v14 }
  0x29   : > { %v6802_v5 = vsel %vm4089_vm4, 4294967295, %v6801_v5  ;;  %v1114_v8 = vpack.c.bf16 %v3068_v4, %v3064_v63  ;;  %vm4106_vm3 = vmor %vm6804_vm10, %vm679_vm5  ;;  %v3136_v24 = vsel %vm4089_vm4, 1.0, %v6619_v33  ;;  %2053 = vmatprep.subr.bf16.mxu1 %v6617_v2  ;;  %vm6809_vm5 = vcmp.eq.s32.totalorder %v3797_v23, %v3765_v13  ;;  %v3604_v4 = vld [vmem:[%s6609_s4 + $0x30] sm:$0xff]  }
  0x2a   : > { %6803 = vst [vmem:[#allocation14_spill] sm:$0xff] %v6802_v5  ;;  %v6806_v10 = vsel %vm4106_vm3, 4294967295, %v6805_v10  ;;  %vm4124_vm10 = vmor %vm6809_vm5, %vm6808_vm14  ;;  %v4131_v31 = vsel %vm4106_vm3, 1.0, %v6619_v33  ;;  %vm6813_vm14 = vcmp.eq.s32.totalorder %v3797_v23, %v3794_v22  ;;  %vm6814_vm5 = vcmp.eq.s32.totalorder %v3797_v23, %v3768_v14  ;;  %3489 = vmatprep.subr.bf16.mxu0 %v3604_v4 }
  0x2b   : > { %6807 = vst [vmem:[#allocation15_spill] sm:$0xff] %v6806_v10  ;;  %v6811_v27 = vsel %vm4124_vm10, 4294967295, %v6810_v27  ;;  %1816 = vxpose.xlu1.c.b16.cont [2/8] %v1114_v8, 128  ;;  %vm4150_vm0 = vmor %vm6814_vm5, %vm6813_vm14  ;;  %v3140_v43 = vsel %vm4124_vm10, 1.0, %v6619_v33  ;;  %v4158_v44 = vadd.f32 %v4131_v31, %v3136_v24  ;;  %vm6819_vm14 = vcmp.eq.s32.totalorder %v3805_v25, %v3791_v21  ;;  %3490 = vmatpush3.bf16.msra.mxu0 %v3604_v4 }
  0x2c   : > { %6812 = vst [vmem:[#allocation16_spill] sm:$0xff] %v6811_v27  ;;  %v6816_v41 = vsel %vm4150_vm0, 4294967295, %v6815_v41  ;;  %v4170_v47 = vsel %vm4150_vm0, 1.0, %v6619_v33  ;;  %v1150_v49 = vpack.c.bf16 %v3140_v43, %v3136_v24  ;;  %vm6820_vm5 = vcmp.eq.s32.totalorder %v3805_v25, %v3765_v13  ;;  %2054 = vmatpush1.bf16.msra.mxu1 %v3591_v61  ;;  %3491 = vmatprep.subr.bf16.mxu0 %v3606_v46 }
  0x2d   : > { %6817 = vst [vmem:[#allocation17_spill] sm:$0xff] %v6816_v41  ;;  %6818 = vst [vmem:[#allocation18_spill] sm:$0xff] %v4158_v44  ;;  %v4184_v50 = vadd.f32 %v4170_v47, %v3140_v43  ;;  %vm6822_vm4 = vcmp.eq.s32.totalorder %v3808_v26, %v3791_v21  ;;  %vm6823_vm0 = vcmp.eq.s32.totalorder %v3808_v26, %v3765_v13  ;;  %2055 = vmatprep.subr.bf16.mxu1 %v6617_v2  ;;  %v6831_v61 = vmov 0 }
  0x2e   : > { %vm742_vm2 = vmor %vm6820_vm5, %vm6819_vm14  ;;  %vm622_vm14 = vcmp.eq.s32.totalorder %v4071_v0, %v3791_v21  ;;  %1881 = vxpose.xlu0.c.b16.cont [3/8] %v1150_v49, 128  ;;  %vm6824_vm10 = vcmp.eq.s32.totalorder %v3834_v29, %v3791_v21  ;;  %v6836_v8 = vmov 0  ;;  %v4261_v43 = vadd.s32 72, %v3733_v3  ;;  %v3595_v49 = vld [vmem:[%s6608_s3 + $0x48] sm:$0xff]  }
  0x2f   : > { %6821 = vst [vmem:[#allocation19_spill] sm:$0xff] %v4184_v50  ;;  %vm746_vm3 = vmor %vm6823_vm0, %vm6822_vm4  ;;  %v3072_v52 = vsel %vm742_vm2, 1.0, %v6619_v33  ;;  %vm6861_vm2 = vcmp.eq.s32.totalorder %v4139_v35, %v3791_v21  ;;  %v4402_v4 = vadd.s32 224, %v3733_v3  ;;  %3492 = vmatpush3.bf16.msra.mxu0 %v3606_v46  ;;  %v6884_v27 = vmov 0 }
  0x30   : > { %v3076_v55 = vsel %vm746_vm3, 1.0, %v6619_v33  ;;  %vm4205_vm4 = vmor %vm6825_vm7, %vm6824_vm10  ;;  %vm6829_vm3 = vcmp.eq.s32.totalorder %v3834_v29, %v3794_v22  ;;  %vm6830_vm7 = vcmp.eq.s32.totalorder %v3834_v29, %v3768_v14  ;;  %2056 = vmatpush1.bf16.msra.mxu1 %v3593_v39  ;;  %v6889_v46 = vmov 0 }
  0x31   : > { %v6827_v57 = vsel %vm4205_vm4, 4294967295, %v6826_v57  ;;  %v1118_v60 = vpack.c.bf16 %v3076_v55, %v3072_v52  ;;  %vm4221_vm10 = vmor %vm6830_vm7, %vm6829_vm3  ;;  %v3144_v63 = vsel %vm4205_vm4, 1.0, %v6619_v33  ;;  %vm6834_vm3 = vcmp.eq.s32.totalorder %v3837_v30, %v3791_v21  ;;  %2057 = vmatprep.subr.bf16.mxu1 %v6617_v2  ;;  %v3597_v2 = vld [vmem:[%s6608_s3 + $0x50] sm:$0xff]  }
  0x32   : > { %6828 = vst [vmem:[#allocation20_spill] sm:$0xff] %v6827_v57  ;;  %v6832_v61 = vsel %vm4221_vm10, 4294967295, %v6831_v61  ;;  %vm6835_vm7 = vcmp.eq.s32.totalorder %v3837_v30, %v3765_v13  ;;  %v4254_v24 = vsel %vm4221_vm10, 1.0, %v6619_v33  ;;  %v6841_v52 = vmov 0 }
  0x33   : > { %6833 = vst [vmem:[#allocation21_spill] sm:$0xff] %v6832_v61  ;;  %vm4247_vm0 = vmor %vm6835_vm7, %vm6834_vm3  ;;  %1817 = vxpose.xlu1.c.b16.cont [3/8] %v1118_v60, 128  ;;  %vm6839_vm3 = vcmp.eq.s32.totalorder %v3837_v30, %v3794_v22  ;;  %vm6840_vm7 = vcmp.eq.s32.totalorder %v3837_v30, %v3768_v14  ;;  %v4280_v55 = vadd.f32 %v4254_v24, %v3144_v63  ;;  %v4285_v60 = vadd.s32 208, %v3733_v3 }
  0x34   : > { %v6837_v8 = vsel %vm4247_vm0, 4294967295, %v6836_v8  ;;  %vm4272_vm5 = vmor %vm6840_vm7, %vm6839_vm3  ;;  %v3148_v39 = vsel %vm4247_vm0, 1.0, %v6619_v33  ;;  %vm6845_vm3 = vcmp.eq.s32.totalorder %v4071_v0, %v3765_v13  ;;  %vm6847_vm0 = vcmp.eq.s32.totalorder %v4098_v6, %v3791_v21  ;;  %2058 = vmatpush1.bf16.msra.mxu1 %v3595_v49 }
  0x35   : > { %6838 = vst [vmem:[#allocation22_spill] sm:$0xff] %v6837_v8  ;;  %v6842_v52 = vsel %vm4272_vm5, 4294967295, %v6841_v52  ;;  %6844 = vst [vmem:[#allocation24_spill] sm:$0xff] %v4280_v55  ;;  %v4291_v50 = vsel %vm4272_vm5, 1.0, %v6619_v33  ;;  %v1154_v44 = vpack.c.bf16 %v3148_v39, %v3144_v63  ;;  %v4302_v55 = vadd.s32 216, %v3733_v3  ;;  %v3608_v33 = vld [vmem:[%s4239_s13] sm:$0xff]  }
  0x36   : > { %6843 = vst [vmem:[#allocation23_spill] sm:$0xff] %v6842_v52  ;;  %vm750_vm7 = vmor %vm6845_vm3, %vm622_vm14  ;;  %v4309_v63 = vadd.f32 %v4291_v50, %v3148_v39  ;;  %vm6848_vm14 = vcmp.eq.s32.totalorder %v4098_v6, %v3765_v13  ;;  %vm6850_vm4 = vcmp.eq.s32.totalorder %v4136_v34, %v3791_v21  ;;  %3493 = vmatprep.mubr.bf16.mxu0 %v3608_v33  ;;  %v6863_v49 = vmov 0 }
  0x37   : > { %vm754_vm3 = vmor %vm6848_vm14, %vm6847_vm0  ;;  %v3080_v58 = vsel %vm750_vm7, 1.0, %v6849_v62  ;;  %1882 = vxpose.xlu0.c.b16.cont [4/8] %v1154_v44, 128  ;;  %vm6851_vm0 = vcmp.eq.s32.totalorder %v4136_v34, %v3765_v13  ;;  %v4381_v33 = vadd.s32 88, %v3733_v3  ;;  %vm6887_vm14 = vcmp.eq.s32.totalorder %v4302_v55, %v3791_v21 }
  0x38   : > { %6846 = vst [vmem:[#allocation25_spill] sm:$0xff] %v4309_v63  ;;  %v3084_v39 = vsel %vm754_vm3, 1.0, %v6849_v62  ;;  %vm4333_vm7 = vmor %vm6851_vm0, %vm6850_vm4  ;;  %v6852_v63 = vmov 0  ;;  %vm6855_vm3 = vcmp.eq.s32.totalorder %v4136_v34, %v3794_v22  ;;  %vm6856_vm4 = vcmp.eq.s32.totalorder %v4136_v34, %v3768_v14 }
  0x39   : > { %v6853_v63 = vsel %vm4333_vm7, 4294967295, %v6852_v63  ;;  %v1122_v44 = vpack.c.bf16 %v3084_v39, %v3080_v58  ;;  %vm4349_vm0 = vmor %vm6856_vm4, %vm6855_vm3  ;;  %v3152_v8 = vsel %vm4333_vm7, 1.0, %v6849_v62  ;;  %v6860_v58 = vmov 0  }
  0x3a   : > { %6854 = vst [vmem:[#allocation26_spill] sm:$0xff] %v6853_v63  ;;  %v6858_v40 = vsel %vm4349_vm0, 4294967295, %v6857_v40  ;;  %2059 = vmatprep.subr.bf16.mxu1 %v6860_v58  ;;  %vm6862_vm3 = vcmp.eq.s32.totalorder %v4139_v35, %v3765_v13  ;;  %v4374_v39 = vsel %vm4349_vm0, 1.0, %v6849_v62  ;;  %v6868_v63 = vmov 0 }
  0x3b   : > { %6859 = vst [vmem:[#allocation27_spill] sm:$0xff] %v6858_v40  ;;  %vm4367_vm4 = vmor %vm6862_vm3, %vm6861_vm2  ;;  %1818 = vxpose.xlu1.c.b16.cont [4/8] %v1122_v44, 128  ;;  %vm6866_vm2 = vcmp.eq.s32.totalorder %v4139_v35, %v3794_v22  ;;  %vm6867_vm3 = vcmp.eq.s32.totalorder %v4139_v35, %v3768_v14  ;;  %v4397_v57 = vadd.f32 %v4374_v39, %v3152_v8 }
  0x3c   : > { %v6864_v49 = vsel %vm4367_vm4, 4294967295, %v6863_v49  ;;  %vm4389_vm7 = vmor %vm6867_vm3, %vm6866_vm2  ;;  %v3156_v40 = vsel %vm4367_vm4, 1.0, %v6849_v62  ;;  %vm6872_vm2 = vcmp.eq.s32.totalorder %v4231_v1, %v3791_v21  ;;  %vm6873_vm3 = vcmp.eq.s32.totalorder %v4231_v1, %v3765_v13  ;;  %2060 = vmatpush1.bf16.msra.mxu1 %v3597_v2  ;;  %v3609_v2 = vld [vmem:[%s4239_s13 + $0x8] sm:$0xff]  }
  0x3d   : > { %6865 = vst [vmem:[#allocation28_spill] sm:$0xff] %v6864_v49  ;;  %v6869_v63 = vsel %vm4389_vm7, 4294967295, %v6868_v63  ;;  %6871 = vst [vmem:[#allocation30_spill] sm:$0xff] %v4397_v57  ;;  %v4407_v44 = vsel %vm4389_vm7, 1.0, %v6849_v62  ;;  %v1158_v52 = vpack.c.bf16 %v3156_v40, %v3152_v8  ;;  %v4418_v57 = vadd.s32 232, %v3733_v3  ;;  %v3599_v49 = vld [vmem:[%s6608_s3 + $0x58] sm:$0xff]   ;;  %2061 = vmatprep.subr.bf16.mxu1 %v6860_v58  ;;  %3494 = vmatmul.mubr.bf16.vlgmr.msra.gmra.mrb[0].mxu0 %v3609_v2 }
  0x3e   : > { %6870 = vst [vmem:[#allocation29_spill] sm:$0xff] %v6869_v63  ;;  %vm758_vm5 = vmor %vm6873_vm3, %vm6872_vm2  ;;  %v4424_v8 = vadd.f32 %v4407_v44, %v3156_v40  ;;  %vm6875_vm4 = vcmp.eq.s32.totalorder %v4261_v43, %v3791_v21  ;;  %vm6876_vm2 = vcmp.eq.s32.totalorder %v4261_v43, %v3765_v13  ;;  %vm6877_vm0 = vcmp.eq.s32.totalorder %v4285_v60, %v3791_v21 }
  0x3f   : > { %vm762_vm3 = vmor %vm6876_vm2, %vm6875_vm4  ;;  %v3088_v63 = vsel %vm758_vm5, 1.0, %v6849_v62  ;;  %1883 = vxpose.xlu0.c.b16.cont [5/8] %v1158_v52, 128  ;;  %vm6878_vm4 = vcmp.eq.s32.totalorder %v4285_v60, %v3765_v13  ;;  %v3601_v52 = vld [vmem:[%s6608_s3 + $0x60] sm:$0xff]   ;;  %vm6903_vm10 = vcmp.eq.s32.totalorder %v4402_v4, %v3791_v21  ;;  %v6905_v2 = vmov 0 }
  0x40   : > { %6874 = vst [vmem:[#allocation31_spill] sm:$0xff] %v4424_v8  ;;  %v3092_v40 = vsel %vm762_vm3, 1.0, %v6849_v62  ;;  %vm4446_vm5 = vmor %vm6878_vm4, %vm6877_vm0  ;;  %v6879_v8 = vmov 0  ;;  %vm6882_vm0 = vcmp.eq.s32.totalorder %v4285_v60, %v3794_v22  ;;  %vm6883_vm3 = vcmp.eq.s32.totalorder %v4285_v60, %v3768_v14  ;;  %2062 = vmatpush1.bf16.msra.mxu1 %v3599_v49 }
  0x41   : > { %v6880_v8 = vsel %vm4446_vm5, 4294967295, %v6879_v8  ;;  %v1126_v61 = vpack.c.bf16 %v3092_v40, %v3088_v63  ;;  %vm4465_vm4 = vmor %vm6883_vm3, %vm6882_vm0  ;;  %v3160_v5 = vsel %vm4446_vm5, 1.0, %v6849_v62  ;;  %v3610_v63 = vld [vmem:[%s4239_s13 + $0x10] sm:$0xff]   ;;  %vm6888_vm0 = vcmp.eq.s32.totalorder %v4302_v55, %v3765_v13  ;;  %2063 = vmatprep.subr.bf16.mxu1 %v6860_v58 }
  0x42   : > { %6881 = vst [vmem:[#allocation32_spill] sm:$0xff] %v6880_v8  ;;  %v6885_v27 = vsel %vm4465_vm4, 4294967295, %v6884_v27  ;;  %vm4483_vm3 = vmor %vm6888_vm0, %vm6887_vm14  ;;  %v4490_v40 = vsel %vm4465_vm4, 1.0, %v6849_v62  ;;  %v4497_v8 = vadd.s32 96, %v3733_v3  ;;  %vm6892_vm14 = vcmp.eq.s32.totalorder %v4302_v55, %v3794_v22  ;;  %3497 = vmatprep.mubr.bf16.mxu0 %v3610_v63 }
  0x43   : > { %6886 = vst [vmem:[#allocation33_spill] sm:$0xff] %v6885_v27  ;;  %v6890_v46 = vsel %vm4483_vm3, 4294967295, %v6889_v46  ;;  %1819 = vxpose.xlu1.c.b16.cont [5/8] %v1126_v61, 128  ;;  %vm6893_vm0 = vcmp.eq.s32.totalorder %v4302_v55, %v3768_v14  ;;  %v6894_v27 = vmov 0  ;;  %v3164_v41 = vsel %vm4483_vm3, 1.0, %v6849_v62 }
  0x44   : > { %6891 = vst [vmem:[#allocation34_spill] sm:$0xff] %v6890_v46  ;;  %vm4505_vm5 = vmor %vm6893_vm0, %vm6892_vm14  ;;  %v4513_v10 = vadd.f32 %v4490_v40, %v3160_v5  ;;  %v4518_v61 = vadd.s32 104, %v3733_v3  ;;  %v1162_v53 = vpack.c.bf16 %v3164_v41, %v3160_v5  ;;  %vm6898_vm14 = vcmp.eq.s32.totalorder %v4321_v45, %v3791_v21  ;;  %v3603_v46 = vld [vmem:[%s6608_s3 + $0x68] sm:$0xff]   ;;  %2064 = vmatpush1.bf16.msra.mxu1 %v3601_v52 }
  0x45   : > { %v6895_v27 = vsel %vm4505_vm5, 4294967295, %v6894_v27  ;;  %v4524_v49 = vsel %vm4505_vm5, 1.0, %v6849_v62  ;;  %vm6899_vm0 = vcmp.eq.s32.totalorder %v4321_v45, %v3765_v13  ;;  %vm6901_vm3 = vcmp.eq.s32.totalorder %v4381_v33, %v3791_v21  ;;  %2065 = vmatprep.subr.bf16.mxu1 %v6860_v58  ;;  %3498 = vmatmul.mubr.bf16.gmra.mrb[4].mxu0 %v3611_v48 }
  0x46   : > { %6896 = vst [vmem:[#allocation35_spill] sm:$0xff] %v6895_v27  ;;  %6897 = vst [vmem:[#allocation36_spill] sm:$0xff] %v4513_v10  ;;  %v4535_v10 = vadd.s32 240, %v3733_v3  ;;  %v4541_v5 = vadd.f32 %v4524_v49, %v3164_v41  ;;  %vm714_vm5 = vcmp.eq.s32.totalorder %v4418_v57, %v3791_v21  ;;  %1884 = vxpose.xlu0.c.b16.cont [6/8] %v1162_v53, 128  ;;  %v6910_v63 = vmov 0  ;;  %3501 = vmatprep.mubr.bf16.mxu0 %v3612_v28  ;;  %v3613_v28 = vld [vmem:[%s4239_s13 + $0x28] sm:$0xff]  }
  0x47   : > { %vm766_vm7 = vmor %vm6899_vm0, %vm6898_vm14  ;;  %vm6902_vm14 = vcmp.eq.s32.totalorder %v4381_v33, %v3765_v13  ;;  %vm6908_vm2 = vcmp.eq.s32.totalorder %v4402_v4, %v3794_v22  ;;  %vm6909_vm4 = vcmp.eq.s32.totalorder %v4402_v4, %v3768_v14  ;;  %v4587_v52 = vadd.s32 248, %v3733_v3 }
  0x48   : > { %6900 = vst [vmem:[#allocation37_spill] sm:$0xff] %v4541_v5  ;;  %vm770_vm0 = vmor %vm6902_vm14, %vm6901_vm3  ;;  %v3096_v27 = vsel %vm766_vm7, 1.0, %v6849_v62  ;;  %vm6904_vm3 = vcmp.eq.s32.totalorder %v4402_v4, %v3765_v13  ;;  %2066 = vmatpush1.bf16.msra.mxu1 %v3603_v46  ;;  %v6931_v46 = vmov 0  ;;  %v6940_v48 = vmov 0 }
  0x49   : > { %v3100_v41 = vsel %vm770_vm0, 1.0, %v6849_v62  ;;  %vm4563_vm7 = vmor %vm6904_vm3, %vm6903_vm10  ;;  %6913 = vst [vmem:[#allocation40_spill] sm:$0xff] %v4587_v52  ;;  %vm6927_vm0 = vcmp.eq.s32.totalorder %v4518_v61, %v3791_v21  ;;  %2067 = vmatprep.subr.bf16.mxu1 %v6860_v58  ;;  %vm474_vm8 = vcmp.eq.s32.totalorder %v3808_v26, %v3768_v14  ;;  %vm627_vm13 = vcmp.eq.s32.totalorder %v4098_v6, %v3794_v22 }
  0x4a   : > { %v6906_v2 = vsel %vm4563_vm7, 4294967295, %v6905_v2  ;;  %v1130_v53 = vpack.c.bf16 %v3100_v41, %v3096_v27  ;;  %vm4577_vm10 = vmor %vm6909_vm4, %vm6908_vm2  ;;  %v3168_v5 = vsel %vm4563_vm7, 1.0, %v6849_v62  ;;  %vm6914_vm2 = vcmp.eq.s32.totalorder %v4418_v57, %v3765_v13 }
  0x4b   : > { %6907 = vst [vmem:[#allocation38_spill] sm:$0xff] %v6906_v2  ;;  %v6911_v63 = vsel %vm4577_vm10, 4294967295, %v6910_v63  ;;  %vm4596_vm4 = vmor %vm6914_vm2, %vm714_vm5  ;;  %v6915_v27 = vmov 0  ;;  %v4603_v41 = vsel %vm4577_vm10, 1.0, %v6849_v62  ;;  %v3605_v2 = vld [vmem:[%s6608_s3 + $0x70] sm:$0xff]   ;;  %vm6918_vm5 = vcmp.eq.s32.totalorder %v4418_v57, %v3794_v22 }
  0x4c   : > { %6912 = vst [vmem:[#allocation39_spill] sm:$0xff] %v6911_v63  ;;  %v6916_v27 = vsel %vm4596_vm4, 4294967295, %v6915_v27  ;;  %1820 = vxpose.xlu1.c.b16.cont [6/8] %v1130_v53, 128  ;;  %vm6919_vm2 = vcmp.eq.s32.totalorder %v4418_v57, %v3768_v14  ;;  %v6920_v63 = vmov 0  ;;  %v3172_v36 = vsel %vm4596_vm4, 1.0, %v6849_v62  ;;  %2068 = vmatpush1.bf16.msra.mxu1 %v3605_v2  ;;  %v3614_v2 = vld [vmem:[%s4239_s13 + $0x30] sm:$0xff]  }
  0x4d   : > { %6917 = vst [vmem:[#allocation41_spill] sm:$0xff] %v6916_v27  ;;  %vm4622_vm3 = vmor %vm6919_vm2, %vm6918_vm5  ;;  %v4630_v56 = vadd.f32 %v4603_v41, %v3168_v5  ;;  %v4635_v53 = vadd.s32 112, %v3733_v3  ;;  %v1166_v38 = vpack.c.bf16 %v3172_v36, %v3168_v5  ;;  %vm6924_vm5 = vcmp.eq.s32.totalorder %v4497_v8, %v3791_v21  ;;  %2069 = vmatprep.subr.bf16.mxu1 %v6860_v58 }
  0x4e   : > { %v6921_v63 = vsel %vm4622_vm3, 4294967295, %v6920_v63  ;;  %v4640_v51 = vsel %vm4622_vm3, 1.0, %v6849_v62  ;;  %vm6925_vm2 = vcmp.eq.s32.totalorder %v4497_v8, %v3765_v13  ;;  %vm6928_vm7 = vcmp.eq.s32.totalorder %v4518_v61, %v3765_v13  ;;  %3502 = vmatmul.mubr.bf16.gmra.mrb[8].mxu0 %v3613_v28 }
  0x4f   : > { %6922 = vst [vmem:[#allocation42_spill] sm:$0xff] %v6921_v63  ;;  %6923 = vst [vmem:[#allocation43_spill] sm:$0xff] %v4630_v56  ;;  %v4651_v56 = vadd.s32 120, %v3733_v3  ;;  %v4654_v27 = vadd.f32 %v4640_v51, %v3172_v36  ;;  %1885 = vxpose.xlu0.c.b16.cont [7/8] %v1166_v38, 128  ;;  %v3607_v38 = vld [vmem:[%s6608_s3 + $0x78] sm:$0xff]   ;;  %vm6935_vm4 = vcmp.eq.s32.totalorder %v4535_v10, %v3768_v14  ;;  %v6936_v63 = vmov 0  ;;  %3505 = vmatprep.mubr.bf16.mxu0 %v3614_v2  ;;  %v3616_v2 = vld [vmem:[%s4239_s13 + $0x40] sm:$0xff]  }
  0x50   : > { %vm774_vm14 = vmor %vm6925_vm2, %vm6924_vm5  ;;  %vm722_vm2 = vcmp.eq.s32.totalorder %v4587_v52, %v3791_v21  ;;  %2070 = vmatpush1.bf16.msra.mxu1 %v3607_v38 }
  0x51   : > { %6926 = vst [vmem:[#allocation44_spill] sm:$0xff] %v4654_v27  ;;  %vm778_vm3 = vmor %vm6928_vm7, %vm6927_vm0  ;;  %v3104_v5 = vsel %vm774_vm14, 1.0, %v6849_v62  ;;  %vm6929_vm14 = vcmp.eq.s32.totalorder %v4535_v10, %v3791_v21  ;;  %vm6930_vm0 = vcmp.eq.s32.totalorder %v4535_v10, %v3765_v13 }
  0x52   : > { %v3108_v36 = vsel %vm778_vm3, 1.0, %v6849_v62  ;;  %vm4679_vm5 = vmor %vm6930_vm0, %vm6929_vm14  ;;  %vm6934_vm3 = vcmp.eq.s32.totalorder %v4535_v10, %v3794_v22  ;;  %vm603_vm0 = vcmp.eq.s32.totalorder %v3762_v12, %v3794_v22  ;;  %vm6952_vm14 = vcmp.eq.s32.totalorder %v3733_v3, %v3794_v22 }
  0x53   : > { %v6932_v46 = vsel %vm4679_vm5, 4294967295, %v6931_v46  ;;  %v1134_v27 = vpack.c.bf16 %v3108_v36, %v3104_v5  ;;  %vm4692_vm7 = vmor %vm6935_vm4, %vm6934_vm3  ;;  %v3176_v32 = vsel %vm4679_vm5, 1.0, %v6849_v62  ;;  %vm6939_vm4 = vcmp.eq.s32.totalorder %v4587_v52, %v3765_v13 }
  0x54   : > { %6933 = vst [vmem:[#allocation45_spill] sm:$0xff] %v6932_v46  ;;  %v6937_v63 = vsel %vm4692_vm7, 4294967295, %v6936_v63  ;;  %vm4709_vm3 = vmor %vm6939_vm4, %vm722_vm2  ;;  %v4716_v5 = vsel %vm4692_vm7, 1.0, %v6849_v62  ;;  %vm6942_vm2 = vcmp.eq.s32.totalorder %v4587_v52, %v3794_v22  ;;  %vm6943_vm4 = vcmp.eq.s32.totalorder %v4587_v52, %v3768_v14 }
  0x55   : > { %6938 = vst [vmem:[#allocation46_spill] sm:$0xff] %v6937_v63  ;;  %v6941_v48 = vsel %vm4709_vm3, 4294967295, %v6940_v48  ;;  %1821 = vxpose.xlu1.c.b16.cont [7/8] %v1134_v27, 128  ;;  %vm4729_vm5 = vmor %vm6943_vm4, %vm6942_vm2  ;;  %v6944_v36 = vmov 0  ;;  %v3180_v46 = vsel %vm4709_vm3, 1.0, %v6849_v62  ;;  %v4737_v63 = vadd.f32 %v4716_v5, %v3176_v32 }
  0x56   : > { %v6945_v36 = vsel %vm4729_vm5, 4294967295, %v6944_v36  ;;  %v4748_v27 = vsel %vm4729_vm5, 1.0, %v6849_v62  ;;  %v1170_v52 = vpack.c.bf16 %v3180_v46, %v3176_v32  ;;  %vm6947_vm2 = vcmp.eq.s32.totalorder %v4635_v53, %v3791_v21 }
  0x57   : > { %6946 = vst [vmem:[#allocation47_spill] sm:$0xff] %v4737_v63  ;;  %vm6948_vm4 = vcmp.eq.s32.totalorder %v4635_v53, %v3765_v13  ;;  %v4761_v58 = vadd.f32 %v4748_v27, %v3180_v46  ;;  %vm6950_vm5 = vcmp.eq.s32.totalorder %v4651_v56, %v3791_v21  ;;  %vm6951_vm7 = vcmp.eq.s32.totalorder %v4651_v56, %v3765_v13 }
  0x58   : > { %vm782_vm3 = vmor %vm6948_vm4, %vm6947_vm2  ;;  %vm607_vm4 = vcmp.eq.s32.totalorder %v3780_v18, %v3794_v22  ;;  %1886 = vxpose.xlu0.c.b16.end [8/8] %v1170_v52, 128  ;;  %v1143_v46 = vpack.c.bf16 %v3909_v42, %v3874_v37  ;;  %vm611_vm2 = vcmp.eq.s32.totalorder %v3783_v19, %v3794_v22 }
  0x59   : > { %6949 = vst [vmem:[#allocation48_spill] sm:$0xff] %v4761_v58  ;;  %vm786_vm10 = vmor %vm6951_vm7, %vm6950_vm5  ;;  %v3112_v32 = vsel %vm782_vm3, 1.0, %v6849_v62  ;;  %vm6953_vm5 = vcmp.eq.s32.totalorder %v3733_v3, %v3768_v14  ;;  %v7051_v58 = vld [vmem:[#allocation40_spill] sm:$0xff] }
  0x5a   : > { %v3116_v63 = vsel %vm786_vm10, 1.0, %v6849_v62  ;;  %vm727_vm7 = vmor %vm6953_vm5, %vm6952_vm14  ;;  %vm6954_vm10 = vcmp.eq.s32.totalorder %v3762_v12, %v3768_v14  ;;  %vm615_vm14 = vcmp.eq.s32.totalorder %v3805_v25, %v3794_v22  ;;  %vm6955_vm5 = vcmp.eq.s32.totalorder %v3780_v18, %v3768_v14 }
  0x5b   : > { %v1138_v13 = vpack.c.bf16 %v3116_v63, %v3112_v32  ;;  %vm731_vm12 = vmor %vm6954_vm10, %vm603_vm0  ;;  %v3057_v21 = vsel %vm727_vm7, 1.0, %v6849_v62  ;;  %vm619_vm0 = vcmp.eq.s32.totalorder %v3808_v26, %v3794_v22  ;;  %vm6956_vm7 = vcmp.eq.s32.totalorder %v3783_v19, %v3768_v14 }
  0x5c   : > { %v3061_v37 = vsel %vm731_vm12, 1.0, %v6849_v62  ;;  %vm735_vm3 = vmor %vm6955_vm5, %vm607_vm4  ;;  %1895 = vxpose.xlu0.c.b16.start [1/8] %v1143_v46, 128  ;;  %v1147_v63 = vpack.c.bf16 %v4043_v59, %v4008_v54  ;;  %vm478_vm5 = vcmp.eq.s32.totalorder %v4071_v0, %v3768_v14  ;;  %v3615_v54 = vld [vmem:[%s4239_s13 + $0x38] sm:$0xff]   ;;  %v1151_v32 = vpack.c.bf16 %v4170_v47, %v4131_v31 }
  0x5d   : > { %1822 = vxpose.xlu1.c.b16.end [8/8] %v1138_v13, 128  ;;  %v1111_v42 = vpack.c.bf16 %v3061_v37, %v3057_v21  ;;  %vm739_vm10 = vmor %vm6956_vm7, %vm611_vm2  ;;  %v3065_v52 = vsel %vm735_vm3, 1.0, %v6849_v62  ;;  %vm623_vm2 = vcmp.eq.s32.totalorder %v4071_v0, %v3794_v22  ;;  %vm482_vm7 = vcmp.eq.s32.totalorder %v4098_v6, %v3768_v14  ;;  %3506 = vmatmul.mubr.bf16.gmra.mrb[12].mxu0 %v3615_v54 }
  0x5e   : > { %v3069_v38 = vsel %vm739_vm10, 1.0, %v6849_v62  ;;  %vm743_vm12 = vmor %vm470_vm11, %vm615_vm14  ;;  %v447_v21 = vsub.s32 2, %v3733_v3  ;;  %v1155_v37 = vpack.c.bf16 %v4291_v50, %v4254_v24  ;;  %vm486_vm3 = vcmp.eq.s32.totalorder %v4231_v1, %v3768_v14  ;;  %3509 = vmatprep.mubr.bf16.mxu0 %v3616_v2 }
  0x5f   : > { %vm747_vm4 = vmor %vm474_vm8, %vm619_vm0  ;;  %v1115_v59 = vpack.c.bf16 %v3069_v38, %v3065_v52  ;;  %v3073_v28 = vsel %vm743_vm12, 1.0, %v6849_v62  ;;  %vm631_vm14 = vcmp.eq.s32.totalorder %v4231_v1, %v3794_v22  ;;  %vm490_vm0 = vcmp.eq.s32.totalorder %v4261_v43, %v3768_v14 }
  0x60   : > { %1896 = vxpose.xlu0.c.b16.cont [2/8] %v1147_v63, 128  ;;  %v3077_v46 = vsel %vm747_vm4, 1.0, %v6849_v62  ;;  %vm4827_vm8 = vmor %vm478_vm5, %vm623_vm2  ;;  %vm635_vm10 = vcmp.eq.s32.totalorder %v4261_v43, %v3794_v22  ;;  %v4843_v31 = vrot.slane %v3756_v9, %v447_v21  ;;  %v4846_v47 = vrot.slane %v3770_v15, %v447_v21  ;;  %v3617_v63 = vld [vmem:[%s4239_s13 + $0x48] sm:$0xff]  }
  0x61   : > { %1831 = vxpose.xlu1.c.b16.start [1/8] %v1111_v42, 128  ;;  %vm755_vm11 = vmor %vm482_vm7, %vm627_vm13  ;;  %v1119_v50 = vpack.c.bf16 %v3077_v46, %v3073_v28  ;;  %vm494_vm13 = vcmp.eq.s32.totalorder %v4321_v45, %v3768_v14  ;;  %vm639_vm12 = vcmp.eq.s32.totalorder %v4321_v45, %v3794_v22  ;;  %v3081_v9 = vsel %vm4827_vm8, 1.0, %v6849_v62 }
  0x62   : > { %v3085_v24 = vsel %vm755_vm11, 1.0, %v6849_v62  ;;  %vm759_vm4 = vmor %vm486_vm3, %vm631_vm14  ;;  %vm498_vm5 = vcmp.eq.s32.totalorder %v4381_v33, %v3768_v14  ;;  %vm643_vm2 = vcmp.eq.s32.totalorder %v4381_v33, %v3794_v22  ;;  %vm519_vm8 = vcmp.eq.s32.totalorder %v3750_v7, %v4843_v31 }
  0x63   : > { %vm763_vm7 = vmor %vm490_vm0, %vm635_vm10  ;;  %vm664_vm11 = vcmp.eq.s32.totalorder %v3750_v7, %v4846_v47  ;;  %vm523_vm14 = vcmp.eq.s32.totalorder %v3759_v11, %v4843_v31  ;;  %vm668_vm6 = vcmp.eq.s32.totalorder %v3759_v11, %v4846_v47  ;;  %v1123_v52 = vpack.c.bf16 %v3085_v24, %v3081_v9 }
  0x64   : > { %1897 = vxpose.xlu0.c.b16.cont [3/8] %v1151_v32, 128  ;;  %vm4873_vm3 = vmor %vm494_vm13, %vm639_vm12  ;;  %v1159_v38 = vpack.c.bf16 %v4407_v44, %v4374_v39  ;;  %v3093_v28 = vsel %vm763_vm7, 1.0, %v6849_v62  ;;  %vm502_vm10 = vcmp.eq.s32.totalorder %v4497_v8, %v3768_v14  ;;  %vm647_vm13 = vcmp.eq.s32.totalorder %v4497_v8, %v3794_v22 }
  0x65   : > { %1832 = vxpose.xlu1.c.b16.cont [2/8] %v1115_v59, 128  ;;  %vm4884_vm0 = vmor %vm498_vm5, %vm643_vm2  ;;  %v3089_v59 = vsel %vm759_vm4, 1.0, %v6849_v62  ;;  %v6963_v39 = vmov 0  ;;  %vm506_vm5 = vcmp.eq.s32.totalorder %v4518_v61, %v3768_v14  ;;  %vm651_vm4 = vcmp.eq.s32.totalorder %v4518_v61, %v3794_v22  ;;  %3510 = vmatmul.mubr.bf16.gmra.mrb[16].mxu0 %v3617_v63 }
  0x66   : > { %vm4897_vm12 = vmor %vm519_vm8, %vm664_vm11  ;;  %v6966_v44 = vmov 0  ;;  %v1127_v2 = vpack.c.bf16 %v3093_v28, %v3089_v59  ;;  %v1163_v32 = vpack.c.bf16 %v4524_v49, %v4490_v40  ;;  %v3097_v46 = vsel %vm4873_vm3, 1.0, %v6849_v62  ;;  %v3618_v40 = vld [vmem:[%s4239_s13 + $0x50] sm:$0xff]   ;;  %v3619_v49 = vld [vmem:[%s4239_s13 + $0x58] sm:$0xff]  }
  0x67   : > { %v6964_v39 = vsel %vm4897_vm12, 4294967295, %v6963_v39  ;;  %vm4908_vm2 = vmor %vm523_vm14, %vm668_vm6  ;;  %v3101_v13 = vsel %vm4884_vm0, 1.0, %v6849_v62  ;;  %vm510_vm11 = vcmp.eq.s32.totalorder %v4635_v53, %v3768_v14  ;;  %vm655_vm14 = vcmp.eq.s32.totalorder %v4635_v53, %v3794_v22  ;;  %3513 = vmatprep.mubr.bf16.mxu0 %v3618_v40 }
  0x68   : > { %1898 = vxpose.xlu0.c.b16.cont [4/8] %v1155_v37, 128  ;;  %6965 = vst [vmem:[#allocation49_spill] sm:$0xff] %v6964_v39  ;;  %v6967_v44 = vsel %vm4908_vm2, 4294967295, %v6966_v44  ;;  %vm775_vm8 = vmor %vm502_vm10, %vm647_vm13  ;;  %vm514_vm7 = vcmp.eq.s32.totalorder %v4651_v56, %v3768_v14  ;;  %vm659_vm10 = vcmp.eq.s32.totalorder %v4651_v56, %v3794_v22  ;;  %v1131_v21 = vpack.c.bf16 %v3101_v13, %v3097_v46 }
  0x69   : > { %1833 = vxpose.xlu1.c.b16.cont [3/8] %v1119_v50, 128  ;;  %6968 = vst [vmem:[#allocation50_spill] sm:$0xff] %v6967_v44  ;;  %vm779_vm6 = vmor %vm506_vm5, %vm651_vm4  ;;  %v3105_v37 = vsel %vm775_vm8, 1.0, %v6849_v62  ;;  %v1167_v9 = vpack.c.bf16 %v4640_v51, %v4603_v41  ;;  %vm455_vm13 = vcmp.eq.s32.totalorder %v3733_v3, %v4843_v31  ;;  %vm600_vm5 = vcmp.eq.s32.totalorder %v3733_v3, %v4846_v47 }
  0x6a   : > { %v3109_v50 = vsel %vm779_vm6, 1.0, %v6849_v62  ;;  %vm783_vm3 = vmor %vm510_vm11, %vm655_vm14  ;;  %vm459_vm4 = vcmp.eq.s32.totalorder %v3762_v12, %v4843_v31  ;;  %vm604_vm8 = vcmp.eq.s32.totalorder %v3762_v12, %v4846_v47  ;;  %v1171_v22 = vpack.c.bf16 %v4748_v27, %v4716_v5 }
  0x6b   : > { %vm787_vm0 = vmor %vm514_vm7, %vm659_vm10  ;;  %v1135_v14 = vpack.c.bf16 %v3109_v50, %v3105_v37  ;;  %vm527_vm7 = vcmp.eq.s32.totalorder %v3773_v16, %v4843_v31  ;;  %vm672_vm6 = vcmp.eq.s32.totalorder %v3773_v16, %v4846_v47  ;;  %v3113_v51 = vsel %vm783_vm3, 1.0, %v6849_v62 }
  0x6c   : > { %1899 = vxpose.xlu0.c.b16.cont [5/8] %v1159_v38, 128  ;;  %v3117_v41 = vsel %vm787_vm0, 1.0, %v6849_v62  ;;  %vm4954_vm11 = vmor %vm455_vm13, %vm600_vm5  ;;  %vm531_vm14 = vcmp.eq.s32.totalorder %v3777_v17, %v4843_v31  ;;  %vm676_vm10 = vcmp.eq.s32.totalorder %v3777_v17, %v4846_v47  ;;  %v4965_v5 = vsel %vm4897_vm12, 1.0, %v6849_v62 }
  0x6d   : > { %1834 = vxpose.xlu1.c.b16.cont [4/8] %v1123_v52, 128  ;;  %3514 = vmatmul.mubr.bf16.gmra.mrb[20].mxu0 %v3619_v49  ;;  %v4970_v27 = vsel %vm4908_vm2, 1.0, %v6849_v62  ;;  %vm4978_vm3 = vmor %vm459_vm4, %vm604_vm8  ;;  %vm463_vm0 = vcmp.eq.s32.totalorder %v3780_v18, %v4843_v31  ;;  %vm608_vm13 = vcmp.eq.s32.totalorder %v3780_v18, %v4846_v47  ;;  %v6973_v63 = vmov 0 }
  0x6e   : > { %vm4989_vm5 = vmor %vm527_vm7, %vm672_vm6  ;;  %vm467_vm12 = vcmp.eq.s32.totalorder %v3783_v19, %v4843_v31  ;;  %vm612_vm4 = vcmp.eq.s32.totalorder %v3783_v19, %v4846_v47  ;;  %v6976_v52 = vmov 0  ;;  %vm535_vm2 = vcmp.eq.s32.totalorder %v3786_v20, %v4843_v31 }
  0x6f   : > { %v6974_v63 = vsel %vm4989_vm5, 4294967295, %v6973_v63  ;;  %vm4997_vm8 = vmor %vm531_vm14, %vm676_vm10  ;;  %vm680_vm15 = vcmp.eq.s32.totalorder %v3786_v20, %v4846_v47  ;;  %v1139_v38 = vpack.c.bf16 %v3117_v41, %v3113_v51  ;;  %v1144_v54 = vpack.c.bf16 %v4970_v27, %v4965_v5 }
  0x70   : > { %1900 = vxpose.xlu0.c.b16.cont [6/8] %v1163_v32, 128  ;;  %6975 = vst [vmem:[#allocation51_spill] sm:$0xff] %v6974_v63  ;;  %v6977_v52 = vsel %vm4997_vm8, 4294967295, %v6976_v52  ;;  %vm5007_vm7 = vmor %vm463_vm0, %vm608_vm13  ;;  %vm539_vm6 = vcmp.eq.s32.totalorder %v3797_v23, %v4843_v31  ;;  %vm684_vm14 = vcmp.eq.s32.totalorder %v3797_v23, %v4846_v47  ;;  %v3058_v28 = vsel %vm4954_vm11, 1.0, %v6849_v62 }
  0x71   : > { %1835 = vxpose.xlu1.c.b16.cont [5/8] %v1127_v2, 128  ;;  %6978 = vst [vmem:[#allocation52_spill] sm:$0xff] %v6977_v52  ;;  %v3062_v2 = vsel %vm4978_vm3, 1.0, %v6849_v62  ;;  %vm5021_vm10 = vmor %vm467_vm12, %vm612_vm4  ;;  %vm471_vm0 = vcmp.eq.s32.totalorder %v3805_v25, %v4843_v31  ;;  %vm616_vm13 = vcmp.eq.s32.totalorder %v3805_v25, %v4846_v47  ;;  %v5032_v46 = vsel %vm4989_vm5, 1.0, %v6849_v62 }
  0x72   : > { %6983 = vst [vmem:[#allocation53_spill] sm:$0xff] %v5032_v46  ;;  %v5037_v13 = vsel %vm4997_vm8, 1.0, %v6849_v62  ;;  %vm5045_vm12 = vmor %vm535_vm2, %vm680_vm15  ;;  %v6985_v40 = vmov 0  ;;  %vm475_vm11 = vcmp.eq.s32.totalorder %v3808_v26, %v4843_v31  ;;  %vm620_vm3 = vcmp.eq.s32.totalorder %v3808_v26, %v4846_v47 }
  0x73   : > { %6984 = vst [vmem:[#allocation54_spill] sm:$0xff] %v5037_v13  ;;  %v6986_v40 = vsel %vm5045_vm12, 4294967295, %v6985_v40  ;;  %vm5053_vm4 = vmor %vm539_vm6, %vm684_vm14  ;;  %v6988_v49 = vmov 0  ;;  %vm543_vm8 = vcmp.eq.s32.totalorder %v3834_v29, %v4843_v31  ;;  %vm688_vm5 = vcmp.eq.s32.totalorder %v3834_v29, %v4846_v47 }
  0x74   : > { %1901 = vxpose.xlu0.c.b16.cont [7/8] %v1167_v9, 128  ;;  %6987 = vst [vmem:[#allocation55_spill] sm:$0xff] %v6986_v40  ;;  %v6989_v49 = vsel %vm5053_vm4, 4294967295, %v6988_v49  ;;  %vm5061_vm15 = vmor %vm471_vm0, %vm616_vm13  ;;  %vm547_vm2 = vcmp.eq.s32.totalorder %v3837_v30, %v4843_v31  ;;  %vm692_vm6 = vcmp.eq.s32.totalorder %v3837_v30, %v4846_v47  ;;  %v1148_v50 = vpack.c.bf16 %v5037_v13, %v5032_v46 }
  0x75   : > { %1836 = vxpose.xlu1.c.b16.cont [6/8] %v1131_v21, 128  ;;  %6990 = vst [vmem:[#allocation56_spill] sm:$0xff] %v6989_v49  ;;  %v1112_v21 = vpack.c.bf16 %v3062_v2, %v3058_v28  ;;  %v3066_v9 = vsel %vm5007_vm7, 1.0, %v6849_v62  ;;  %vm5082_vm0 = vmor %vm475_vm11, %vm620_vm3  ;;  %vm624_vm13 = vcmp.eq.s32.totalorder %v4071_v0, %v4846_v47  ;;  %v5091_v51 = vsel %vm5045_vm12, 1.0, %v6849_v62 }
  0x76   : > { %6995 = vst [vmem:[#allocation57_spill] sm:$0xff] %v5091_v51  ;;  %v5096_v41 = vsel %vm5053_vm4, 1.0, %v6849_v62  ;;  %vm5104_vm7 = vmor %vm543_vm8, %vm688_vm5  ;;  %v6997_v24 = vmov 0  ;;  %vm628_vm11 = vcmp.eq.s32.totalorder %v4098_v6, %v4846_v47  ;;  %v7000_v42 = vmov 0 }
  0x77   : > { %6996 = vst [vmem:[#allocation58_spill] sm:$0xff] %v5096_v41  ;;  %v6998_v24 = vsel %vm5104_vm7, 4294967295, %v6997_v24  ;;  %vm5112_vm3 = vmor %vm547_vm2, %vm692_vm6  ;;  %vm696_vm4 = vcmp.eq.s32.totalorder %v4136_v34, %v4846_v47  ;;  %vm7003_vm5 = vcmp.eq.s32.totalorder %v4071_v0, %v4843_v31  ;;  %vm555_vm2 = vcmp.eq.s32.totalorder %v4139_v35, %v4843_v31 }
  0x78   : > { %1902 = vxpose.xlu0.c.b16.end [8/8] %v1171_v22, 128  ;;  %6999 = vst [vmem:[#allocation59_spill] sm:$0xff] %v6998_v24  ;;  %v7001_v42 = vsel %vm5112_vm3, 4294967295, %v7000_v42  ;;  %vm5125_vm8 = vmor %vm7003_vm5, %vm624_vm13  ;;  %vm700_vm6 = vcmp.eq.s32.totalorder %v4139_v35, %v4846_v47  ;;  %v1152_v2 = vpack.c.bf16 %v5096_v41, %v5091_v51  ;;  %v3074_v32 = vsel %vm5061_vm15, 1.0, %v6849_v62 }
  0x79   : > { %1837 = vxpose.xlu1.c.b16.cont [7/8] %v1135_v14, 128  ;;  %v3070_v14 = vsel %vm5021_vm10, 1.0, %v6849_v62  ;;  %vm483_vm10 = vcmp.eq.s32.totalorder %v4098_v6, %v4843_v31  ;;  %7002 = vst [vmem:[#allocation60_spill] sm:$0xff] %v7001_v42  ;;  %vm632_vm5 = vcmp.eq.s32.totalorder %v4231_v1, %v4846_v47  ;;  %v5158_v37 = vsel %vm5104_vm7, 1.0, %v6849_v62  ;;  %vm5185_vm14 = vmor %vm555_vm2, %vm700_vm6 }
  0x7a   : > { %v1116_v59 = vpack.c.bf16 %v3070_v14, %v3066_v9  ;;  %vm5149_vm13 = vmor %vm483_vm10, %vm628_vm11  ;;  %7008 = vst [vmem:[#allocation61_spill] sm:$0xff] %v5158_v37  ;;  %vm7010_vm15 = vcmp.eq.s32.totalorder %v4136_v34, %v4843_v31  ;;  %v7011_v14 = vmov 0  ;;  %v7014_v22 = vmov 0 }
  0x7b   : > { %v7015_v22 = vsel %vm5185_vm14, 4294967295, %v7014_v22  ;;  %vm7017_vm10 = vcmp.eq.s32.totalorder %v4231_v1, %v4843_v31  ;;  %vm563_vm2 = vcmp.eq.s32.totalorder %v4302_v55, %v4843_v31  ;;  %vm708_vm6 = vcmp.eq.s32.totalorder %v4302_v55, %v4846_v47 }
  0x7c   : > { %1911 = vxpose.xlu0.c.b16.start [1/8] %v1144_v54, 128  ;;  %v3621_v54 = vld [vmem:[%s4239_s13 + $0x68] sm:$0xff]   ;;  %7016 = vst [vmem:[#allocation64_spill] sm:$0xff] %v7015_v22  ;;  %vm5196_vm11 = vmor %vm7017_vm10, %vm632_vm5  ;;  %vm7020_vm5 = vcmp.eq.s32.totalorder %v4261_v43, %v4846_v47  ;;  %vm7021_vm10 = vcmp.eq.s32.totalorder %v4261_v43, %v4843_v31  ;;  %v7028_v9 = vmov 0  ;;  %v7031_v22 = vmov 0 }
  0x7d   : > { %1838 = vxpose.xlu1.c.b16.end [8/8] %v1139_v38, 128  ;;  %v3620_v38 = vld [vmem:[%s4239_s13 + $0x60] sm:$0xff]   ;;  %vm712_vm7 = vcmp.eq.s32.totalorder %v4402_v4, %v4846_v47 }
  0x7e   : > { %3517 = vmatprep.mubr.bf16.mxu0 %v3620_v38 }
  0x7f   : > { %3518 = vmatmul.mubr.bf16.gmra.mrb[24].mxu0 %v3621_v54 }
  0x80   : > { %1912 = vxpose.xlu0.c.b16.cont [2/8] %v1148_v50, 128  ;;  %v5163_v50 = vsel %vm5112_vm3, 1.0, %v6849_v62  ;;  %vm5250_vm3 = vmor %vm563_vm2, %vm708_vm6  ;;  %vm571_vm2 = vcmp.eq.s32.totalorder %v4418_v57, %v4843_v31  ;;  %vm716_vm6 = vcmp.eq.s32.totalorder %v4418_v57, %v4846_v47 }
  0x81   : > { %1847 = vxpose.xlu1.c.b16.start [1/8] %v1112_v21, 128  ;;  %v3078_v21 = vsel %vm5082_vm0, 1.0, %v6849_v62  ;;  %7009 = vst [vmem:[#allocation62_spill] sm:$0xff] %v5163_v50  ;;  %vm5171_vm0 = vmor %vm7010_vm15, %vm696_vm4  ;;  %vm640_vm4 = vcmp.eq.s32.totalorder %v4321_v45, %v4846_v47  ;;  %v7032_v22 = vsel %vm5250_vm3, 4294967295, %v7031_v22  ;;  %v5300_v42 = vsel %vm5250_vm3, 1.0, %v6849_v62 }
  0x82   : > { %v7012_v14 = vsel %vm5171_vm0, 4294967295, %v7011_v14  ;;  %v1120_v38 = vpack.c.bf16 %v3078_v21, %v3074_v32  ;;  %v3082_v32 = vsel %vm5125_vm8, 1.0, %v6849_v62  ;;  %v3086_v21 = vsel %vm5149_vm13, 1.0, %v6849_v62  ;;  %vm5220_vm15 = vmor %vm7021_vm10, %vm7020_vm5  ;;  %7033 = vst [vmem:[#allocation68_spill] sm:$0xff] %v7032_v22 }
  0x83   : > { %7013 = vst [vmem:[#allocation63_spill] sm:$0xff] %v7012_v14  ;;  %v5229_v28 = vsel %vm5171_vm0, 1.0, %v6849_v62  ;;  %vm7026_vm8 = vcmp.eq.s32.totalorder %v4285_v60, %v4846_v47  ;;  %vm7027_vm13 = vcmp.eq.s32.totalorder %v4285_v60, %v4843_v31  ;;  %vm499_vm10 = vcmp.eq.s32.totalorder %v4381_v33, %v4843_v31  ;;  %7040 = vst [vmem:[#allocation70_spill] sm:$0xff] %v5300_v42 }
  0x84   : > { %1913 = vxpose.xlu0.c.b16.cont [3/8] %v1152_v2, 128  ;;  %7024 = vst [vmem:[#allocation65_spill] sm:$0xff] %v5229_v28  ;;  %v5234_v2 = vsel %vm5185_vm14, 1.0, %v6849_v62  ;;  %vm5242_vm5 = vmor %vm7027_vm13, %vm7026_vm8  ;;  %vm644_vm0 = vcmp.eq.s32.totalorder %v4381_v33, %v4846_v47  ;;  %v451_v14 = vsub.s32 3, %v3733_v3  ;;  %v1124_v24 = vpack.c.bf16 %v3086_v21, %v3082_v32 }
  0x85   : > { %1848 = vxpose.xlu1.c.b16.cont [2/8] %v1116_v59, 128  ;;  %v1156_v59 = vpack.c.bf16 %v5163_v50, %v5158_v37  ;;  %7025 = vst [vmem:[#allocation66_spill] sm:$0xff] %v5234_v2  ;;  %v7029_v9 = vsel %vm5242_vm5, 4294967295, %v7028_v9  ;;  %vm7034_vm8 = vcmp.eq.s32.totalorder %v4321_v45, %v4843_v31  ;;  %v3090_v32 = vsel %vm5196_vm11, 1.0, %v6849_v62  ;;  %vm5316_vm14 = vmor %vm571_vm2, %vm716_vm6 }
  0x86   : > { %7030 = vst [vmem:[#allocation67_spill] sm:$0xff] %v7029_v9  ;;  %vm5262_vm13 = vmor %vm7034_vm8, %vm640_vm4  ;;  %v3094_v21 = vsel %vm5220_vm15, 1.0, %v6849_v62  ;;  %vm648_vm8 = vcmp.eq.s32.totalorder %v4497_v8, %v4846_v47  ;;  %v5295_v54 = vsel %vm5242_vm5, 1.0, %v6849_v62  ;;  %vm507_vm15 = vcmp.eq.s32.totalorder %v4518_v61, %v4843_v31  ;;  %v3640_v9 = vld [vmem:[%s3744_s12] sm:$0xf] }
  0x87   : > { %vm5286_vm4 = vmor %vm499_vm10, %vm644_vm0  ;;  %7039 = vst [vmem:[#allocation69_spill] sm:$0xff] %v5295_v54  ;;  %vm7041_vm0 = vcmp.eq.s32.totalorder %v4402_v4, %v4843_v31  ;;  %vm652_vm10 = vcmp.eq.s32.totalorder %v4518_v61, %v4846_v47  ;;  %v7045_v22 = vmov 0  ;;  %vm720_vm5 = vcmp.eq.s32.totalorder %v4535_v10, %v4846_v47 }
  0x88   : > { %1914 = vxpose.xlu0.c.b16.cont [4/8] %v1156_v59, 128  ;;  %vm5308_vm11 = vmor %vm7041_vm0, %vm712_vm7  ;;  %v7042_v59 = vmov 0  ;;  %v7046_v22 = vsel %vm5316_vm14, 4294967295, %v7045_v22  ;;  %v5325_v52 = vrot.slane %v3640_v9, %v451_v14  ;;  %v5328_v63 = vrot.slane %v3770_v15, %v451_v14 }
  0x89   : > { %1849 = vxpose.xlu1.c.b16.cont [3/8] %v1120_v38, 128  ;;  %v1160_v38 = vpack.c.bf16 %v5234_v2, %v5229_v28  ;;  %v7043_v59 = vsel %vm5308_vm11, 4294967295, %v7042_v59  ;;  %7047 = vst [vmem:[#allocation72_spill] sm:$0xff] %v7046_v22  ;;  %v1128_v39 = vpack.c.bf16 %v3094_v21, %v3090_v32  ;;  %vm7048_vm7 = vcmp.eq.s32.totalorder %v4497_v8, %v4843_v31  ;;  %v3622_v21 = vld [vmem:[%s4239_s13 + $0x70] sm:$0xff]   ;;  %v3623_v22 = vld [vmem:[%s4239_s13 + $0x78] sm:$0xff]  }
  0x8a   : > { %7044 = vst [vmem:[#allocation71_spill] sm:$0xff] %v7043_v59  ;;  %vm5333_vm2 = vmor %vm7048_vm7, %vm648_vm8  ;;  %vm579_vm6 = vcmp.eq.s32.totalorder %v7051_v58, %v4843_v31  ;;  %vm724_vm0 = vcmp.eq.s32.totalorder %v7051_v58, %v4846_v47  ;;  %v1164_v15 = vpack.c.bf16 %v5300_v42, %v5295_v54  ;;  %v3102_v14 = vsel %vm5286_vm4, 1.0, %v6849_v62  ;;  %3521 = vmatprep.mubr.bf16.mxu0 %v3622_v21 }
  0x8b   : > { %vm5357_vm8 = vmor %vm507_vm15, %vm652_vm10  ;;  %vm656_vm7 = vcmp.eq.s32.totalorder %v4635_v53, %v4846_v47  ;;  %v5366_v49 = vsel %vm5308_vm11, 1.0, %v6849_v62  ;;  %v5371_v40 = vsel %vm5316_vm14, 1.0, %v6849_v62  ;;  %vm515_vm15 = vcmp.eq.s32.totalorder %v4651_v56, %v4843_v31  ;;  %3522 = vmatmul.mubr.bf16.gmra.mrb[28].mxu0 %v3623_v22 }
  0x8c   : > { %1915 = vxpose.xlu0.c.b16.cont [5/8] %v1160_v38, 128  ;;  %7054 = vst [vmem:[#allocation40_spill] sm:$0xff] %v5366_v49  ;;  %7055 = vst [vmem:[#allocation73_spill] sm:$0xff] %v5371_v40  ;;  %v7057_v38 = vmov 0  ;;  %vm660_vm10 = vcmp.eq.s32.totalorder %v4651_v56, %v4846_v47  ;;  %v7060_v32 = vmov 0  ;;  %vm665_vm11 = vcmp.eq.s32.totalorder %v3750_v7, %v5328_v63 }
  0x8d   : > { %1850 = vxpose.xlu1.c.b16.cont [4/8] %v1124_v24, 128  ;;  %v3098_v24 = vsel %vm5262_vm13, 1.0, %v6849_v62  ;;  %vm7056_vm13 = vcmp.eq.s32.totalorder %v4535_v10, %v4843_v31  ;;  %vm5387_vm3 = vmor %vm579_vm6, %vm724_vm0  ;;  %vm524_vm6 = vcmp.eq.s32.totalorder %v3759_v11, %v5325_v52  ;;  %vm669_vm0 = vcmp.eq.s32.totalorder %v3759_v11, %v5328_v63 }
  0x8e   : > { %vm5379_vm4 = vmor %vm7056_vm13, %vm720_vm5  ;;  %v7061_v32 = vsel %vm5387_vm3, 4294967295, %v7060_v32  ;;  %v1132_v59 = vpack.c.bf16 %v3102_v14, %v3098_v24  ;;  %vm7063_vm5 = vcmp.eq.s32.totalorder %v4635_v53, %v4843_v31  ;;  %v3106_v24 = vsel %vm5333_vm2, 1.0, %v6849_v62  ;;  %v7253_v31 = vld [vmem:[#allocation13_spill] sm:$0xff] }
  0x8f   : > { %v7058_v38 = vsel %vm5379_vm4, 4294967295, %v7057_v38  ;;  %7062 = vst [vmem:[#allocation75_spill] sm:$0xff] %v7061_v32  ;;  %vm5400_vm13 = vmor %vm7063_vm5, %vm656_vm7  ;;  %v3110_v14 = vsel %vm5357_vm8, 1.0, %v6849_v62  ;;  %vm601_vm5 = vcmp.eq.s32.totalorder %v3733_v3, %v5328_v63  ;;  %v5433_v44 = vsel %vm5379_vm4, 1.0, %v6849_v62 }
  0x90   : > { %7059 = vst [vmem:[#allocation74_spill] sm:$0xff] %v7058_v38  ;;  %1916 = vxpose.xlu0.c.b16.cont [6/8] %v1164_v15, 128  ;;  %vm5424_vm7 = vmor %vm515_vm15, %vm660_vm10  ;;  %v5438_v47 = vsel %vm5387_vm3, 1.0, %v6849_v62  ;;  %vm7070_vm2 = vcmp.eq.s32.totalorder %v3750_v7, %v5325_v52  ;;  %v7073_v15 = vmov 0  ;;  %v1136_v7 = vpack.c.bf16 %v3110_v14, %v3106_v24 }
  0x91   : > { %1851 = vxpose.xlu1.c.b16.cont [5/8] %v1128_v39, 128  ;;  %v1168_v39 = vpack.c.bf16 %v5371_v40, %v5366_v49  ;;  %7068 = vst [vmem:[#allocation76_spill] sm:$0xff] %v5433_v44  ;;  %7069 = vst [vmem:[#allocation77_spill] sm:$0xff] %v5438_v47  ;;  %vm7075_vm15 = vcmp.eq.s32.totalorder %v3733_v3, %v5325_v52  ;;  %v1172_v11 = vpack.c.bf16 %v5438_v47, %v5433_v44  ;;  %v7089_v9 = vmov 0 }
  0x92   : > { %vm5446_vm8 = vmor %vm7070_vm2, %vm665_vm11  ;;  %v3114_v3 = vsel %vm5400_vm13, 1.0, %v6849_v62  ;;  %vm609_vm11 = vcmp.eq.s32.totalorder %v3780_v18, %v5328_v63  ;;  %vm7084_vm13 = vcmp.eq.s32.totalorder %v3773_v16, %v5328_v63  ;;  %vm613_vm3 = vcmp.eq.s32.totalorder %v3783_v19, %v5328_v63 }
  0x93   : > { %vm5460_vm14 = vmor %vm524_vm6, %vm669_vm0  ;;  %vm532_vm6 = vcmp.eq.s32.totalorder %v3777_v17, %v5325_v52  ;;  %vm677_vm0 = vcmp.eq.s32.totalorder %v3777_v17, %v5328_v63  ;;  %v5504_v42 = vsel %vm5446_vm8, 1.0, %v6849_v62  ;;  %v7103_v22 = vmov 0 }
  0x94   : > { %v7074_v15 = vsel %vm5460_vm14, 4294967295, %v7073_v15  ;;  %vm5471_vm10 = vmor %vm7075_vm15, %vm601_vm5  ;;  %1917 = vxpose.xlu0.c.b16.cont [7/8] %v1168_v39, 128  ;;  %vm7078_vm5 = vcmp.eq.s32.totalorder %v3762_v12, %v5328_v63  ;;  %vm7079_vm15 = vcmp.eq.s32.totalorder %v3762_v12, %v5325_v52  ;;  %7082 = vst [vmem:[#allocation78_spill] sm:$0xff] %v5504_v42  ;;  %v5509_v54 = vsel %vm5460_vm14, 1.0, %v6849_v62 }
  0x95   : > { %1852 = vxpose.xlu1.c.b16.cont [6/8] %v1132_v59, 128  ;;  %v3118_v59 = vsel %vm5424_vm7, 1.0, %v6849_v62  ;;  %vm5495_vm2 = vmor %vm7079_vm15, %vm7078_vm5  ;;  %7083 = vst [vmem:[#allocation79_spill] sm:$0xff] %v5509_v54  ;;  %vm7085_vm7 = vcmp.eq.s32.totalorder %v3773_v16, %v5325_v52  ;;  %v7086_v12 = vmov 0  ;;  %vm468_vm15 = vcmp.eq.s32.totalorder %v3783_v19, %v5325_v52 }
  0x96   : > { %vm5517_vm5 = vmor %vm7085_vm7, %vm7084_vm13  ;;  %vm681_vm14 = vcmp.eq.s32.totalorder %v3786_v20, %v5328_v63  ;;  %v1140_v16 = vpack.c.bf16 %v3118_v59, %v3114_v3  ;;  %vm7092_vm13 = vcmp.eq.s32.totalorder %v3780_v18, %v5325_v52  ;;  %v1145_v39 = vpack.c.bf16 %v5509_v54, %v5504_v42 }
  0x97   : > { %v7087_v12 = vsel %vm5517_vm5, 4294967295, %v7086_v12  ;;  %vm5525_vm4 = vmor %vm532_vm6, %vm677_vm0  ;;  %vm540_vm6 = vcmp.eq.s32.totalorder %v3797_v23, %v5325_v52  ;;  %vm685_vm0 = vcmp.eq.s32.totalorder %v3797_v23, %v5328_v63  ;;  %v3059_v18 = vsel %vm5471_vm10, 1.0, %v6849_v62 }
  0x98   : > { %7088 = vst [vmem:[#allocation80_spill] sm:$0xff] %v7087_v12  ;;  %v7090_v9 = vsel %vm5525_vm4, 4294967295, %v7089_v9  ;;  %vm5536_vm7 = vmor %vm7092_vm13, %vm609_vm11  ;;  %1918 = vxpose.xlu0.c.b16.end [8/8] %v1172_v11, 128  ;;  %v3063_v24 = vsel %vm5495_vm2, 1.0, %v6849_v62  ;;  %vm617_vm13 = vcmp.eq.s32.totalorder %v3805_v25, %v5328_v63  ;;  %v5566_v14 = vsel %vm5517_vm5, 1.0, %v6849_v62 }
  0x99   : > { %7091 = vst [vmem:[#allocation81_spill] sm:$0xff] %v7090_v9  ;;  %1853 = vxpose.xlu1.c.b16.cont [7/8] %v1136_v7, 128  ;;  %vm5557_vm11 = vmor %vm468_vm15, %vm613_vm3  ;;  %v5571_v7 = vsel %vm5525_vm4, 1.0, %v6849_v62  ;;  %vm7099_vm3 = vcmp.eq.s32.totalorder %v3786_v20, %v5325_v52  ;;  %v7100_v19 = vmov 0  ;;  %vm476_vm2 = vcmp.eq.s32.totalorder %v3808_v26, %v5325_v52 }
  0x9a   : > { %7097 = vst [vmem:[#allocation82_spill] sm:$0xff] %v5566_v14  ;;  %7098 = vst [vmem:[#allocation83_spill] sm:$0xff] %v5571_v7  ;;  %vm621_vm15 = vcmp.eq.s32.totalorder %v3808_v26, %v5328_v63  ;;  %vm689_vm5 = vcmp.eq.s32.totalorder %v3834_v29, %v5328_v63  ;;  %v1113_v20 = vpack.c.bf16 %v3063_v24, %v3059_v18  ;;  %v3071_v59 = vsel %vm5557_vm11, 1.0, %v6849_v62 }
  0x9b   : > { %vm5579_vm10 = vmor %vm7099_vm3, %vm681_vm14  ;;  %vm7106_vm14 = vcmp.eq.s32.totalorder %v3805_v25, %v5325_v52  ;;  %v1149_v3 = vpack.c.bf16 %v5571_v7, %v5566_v14  ;;  %v3067_v25 = vsel %vm5536_vm7, 1.0, %v6849_v62  ;;  %vm7113_vm7 = vcmp.eq.s32.totalorder %v3834_v29, %v5325_v52  ;;  %v3624_v29 = vld [vmem:[%s4239_s13 + $0x80] sm:$0xff]  }
  0x9c   : > { %v7101_v19 = vsel %vm5579_vm10, 4294967295, %v7100_v19  ;;  %vm5587_vm12 = vmor %vm540_vm6, %vm685_vm0  ;;  %vm548_vm6 = vcmp.eq.s32.totalorder %v3837_v30, %v5325_v52  ;;  %vm693_vm0 = vcmp.eq.s32.totalorder %v3837_v30, %v5328_v63  ;;  %1927 = vxpose.xlu0.c.b16.start [1/8] %v1145_v39, 128  ;;  %v5628_v17 = vsel %vm5579_vm10, 1.0, %v6849_v62  ;;  %v3625_v39 = vld [vmem:[%s4239_s13 + $0x88] sm:$0xff]   ;;  %3525 = vmatprep.mubr.bf16.mxu0 %v3624_v29 }
  0x9d   : > { %7102 = vst [vmem:[#allocation84_spill] sm:$0xff] %v7101_v19  ;;  %v7104_v22 = vsel %vm5587_vm12, 4294967295, %v7103_v22  ;;  %1854 = vxpose.xlu1.c.b16.end [8/8] %v1140_v16, 128  ;;  %vm5598_vm3 = vmor %vm7106_vm14, %vm617_vm13  ;;  %vm625_vm14 = vcmp.eq.s32.totalorder %v4071_v0, %v5328_v63  ;;  %v5633_v16 = vsel %vm5587_vm12, 1.0, %v6849_v62  ;;  %v7114_v26 = vmov 0  ;;  %3526 = vmatmul.mubr.bf16.gmra.mrb[32].mxu0 %v3625_v39 }
  0x9e   : > { %7105 = vst [vmem:[#allocation85_spill] sm:$0xff] %v7104_v22  ;;  %vm5619_vm13 = vmor %vm476_vm2, %vm621_vm15  ;;  %vm484_vm2 = vcmp.eq.s32.totalorder %v4098_v6, %v5325_v52  ;;  %vm629_vm15 = vcmp.eq.s32.totalorder %v4098_v6, %v5328_v63  ;;  %v7117_v21 = vmov 0  ;;  %vm697_vm10 = vcmp.eq.s32.totalorder %v4136_v34, %v5328_v63 }
  0x9f   : > { %7111 = vst [vmem:[#allocation86_spill] sm:$0xff] %v5628_v17  ;;  %7112 = vst [vmem:[#allocation87_spill] sm:$0xff] %v5633_v16  ;;  %v1117_v18 = vpack.c.bf16 %v3071_v59, %v3067_v25  ;;  %v1153_v23 = vpack.c.bf16 %v5633_v16, %v5628_v17  ;;  %v7128_v6 = vmov 0 }
  0xa0   : > { %vm5641_vm11 = vmor %vm7113_vm7, %vm689_vm5  ;;  %vm7120_vm5 = vcmp.eq.s32.totalorder %v4071_v0, %v5325_v52  ;;  %1928 = vxpose.xlu0.c.b16.cont [2/8] %v1149_v3, 128  ;;  %v3075_v0 = vsel %vm5598_vm3, 1.0, %v6849_v62  ;;  %vm7127_vm3 = vcmp.eq.s32.totalorder %v4136_v34, %v5325_v52  ;;  %v7131_v34 = vmov 0 }
  0xa1   : > { %v7115_v26 = vsel %vm5641_vm11, 4294967295, %v7114_v26  ;;  %vm5649_vm4 = vmor %vm548_vm6, %vm693_vm0  ;;  %1863 = vxpose.xlu1.c.b16.start [1/8] %v1113_v20, 128  ;;  %vm556_vm6 = vcmp.eq.s32.totalorder %v4139_v35, %v5325_v52  ;;  %vm701_vm0 = vcmp.eq.s32.totalorder %v4139_v35, %v5328_v63  ;;  %v3079_v20 = vsel %vm5619_vm13, 1.0, %v6849_v62 }
  0xa2   : > { %7116 = vst [vmem:[#allocation88_spill] sm:$0xff] %v7115_v26  ;;  %v7118_v21 = vsel %vm5649_vm4, 4294967295, %v7117_v21  ;;  %vm5662_vm7 = vmor %vm7120_vm5, %vm625_vm14  ;;  %vm633_vm5 = vcmp.eq.s32.totalorder %v4231_v1, %v5328_v63  ;;  %v5695_v11 = vsel %vm5641_vm11, 1.0, %v6849_v62  ;;  %v5700_v3 = vsel %vm5649_vm4, 1.0, %v6849_v62  ;;  %v1887_v59 = vpop.trf.xlu0 }
  0xa3   : > { %7119 = vst [vmem:[#allocation89_spill] sm:$0xff] %v7118_v21  ;;  %vm5686_vm14 = vmor %vm484_vm2, %vm629_vm15  ;;  %vm637_vm15 = vcmp.eq.s32.totalorder %v4261_v43, %v5328_v63  ;;  %vm705_vm2 = vcmp.eq.s32.totalorder %v4285_v60, %v5328_v63  ;;  %2071 = vmatprep.mubr.bf16.mxu1 %v1887_v59  ;;  %v1121_v30 = vpack.c.bf16 %v3079_v20, %v3075_v0  ;;  %v3083_v39 = vsel %vm5662_vm7, 1.0, %v6849_v62 }
  0xa4   : > { %7125 = vst [vmem:[#allocation90_spill] sm:$0xff] %v5695_v11  ;;  %7126 = vst [vmem:[#allocation91_spill] sm:$0xff] %v5700_v3  ;;  %1929 = vxpose.xlu0.c.b16.cont [3/8] %v1153_v23, 128  ;;  %v1157_v29 = vpack.c.bf16 %v5700_v3, %v5695_v11  ;;  %vm7142_vm7 = vcmp.eq.s32.totalorder %v4285_v60, %v5325_v52  ;;  %v7147_v60 = vmov 0  ;;  %vm576_vm4 = vcmp.eq.s32.totalorder %v4535_v10, %v5325_v52 }
  0xa5   : > { %vm5708_vm13 = vmor %vm7127_vm3, %vm697_vm10  ;;  %1864 = vxpose.xlu1.c.b16.cont [2/8] %v1117_v18, 128  ;;  %vm709_vm10 = vcmp.eq.s32.totalorder %v4302_v55, %v5328_v63  ;;  %vm7146_vm3 = vcmp.eq.s32.totalorder %v4302_v55, %v5325_v52 }
  0xa6   : > { %v7129_v6 = vsel %vm5708_vm13, 4294967295, %v7128_v6  ;;  %vm5722_vm12 = vmor %vm556_vm6, %vm701_vm0  ;;  %vm7134_vm6 = vcmp.eq.s32.totalorder %v4231_v1, %v5325_v52  ;;  %v3087_v1 = vsel %vm5686_vm14, 1.0, %v6849_v62  ;;  %v5769_v24 = vsel %vm5708_vm13, 1.0, %v6849_v62  ;;  %v1888_v20 = vpop.trf.xlu0 }
  0xa7   : > { %7130 = vst [vmem:[#allocation92_spill] sm:$0xff] %v7129_v6  ;;  %v7132_v34 = vsel %vm5722_vm12, 4294967295, %v7131_v34  ;;  %vm5738_vm0 = vmor %vm7134_vm6, %vm633_vm5  ;;  %vm7137_vm5 = vcmp.eq.s32.totalorder %v4261_v43, %v5325_v52  ;;  %v1823_v23 = vpop.trf.xlu1  ;;  %v5774_v0 = vsel %vm5722_vm12, 1.0, %v6849_v62  ;;  %v7143_v43 = vmov 0 }
  0xa8   : > { %7133 = vst [vmem:[#allocation93_spill] sm:$0xff] %v7132_v34  ;;  %vm5760_vm6 = vmor %vm7137_vm5, %vm637_vm15  ;;  %2072 = vmatmul.mubr.bf16.vlgmr.msra.gmra.mrb[0].mxu1 %v1823_v23  ;;  %v1125_v25 = vpack.c.bf16 %v3087_v1, %v3083_v39  ;;  %vm7150_vm5 = vcmp.eq.s32.totalorder %v4321_v45, %v5328_v63  ;;  %1930 = vxpose.xlu0.c.b16.cont [4/8] %v1157_v29, 128  ;;  %v7166_v1 = vmov 0 }
  0xa9   : > { %7140 = vst [vmem:[#allocation94_spill] sm:$0xff] %v5769_v24  ;;  %7141 = vst [vmem:[#allocation95_spill] sm:$0xff] %v5774_v0  ;;  %2079 = vmatprep.mubr.bf16.mxu1 %v1888_v20  ;;  %1865 = vxpose.xlu1.c.b16.cont [3/8] %v1121_v30, 128  ;;  %v1161_v59 = vpack.c.bf16 %v5774_v0, %v5769_v24  ;;  %v3091_v30 = vsel %vm5738_vm0, 1.0, %v6849_v62  ;;  %vm7160_vm0 = vcmp.eq.s32.totalorder %v4402_v4, %v5328_v63 }
  0xaa   : > { %vm5782_vm14 = vmor %vm7142_vm7, %vm705_vm2  ;;  %vm717_vm2 = vcmp.eq.s32.totalorder %v4418_v57, %v5328_v63  ;;  %vm649_vm7 = vcmp.eq.s32.totalorder %v4497_v8, %v5328_v63 }
  0xab   : > { %v7144_v43 = vsel %vm5782_vm14, 4294967295, %v7143_v43  ;;  %vm5796_vm12 = vmor %vm7146_vm3, %vm709_vm10  ;;  %vm7151_vm10 = vcmp.eq.s32.totalorder %v4321_v45, %v5325_v52  ;;  %v3095_v45 = vsel %vm5760_vm6, 1.0, %v6849_v62  ;;  %v5843_v35 = vsel %vm5782_vm14, 1.0, %v6849_v62 }
  0xac   : > { %7145 = vst [vmem:[#allocation96_spill] sm:$0xff] %v7144_v43  ;;  %v7148_v60 = vsel %vm5796_vm12, 4294967295, %v7147_v60  ;;  %vm5812_vm3 = vmor %vm7151_vm10, %vm7150_vm5  ;;  %vm7154_vm5 = vcmp.eq.s32.totalorder %v4381_v33, %v5328_v63  ;;  %vm7155_vm10 = vcmp.eq.s32.totalorder %v4381_v33, %v5325_v52  ;;  %v5848_v29 = vsel %vm5796_vm12, 1.0, %v6849_v62  ;;  %1931 = vxpose.xlu0.c.b16.cont [5/8] %v1161_v59, 128 }
  0xad   : > { %7149 = vst [vmem:[#allocation97_spill] sm:$0xff] %v7148_v60  ;;  %vm5834_vm15 = vmor %vm7155_vm10, %vm7154_vm5  ;;  %vm7161_vm6 = vcmp.eq.s32.totalorder %v4402_v4, %v5325_v52  ;;  %v7162_v33 = vmov 0  ;;  %vm653_vm14 = vcmp.eq.s32.totalorder %v4518_v61, %v5328_v63  ;;  %vm7165_vm12 = vcmp.eq.s32.totalorder %v4418_v57, %v5325_v52  ;;  %v1824_v4 = vpop.trf.xlu1  ;;  %1866 = vxpose.xlu1.c.b16.cont [4/8] %v1125_v25, 128  ;;  %v1889_v57 = vpop.trf.xlu0 }
  0xae   : > { %7158 = vst [vmem:[#allocation98_spill] sm:$0xff] %v5843_v35  ;;  %7159 = vst [vmem:[#allocation99_spill] sm:$0xff] %v5848_v29  ;;  %v1129_v18 = vpack.c.bf16 %v3095_v45, %v3091_v30  ;;  %v1165_v20 = vpack.c.bf16 %v5848_v29, %v5843_v35  ;;  %v3103_v25 = vsel %vm5834_vm15, 1.0, %v6849_v62  ;;  %vm512_vm15 = vcmp.eq.s32.totalorder %v4635_v53, %v5325_v52  ;;  %v3627_v45 = vld [vmem:[%s4239_s13 + $0x98] sm:$0xff]  }
  0xaf   : > { %vm5856_vm5 = vmor %vm7161_vm6, %vm7160_vm0  ;;  %vm721_vm0 = vcmp.eq.s32.totalorder %v4535_v10, %v5328_v63  ;;  %vm7169_vm6 = vcmp.eq.s32.totalorder %v4497_v8, %v5325_v52  ;;  %v3099_v8 = vsel %vm5812_vm3, 1.0, %v6849_v62  ;;  %vm657_vm3 = vcmp.eq.s32.totalorder %v4635_v53, %v5328_v63  ;;  %v3626_v10 = vld [vmem:[%s4239_s13 + $0x90] sm:$0xff]  }
  0xb0   : > { %v7163_v33 = vsel %vm5856_vm5, 4294967295, %v7162_v33  ;;  %vm5867_vm13 = vmor %vm7165_vm12, %vm717_vm2  ;;  %vm580_vm12 = vcmp.eq.s32.totalorder %v7051_v58, %v5325_v52  ;;  %vm725_vm2 = vcmp.eq.s32.totalorder %v7051_v58, %v5328_v63  ;;  %v5907_v59 = vsel %vm5856_vm5, 1.0, %v6849_v62  ;;  %2080 = vmatmul.mubr.bf16.gmra.mrb[4].mxu1 %v1824_v4  ;;  %1932 = vxpose.xlu0.c.b16.cont [6/8] %v1165_v20, 128  ;;  %v3628_v58 = vld [vmem:[%s4239_s13 + $0xa0] sm:$0xff]  }
  0xb1   : > { %7164 = vst [vmem:[#allocation100_spill] sm:$0xff] %v7163_v33  ;;  %v7167_v1 = vsel %vm5867_vm13, 4294967295, %v7166_v1  ;;  %vm5878_vm10 = vmor %vm7169_vm6, %vm649_vm7  ;;  %vm7172_vm7 = vcmp.eq.s32.totalorder %v4518_v61, %v5325_v52  ;;  %v5912_v55 = vsel %vm5867_vm13, 1.0, %v6849_v62  ;;  %v7177_v61 = vmov 0  ;;  %2087 = vmatprep.mubr.bf16.mxu1 %v1889_v57  ;;  %1867 = vxpose.xlu1.c.b16.cont [5/8] %v1129_v18, 128  ;;  %v1825_v23 = vpop.trf.xlu1  ;;  %v1890_v57 = vpop.trf.xlu0 }
  0xb2   : > { %7168 = vst [vmem:[#allocation101_spill] sm:$0xff] %v7167_v1  ;;  %vm5900_vm6 = vmor %vm7172_vm7, %vm653_vm14  ;;  %v7180_v30 = vmov 0  ;;  %vm516_vm13 = vcmp.eq.s32.totalorder %v4651_v56, %v5325_v52  ;;  %v1133_v39 = vpack.c.bf16 %v3103_v25, %v3099_v8  ;;  %v1169_v32 = vpack.c.bf16 %v5912_v55, %v5907_v59  ;;  %3529 = vmatprep.mubr.bf16.mxu0 %v3626_v10 }
  0xb3   : > { %7175 = vst [vmem:[#allocation102_spill] sm:$0xff] %v5907_v59  ;;  %7176 = vst [vmem:[#allocation103_spill] sm:$0xff] %v5912_v55  ;;  %v3107_v4 = vsel %vm5878_vm10, 1.0, %v6849_v62  ;;  %v3111_v38 = vsel %vm5900_vm6, 1.0, %v6849_v62  ;;  %3530 = vmatmul.mubr.bf16.gmra.mrb[36].mxu0 %v3627_v45 }
  0xb4   : > { %vm5920_vm14 = vmor %vm576_vm4, %vm721_vm0  ;;  %vm661_vm4 = vcmp.eq.s32.totalorder %v4651_v56, %v5328_v63  ;;  %v1137_v53 = vpack.c.bf16 %v3111_v38, %v3107_v4  ;;  %1933 = vxpose.xlu0.c.b16.cont [7/8] %v1169_v32, 128  ;;  %v3629_v32 = vld [vmem:[%s4239_s13 + $0xa8] sm:$0xff]   ;;  %3533 = vmatprep.mubr.bf16.mxu0 %v3628_v58  ;;  %v3630_v4 = vld [vmem:[%s4239_s13 + $0xb0] sm:$0xff]  }
  0xb5   : > { %v7178_v61 = vsel %vm5920_vm14, 4294967295, %v7177_v61  ;;  %vm5928_vm7 = vmor %vm580_vm12, %vm725_vm2  ;;  %v5952_v63 = vsel %vm5920_vm14, 1.0, %v6849_v62  ;;  %1868 = vxpose.xlu1.c.b16.cont [6/8] %v1133_v39, 128  ;;  %v1826_v52 = vpop.trf.xlu1  ;;  %v1891_v38 = vpop.trf.xlu0 }
  0xb6   : > { %7179 = vst [vmem:[#allocation104_spill] sm:$0xff] %v7178_v61  ;;  %v7181_v30 = vsel %vm5928_vm7, 4294967295, %v7180_v30  ;;  %vm785_vm0 = vmor %vm512_vm15, %vm657_vm3  ;;  %v5957_v18 = vsel %vm5928_vm7, 1.0, %v6849_v62 }
  0xb7   : > { %7182 = vst [vmem:[#allocation105_spill] sm:$0xff] %v7181_v30  ;;  %7183 = vst [vmem:[#allocation106_spill] sm:$0xff] %v5952_v63  ;;  %v1173_v20 = vpack.c.bf16 %v5957_v18, %v5952_v63  ;;  %v3115_v8 = vsel %vm785_vm0, 1.0, %v6849_v62 }
  0xb8   : > { %7184 = vst [vmem:[#allocation107_spill] sm:$0xff] %v5957_v18  ;;  %vm789_vm10 = vmor %vm516_vm13, %vm661_vm4  ;;  %2088 = vmatmul.mubr.bf16.gmra.mrb[8].mxu1 %v1825_v23  ;;  %v3631_v23 = vld [vmem:[%s4239_s13 + $0xb8] sm:$0xff]  }
  0xb9   : > { %v3119_v25 = vsel %vm789_vm10, 1.0, %v6849_v62  ;;  %2095 = vmatprep.mubr.bf16.mxu1 %v1890_v57  ;;  %1869 = vxpose.xlu1.c.b16.cont [7/8] %v1137_v53, 128  ;;  %v1827_v10 = vpop.trf.xlu1  ;;  %v1892_v45 = vpop.trf.xlu0  ;;  %vm3241_vm13 = vmpackc.low %vm3889_vm1, %vm3845_vm9 }
  0xba   : > { %v1141_v56 = vpack.c.bf16 %v3119_v25, %v3115_v8  ;;  %1934 = vxpose.xlu0.c.b16.end [8/8] %v1173_v20, 128  ;;  %v3632_v25 = vld [vmem:[%s4239_s13 + $0xc0] sm:$0xff]  }
  0xbb   : > { %3534 = vmatmul.mubr.bf16.gmra.mrb[40].mxu0 %v3629_v32 }
  0xbc   : > { %3537 = vmatprep.mubr.bf16.mxu0 %v3630_v4 }
  0xbd   : > { %1870 = vxpose.xlu1.c.b16.end [8/8] %v1141_v56, 128  ;;  %v1828_v62 = vpop.trf.xlu1  ;;  %v1893_v39 = vpop.trf.xlu0  ;;  %v3633_v56 = vld [vmem:[%s4239_s13 + $0xc8] sm:$0xff]  }
  0xc0   : > { %2096 = vmatmul.mubr.bf16.gmra.mrb[12].mxu1 %v1826_v52 }
  0xc1   : > { %2103 = vmatprep.mubr.bf16.mxu1 %v1891_v38  ;;  %v1829_v53 = vpop.trf.xlu1  ;;  %v1894_v57 = vpop.trf.xlu0 }
  0xc3   : > { %3538 = vmatmul.mubr.bf16.gmra.mrb[44].mxu0 %v3631_v23 }
  0xc4   : > { %3541 = vmatprep.mubr.bf16.mxu0 %v3632_v25 }
  0xc5   : > { %v1830_v20 = vpop.trf.xlu1  ;;  %v1903_v8 = vpop.trf.xlu0 }
  0xc8   : > { %2104 = vmatmul.mubr.bf16.gmra.mrb[16].mxu1 %v1827_v10  ;;  %v3634_v10 = vld [vmem:[%s4239_s13 + $0xd0] sm:$0xff]  }
  0xc9   : > { %2111 = vmatprep.mubr.bf16.mxu1 %v1892_v45  ;;  %v1839_v52 = vpop.trf.xlu1  ;;  %v1904_v38 = vpop.trf.xlu0  ;;  %v3635_v45 = vld [vmem:[%s4239_s13 + $0xd8] sm:$0xff]  }
  0xcb   : > { %3542 = vmatmul.mubr.bf16.gmra.mrb[48].mxu0 %v3633_v56 }
  0xcc   : > { %3545 = vmatprep.mubr.bf16.mxu0 %v3634_v10 }
  0xcd   : > { %v1840_v58 = vpop.trf.xlu1  ;;  %v1905_v32 = vpop.trf.xlu0 }
  0xd0   : > { %2112 = vmatmul.mubr.bf16.gmra.mrb[20].mxu1 %v1828_v62 }
  0xd1   : > { %2119 = vmatprep.mubr.bf16.mxu1 %v1893_v39  ;;  %v1841_v62 = vpop.trf.xlu1  ;;  %v1906_v39 = vpop.trf.xlu0 }
  0xd3   : > { %3546 = vmatmul.mubr.bf16.gmra.mrb[52].mxu0 %v3635_v45 }
  0xd5   : > { %v1842_v4 = vpop.trf.xlu1  ;;  %v1907_v23 = vpop.trf.xlu0 }
  0xd8   : > { %2120 = vmatmul.mubr.bf16.gmra.mrb[24].mxu1 %v1829_v53  ;;  %v3636_v53 = vld [vmem:[%s4239_s13 + $0xe0] sm:$0xff]  }
  0xd9   : > { %2127 = vmatprep.mubr.bf16.mxu1 %v1894_v57  ;;  %v1843_v57 = vpop.trf.xlu1  ;;  %3549 = vmatprep.mubr.bf16.mxu0 %v3636_v53 }
  0xdd   : > { %v1844_v25 = vpop.trf.xlu1 }
  0xe0   : > { %2128 = vmatmul.mubr.bf16.gmra.mrb[28].mxu1 %v1830_v20  ;;  %v3637_v20 = vld [vmem:[%s4239_s13 + $0xe8] sm:$0xff]  }
  0xe1   : > { %2135 = vmatprep.mubr.bf16.mxu1 %v1903_v8  ;;  %v1908_v8 = vpop.trf.xlu0  ;;  %3550 = vmatmul.mubr.bf16.gmra.mrb[56].mxu0 %v3637_v20 }
  0xe5   : > { %v1909_v56 = vpop.trf.xlu0 }
  0xe8   : > { %2136 = vmatmul.mubr.bf16.gmra.mrb[32].mxu1 %v1839_v52  ;;  %v3638_v52 = vld [vmem:[%s4239_s13 + $0xf0] sm:$0xff]  }
  0xe9   : > { %2143 = vmatprep.mubr.bf16.mxu1 %v1904_v38  ;;  %v1845_v38 = vpop.trf.xlu1  ;;  %3553 = vmatprep.mubr.bf16.mxu0 %v3638_v52 }
  0xed   : > { %v1846_v10 = vpop.trf.xlu1 }
  0xf0   : > { %2144 = vmatmul.mubr.bf16.gmra.mrb[36].mxu1 %v1840_v58  ;;  %v3639_v58 = vld [vmem:[%s4239_s13 + $0xf8] sm:$0xff]   ;;  %s3307_s13 = sshll.u32 %s7363_s24, 7 }
  0xf1   : > { %2151 = vmatprep.mubr.bf16.mxu1 %v1905_v32  ;;  %v1910_v32 = vpop.trf.xlu0  ;;  %3554 = vmatmul.mubr.bf16.gmra.mrb[60].mxu0 %v3639_v58  ;;  %v1855_v53 = vpop.trf.xlu1  ;;  %s6527_s16 = scalar_lea.vmem %s6612_s7, %s3307_s13  ;;  %s6563_s19 = scalar_lea.vmem %s6611_s6, %s3307_s13 }
  0xf5   : > { %v1919_v45 = vpop.trf.xlu0  ;;  %v1856_v52 = vpop.trf.xlu1 }
  0xf8   : > { %2152 = vmatmul.mubr.bf16.gmra.mrb[40].mxu1 %v1841_v62 }
  0xf9   : > { %2159 = vmatprep.mubr.bf16.mxu1 %v1906_v39 }
 0x100   : > { %2160 = vmatmul.mubr.bf16.gmra.mrb[44].mxu1 %v1842_v4 }
 0x101   : > { %2167 = vmatprep.mubr.bf16.mxu1 %v1907_v23 }
 0x108   : > { %2168 = vmatmul.mubr.bf16.gmra.mrb[48].mxu1 %v1843_v57  ;;  %v1920_v57 = vpop.trf.xlu0 }
 0x109   : > { %2175 = vmatprep.mubr.bf16.mxu1 %v1908_v8 }
 0x110   : > { %2176 = vmatmul.mubr.bf16.gmra.mrb[52].mxu1 %v1844_v25  ;;  %v5978_v62 = vpop.f32.mrb[0].mxu0 }
 0x111   : > { %2183 = vmatprep.mubr.bf16.mxu1 %v1909_v56  ;;  %v5980_v39 = vpop.f32.mrb[1].mxu0 }
 0x112   : > { %v5982_v4 = vpop.f32.mrb[2].mxu0 }
 0x113   : > { %v5984_v23 = vpop.f32.mrb[3].mxu0 }
 0x118   : > { %2184 = vmatmul.mubr.bf16.gmra.mrb[56].mxu1 %v1845_v38  ;;  %v5986_v20 = vpop.f32.mrb[4].mxu0  ;;  %v1921_v38 = vpop.trf.xlu0 }
 0x119   : > { %2191 = vmatprep.mubr.bf16.mxu1 %v1910_v32  ;;  %v5988_v8 = vpop.f32.mrb[5].mxu0 }
 0x11a   : > { %v5990_v25 = vpop.f32.mrb[6].mxu0 }
 0x11b   : > { %v5992_v56 = vpop.f32.mrb[7].mxu0 }
 0x11c   : > { %v1922_v30 = vpop.trf.xlu0 }
 0x120   : > { %2192 = vmatmul.mubr.bf16.gmra.mrb[60].mxu1 %v1846_v10  ;;  %v1923_v60 = vpop.trf.xlu0 }
 0x121   : > { %2199 = vmatprep.mubr.bf16.mxu1 %v1919_v45  ;;  %v5994_v58 = vpop.f32.mrb[8].mxu0 }
 0x122   : > { %v5996_v32 = vpop.f32.mrb[9].mxu0 }
 0x123   : > { %v5998_v10 = vpop.f32.mrb[10].mxu0 }
 0x124   : > { %v6000_v45 = vpop.f32.mrb[11].mxu0  ;;  %v1924_v21 = vpop.trf.xlu0 }
 0x128   : > { %2200 = vmatmul.mubr.bf16.gmra.mrb[64].mxu1 %v1855_v53  ;;  %v1857_v53 = vpop.trf.xlu1 }
 0x129   : > { %2207 = vmatprep.mubr.bf16.mxu1 %v1920_v57 }
 0x130   : > { %2208 = vmatmul.mubr.bf16.gmra.mrb[68].mxu1 %v1856_v52  ;;  %v6002_v61 = vpop.f32.mrb[12].mxu0  ;;  %v1858_v52 = vpop.trf.xlu1 }
 0x131   : > { %2215 = vmatprep.mubr.bf16.mxu1 %v1921_v38  ;;  %v6004_v57 = vpop.f32.mrb[13].mxu0 }
 0x132   : > { %v6006_v1 = vpop.f32.mrb[14].mxu0 }
 0x133   : > { %v6008_v33 = vpop.f32.mrb[15].mxu0 }
 0x138   : > { %2216 = vmatmul.mubr.bf16.gmra.mrb[72].mxu1 %v1857_v53  ;;  %v6010_v43 = vpop.f32.mrb[16].mxu0  ;;  %v1859_v53 = vpop.trf.xlu1 }
 0x139   : > { %2223 = vmatprep.mubr.bf16.mxu1 %v1922_v30  ;;  %v6012_v38 = vpop.f32.mrb[17].mxu0 }
 0x13a   : > { %v6014_v34 = vpop.f32.mrb[18].mxu0 }
 0x13b   : > { %v6016_v6 = vpop.f32.mrb[19].mxu0 }
 0x13c   : > { %v1860_v19 = vpop.trf.xlu1 }
 0x140   : > { %2224 = vmatmul.mubr.bf16.gmra.mrb[76].mxu1 %v1858_v52  ;;  %v6018_v30 = vpop.f32.mrb[20].mxu0  ;;  %v1925_v52 = vpop.trf.xlu0 }
 0x141   : > { %2231 = vmatprep.mubr.bf16.mxu1 %v1923_v60  ;;  %v6020_v26 = vpop.f32.mrb[21].mxu0  ;;  %v1861_v60 = vpop.trf.xlu1 }
 0x142   : > { %v6022_v22 = vpop.f32.mrb[22].mxu0 }
 0x143   : > { %v6024_v9 = vpop.f32.mrb[23].mxu0 }
 0x144   : > { %v1926_v12 = vpop.trf.xlu0 }
 0x145   : > { %v1862_v63 = vpop.trf.xlu1 }
 0x148   : > { %2232 = vmatmul.mubr.bf16.gmra.mrb[80].mxu1 %v1859_v53  ;;  %v1935_v55 = vpop.trf.xlu0 }
 0x149   : > { %2239 = vmatprep.mubr.bf16.mxu1 %v1924_v21  ;;  %v1871_v44 = vpop.trf.xlu1 }
 0x14c   : > { %v1936_v59 = vpop.trf.xlu0 }
 0x150   : > { %2240 = vmatmul.mubr.bf16.gmra.mrb[84].mxu1 %v1860_v19  ;;  %v1937_v29 = vpop.trf.xlu0 }
 0x151   : > { %2247 = vmatprep.mubr.bf16.mxu1 %v1925_v52 }
 0x152   : > { %v6026_v18 = vpop.f32.mrb[24].mxu0 }
 0x153   : > { %v6028_v53 = vpop.f32.mrb[25].mxu0 }
 0x154   : > { %v6030_v21 = vpop.f32.mrb[26].mxu0  ;;  %v1938_v49 = vpop.trf.xlu0 }
 0x155   : > { %v6032_v47 = vpop.f32.mrb[27].mxu0 }
 0x158   : > { %2248 = vmatmul.mubr.bf16.gmra.mrb[88].mxu1 %v1861_v60  ;;  %v1872_v60 = vpop.trf.xlu1  ;;  %v1939_v11 = vpop.trf.xlu0 }
 0x159   : > { %2255 = vmatprep.mubr.bf16.mxu1 %v1926_v12 }
 0x15c   : > { %v1873_v35 = vpop.trf.xlu1 }
 0x15e   : > { %v6034_v19 = vpop.f32.mrb[28].mxu0 }
 0x15f   : > { %v6036_v52 = vpop.f32.mrb[29].mxu0 }
 0x160   : > { %2256 = vmatmul.mubr.bf16.gmra.mrb[92].mxu1 %v1862_v63  ;;  %v6038_v12 = vpop.f32.mrb[30].mxu0 }
 0x161   : > { %2263 = vmatprep.mubr.bf16.mxu1 %v1935_v55  ;;  %v6040_v40 = vpop.f32.mrb[31].mxu0  ;;  %v1874_v55 = vpop.trf.xlu1 }
 0x165   : > { %v1875_v7 = vpop.trf.xlu1 }
 0x168   : > { %2264 = vmatmul.mubr.bf16.gmra.mrb[96].mxu1 %v1871_v44 }
 0x169   : > { %2271 = vmatprep.mubr.bf16.mxu1 %v1936_v59  ;;  %v6047_v59 = vld [vmem:[%s6610_s5] ss:$0 sm:$0xff] }
 0x170   : > { %2272 = vmatmul.mubr.bf16.gmra.mrb[100].mxu1 %v1872_v60  ;;  %v6042_v63 = vpop.f32.mrb[32].mxu0 }
 0x171   : > { %2279 = vmatprep.mubr.bf16.mxu1 %v1937_v29  ;;  %v6049_v0 = vpop.f32.mrb[33].mxu0 }
 0x172   : > { %v6052_v60 = vpop.f32.mrb[34].mxu0 }
 0x173   : > { %v6054_v3 = vpop.f32.mrb[35].mxu0 }
 0x178   : > { %2280 = vmatmul.mubr.bf16.gmra.mrb[104].mxu1 %v1873_v35 }
 0x179   : > { %2287 = vmatprep.mubr.bf16.mxu1 %v1938_v49 }
 0x17b   : > { %v2073_v44 = vpop.f32.mrb[0].mxu1 }
 0x17c   : > { %v2074_v24 = vadd.f32 %v2073_v44, %v5980_v39  ;;  %v2075_v2 = vpop.f32.mrb[1].mxu1 }
 0x17d   : > { %v2076_v29 = vpop.f32.mrb[2].mxu1 }
 0x17e   : > { %v2335_v49 = vadd.f32 %v6047_v59, %v2074_v24  ;;  %v2077_v35 = vadd.f32 %v2076_v29, %v5984_v23  ;;  %v2078_v28 = vpop.f32.mrb[3].mxu1  ;;  %v1940_v29 = vpop.trf.xlu0 }
 0x180   : > { %v2336_v50 = vadd.f32 %v6047_v59, %v2077_v35  ;;  %2288 = vmatmul.mubr.bf16.gmra.mrb[108].mxu1 %v1874_v55  ;;  %v2399_v16 = vmax.f32 %v2335_v49, 0.0  ;;  %v1876_v55 = vpop.trf.xlu1 }
 0x181   : > { %2295 = vmatprep.mubr.bf16.mxu1 %v1939_v11 }
 0x182   : > { %v2400_v17 = vmax.f32 %v2336_v50, 0.0 }
 0x183   : > { %v2081_v37 = vpop.f32.mrb[4].mxu1 }
 0x184   : > { %v6059_v39 = vpack.c.bf16 %v2400_v17, %v2399_v16  ;;  %v2082_v2 = vadd.f32 %v5978_v62, %v2081_v37  ;;  %v2083_v44 = vpop.f32.mrb[5].mxu1  ;;  %v1877_v14 = vpop.trf.xlu1 }
 0x185   : > { %v2084_v41 = vpop.f32.mrb[6].mxu1 }
 0x186   : > { %v2337_v24 = vadd.f32 %v6047_v59, %v2082_v2  ;;  %v2085_v23 = vadd.f32 %v5982_v4, %v2084_v41  ;;  %v2086_v28 = vpop.f32.mrb[7].mxu1  ;;  %v6065_v17 = vpop.f32.mrb[36].mxu0 }
 0x187   : > { %v6067_v37 = vpop.f32.mrb[37].mxu0  ;;  %v1941_v28 = vpop.trf.xlu0 }
 0x188   : > { %v2338_v35 = vadd.f32 %v6047_v59, %v2085_v23  ;;  %2296 = vmatmul.mubr.bf16.gmra.mrb[112].mxu1 %v1875_v7  ;;  %v2401_v11 = vmax.f32 %v2337_v24, 0.0  ;;  %v6072_v41 = vpop.f32.mrb[38].mxu0 }
 0x189   : > { %2303 = vmatprep.mubr.bf16.mxu1 %v1940_v29  ;;  %v6074_v44 = vpop.f32.mrb[39].mxu0 }
 0x18a   : > { %v2402_v50 = vmax.f32 %v2338_v35, 0.0 }
 0x18b   : > { %v2089_v16 = vpop.f32.mrb[8].mxu1 }
 0x18c   : > { %v6069_v62 = vpack.c.bf16 %v2402_v50, %v2401_v11  ;;  %v2090_v49 = vadd.f32 %v2089_v16, %v5988_v8  ;;  %v2091_v2 = vpop.f32.mrb[9].mxu1 }
 0x18d   : > { %v2092_v4 = vpop.f32.mrb[10].mxu1 }
 0x18e   : > { %v2339_v7 = vadd.f32 %v6047_v59, %v2090_v49  ;;  %v2093_v24 = vadd.f32 %v2092_v4, %v5992_v56  ;;  %v2094_v23 = vpop.f32.mrb[11].mxu1 }
 0x18f   : > { %v1942_v23 = vpop.trf.xlu0 }
 0x190   : > { %v2340_v29 = vadd.f32 %v6047_v59, %v2093_v24  ;;  %2304 = vmatmul.mubr.bf16.gmra.mrb[116].mxu1 %v1876_v55  ;;  %v2403_v35 = vmax.f32 %v2339_v7, 0.0 }
 0x191   : > { %2311 = vmatprep.mubr.bf16.mxu1 %v1941_v28  ;;  %v1878_v28 = vpop.trf.xlu1 }
 0x192   : > { %v2404_v11 = vmax.f32 %v2340_v29, 0.0  ;;  %v6085_v29 = vpop.f32.mrb[40].mxu0 }
 0x193   : > { %v2097_v50 = vpop.f32.mrb[12].mxu1 }
 0x194   : > { %v6079_v8 = vpack.c.bf16 %v2404_v11, %v2403_v35  ;;  %v2098_v16 = vadd.f32 %v5986_v20, %v2097_v50  ;;  %v2099_v2 = vpop.f32.mrb[13].mxu1  ;;  %v6087_v20 = vpop.f32.mrb[41].mxu0 }
 0x195   : > { %v2100_v51 = vpop.f32.mrb[14].mxu1 }
 0x196   : > { %v2341_v49 = vadd.f32 %v6047_v59, %v2098_v16  ;;  %v2101_v56 = vadd.f32 %v5990_v25, %v2100_v51  ;;  %v2102_v4 = vpop.f32.mrb[15].mxu1  ;;  %v6092_v51 = vpop.f32.mrb[42].mxu0 }
 0x197   : > { %v6094_v2 = vpop.f32.mrb[43].mxu0 }
 0x198   : > { %v2342_v24 = vadd.f32 %v6047_v59, %v2101_v56  ;;  %2312 = vmatmul.mubr.bf16.gmra.mrb[120].mxu1 %v1877_v14  ;;  %v2405_v55 = vmax.f32 %v2341_v49, 0.0 }
 0x199   : > { %2319 = vmatprep.mubr.bf16.mxu1 %v1942_v23 }
 0x19a   : > { %v2406_v7 = vmax.f32 %v2342_v24, 0.0 }
 0x19b   : > { %v2105_v35 = vpop.f32.mrb[16].mxu1 }
 0x19c   : > { %v6089_v11 = vpack.c.bf16 %v2406_v7, %v2405_v55  ;;  %v2106_v50 = vadd.f32 %v2105_v35, %v5996_v32  ;;  %v2107_v16 = vpop.f32.mrb[17].mxu1 }
 0x19d   : > { %v2108_v25 = vpop.f32.mrb[18].mxu1 }
 0x19e   : > { %v2343_v14 = vadd.f32 %v6047_v59, %v2106_v50  ;;  %v2109_v49 = vadd.f32 %v2108_v25, %v6000_v45  ;;  %v2110_v56 = vpop.f32.mrb[19].mxu1 }
 0x1a0   : > { %v2344_v4 = vadd.f32 %v6047_v59, %v2109_v49  ;;  %2320 = vmatmul.mubr.bf16.gmra.mrb[124].mxu1 %v1878_v28  ;;  %v2407_v23 = vmax.f32 %v2343_v14, 0.0  ;;  %v6105_v49 = vpop.f32.mrb[44].mxu0 }
 0x1a1   : > { %v6107_v14 = vpop.f32.mrb[45].mxu0 }
 0x1a2   : > { %v2408_v24 = vmax.f32 %v2344_v4, 0.0 }
 0x1a3   : > { %v2113_v55 = vpop.f32.mrb[20].mxu1 }
 0x1a4   : > { %v6099_v7 = vpack.c.bf16 %v2408_v24, %v2407_v23  ;;  %v2114_v32 = vadd.f32 %v5994_v58, %v2113_v55  ;;  %v2115_v35 = vpop.f32.mrb[21].mxu1  ;;  %v6112_v24 = vpop.f32.mrb[46].mxu0 }
 0x1a5   : > { %v2116_v16 = vpop.f32.mrb[22].mxu1 }
 0x1a6   : > { %v2345_v54 = vadd.f32 %v6047_v59, %v2114_v32  ;;  %v2117_v42 = vadd.f32 %v5998_v10, %v2116_v16  ;;  %v2118_v50 = vpop.f32.mrb[23].mxu1  ;;  %v6114_v32 = vpop.f32.mrb[47].mxu0 }
 0x1a8   : > { %v2346_v45 = vadd.f32 %v6047_v59, %v2117_v42  ;;  %v2409_v25 = vmax.f32 %v2345_v54, 0.0 }
 0x1aa   : > { %v2410_v56 = vmax.f32 %v2346_v45, 0.0 }
 0x1ab   : > { %v2121_v28 = vpop.f32.mrb[24].mxu1 }
 0x1ac   : > { %v6109_v4 = vpack.c.bf16 %v2410_v56, %v2409_v25  ;;  %v2122_v58 = vadd.f32 %v2121_v28, %v6004_v57  ;;  %v2123_v23 = vpop.f32.mrb[25].mxu1 }
 0x1ad   : > { %v2124_v55 = vpop.f32.mrb[26].mxu1 }
 0x1ae   : > { %v2347_v10 = vadd.f32 %v6047_v59, %v2122_v58  ;;  %v2125_v42 = vadd.f32 %v2124_v55, %v6008_v33  ;;  %v2126_v54 = vpop.f32.mrb[27].mxu1 }
 0x1af   : > { %v6125_v54 = vpop.f32.mrb[48].mxu0 }
 0x1b0   : > { %v2348_v35 = vadd.f32 %v6047_v59, %v2125_v42  ;;  %v2411_v16 = vmax.f32 %v2347_v10, 0.0  ;;  %7185 = vst [vmem:[#allocation108_spill] sm:$0xff] %v6125_v54  ;;  %v6127_v42 = vpop.f32.mrb[49].mxu0 }
 0x1b2   : > { %v2412_v50 = vmax.f32 %v2348_v35, 0.0 }
 0x1b3   : > { %v2129_v45 = vpop.f32.mrb[28].mxu1 }
 0x1b4   : > { %v6119_v25 = vpack.c.bf16 %v2412_v50, %v2411_v16  ;;  %v2130_v57 = vadd.f32 %v6002_v61, %v2129_v45  ;;  %v2131_v56 = vpop.f32.mrb[29].mxu1  ;;  %v6132_v50 = vpop.f32.mrb[50].mxu0 }
 0x1b5   : > { %v2132_v28 = vpop.f32.mrb[30].mxu1  ;;  %7186 = vst [vmem:[#allocation109_spill] sm:$0xff] %v6132_v50 }
 0x1b6   : > { %v2349_v23 = vadd.f32 %v6047_v59, %v2130_v57  ;;  %v2133_v13 = vadd.f32 %v6006_v1, %v2132_v28  ;;  %v2134_v46 = vpop.f32.mrb[31].mxu1  ;;  %v6134_v57 = vpop.f32.mrb[51].mxu0 }
 0x1b8   : > { %v2350_v58 = vadd.f32 %v6047_v59, %v2133_v13  ;;  %v2413_v33 = vmax.f32 %v2349_v23, 0.0  ;;  %v3667_v23 = vmov 1.0|1.0  }
 0x1b9   : > { %3242 = vmatprep.mubr.msk.bf16.mxu0 %vm3241_vm13, %v3667_v23 }
 0x1ba   : > { %v2414_v55 = vmax.f32 %v2350_v58, 0.0 }
 0x1bb   : > { %v2137_v10 = vpop.f32.mrb[32].mxu1 }
 0x1bc   : > { %v6129_v35 = vpack.c.bf16 %v2414_v55, %v2413_v33  ;;  %v2138_v61 = vadd.f32 %v2137_v10, %v6012_v38  ;;  %v2139_v16 = vpop.f32.mrb[33].mxu1 }
 0x1bd   : > { %v2140_v45 = vpop.f32.mrb[34].mxu1 }
 0x1be   : > { %v2351_v1 = vadd.f32 %v6047_v59, %v2138_v61  ;;  %v2141_v56 = vadd.f32 %v2140_v45, %v6016_v6  ;;  %v2142_v28 = vpop.f32.mrb[35].mxu1 }
 0x1c0   : > { %v2352_v38 = vadd.f32 %v6047_v59, %v2141_v56  ;;  %v2415_v58 = vmax.f32 %v2351_v1, 0.0  ;;  %v6149_v1 = vpop.f32.mrb[52].mxu0 }
 0x1c2   : > { %v2416_v33 = vmax.f32 %v2352_v38, 0.0  ;;  %v6151_v38 = vpop.f32.mrb[53].mxu0 }
 0x1c3   : > { %v2145_v55 = vpop.f32.mrb[36].mxu1 }
 0x1c4   : > { %v2146_v10 = vadd.f32 %v6010_v43, %v2145_v55  ;;  %v2147_v16 = vpop.f32.mrb[37].mxu1  ;;  %v2487_v46 = vpack.c.bf16 %v2416_v33, %v2415_v58  ;;  %v6154_v55 = vpop.f32.mrb[54].mxu0 }
 0x1c5   : > { %v2148_v50 = vpop.f32.mrb[38].mxu1 }
 0x1c6   : > { %v2353_v13 = vadd.f32 %v6047_v59, %v2146_v10  ;;  %v2149_v61 = vadd.f32 %v6014_v34, %v2148_v50  ;;  %v2150_v54 = vpop.f32.mrb[39].mxu1  ;;  %3349 = vmatprep.subr.bf16.mxu0 %v2487_v46 }
 0x1c7   : > { %3350 = vmatpush3.bf16.msra.mxu0 %v6059_v39  ;;  %v6156_v54 = vpop.f32.mrb[55].mxu0 }
 0x1c8   : > { %v2354_v6 = vadd.f32 %v6047_v59, %v2149_v61  ;;  %v2417_v45 = vmax.f32 %v2353_v13, 0.0 }
 0x1ca   : > { %v2418_v56 = vmax.f32 %v2354_v6, 0.0 }
 0x1cb   : > { %v2153_v28 = vpop.f32.mrb[40].mxu1 }
 0x1cc   : > { %v2154_v43 = vadd.f32 %v2153_v28, %v6020_v26  ;;  %v2155_v58 = vpop.f32.mrb[41].mxu1  ;;  %v2488_v33 = vpack.c.bf16 %v2418_v56, %v2417_v45 }
 0x1cd   : > { %v2156_v34 = vpop.f32.mrb[42].mxu1 }
 0x1ce   : > { %v2355_v39 = vadd.f32 %v6047_v59, %v2154_v43  ;;  %v2157_v50 = vadd.f32 %v2156_v34, %v6024_v9  ;;  %v2158_v10 = vpop.f32.mrb[43].mxu1  ;;  %3351 = vmatprep.subr.bf16.mxu0 %v2488_v33  ;;  %v6167_v34 = vpop.f32.mrb[56].mxu0 }
 0x1cf   : > { %3352 = vmatpush3.bf16.msra.mxu0 %v6069_v62 }
 0x1d0   : > { %v2356_v16 = vadd.f32 %v6047_v59, %v2157_v50  ;;  %v2419_v46 = vmax.f32 %v2355_v39, 0.0  ;;  %v6169_v50 = vpop.f32.mrb[57].mxu0 }
 0x1d2   : > { %v2420_v13 = vmax.f32 %v2356_v16, 0.0 }
 0x1d3   : > { %v2161_v26 = vpop.f32.mrb[44].mxu1 }
 0x1d4   : > { %v2162_v61 = vadd.f32 %v6018_v30, %v2161_v26  ;;  %v2163_v6 = vpop.f32.mrb[45].mxu1  ;;  %v2489_v45 = vpack.c.bf16 %v2420_v13, %v2419_v46  ;;  %v6172_v46 = vpop.f32.mrb[58].mxu0 }
 0x1d5   : > { %v2164_v56 = vpop.f32.mrb[46].mxu1  ;;  %v6174_v13 = vpop.f32.mrb[59].mxu0 }
 0x1d6   : > { %v2357_v28 = vadd.f32 %v6047_v59, %v2162_v61  ;;  %v2165_v43 = vadd.f32 %v6022_v22, %v2164_v56  ;;  %v2166_v58 = vpop.f32.mrb[47].mxu1  ;;  %3353 = vmatprep.subr.bf16.mxu0 %v2489_v45 }
 0x1d7   : > { %3354 = vmatpush3.bf16.msra.mxu0 %v6079_v8 }
 0x1d8   : > { %v2358_v9 = vadd.f32 %v6047_v59, %v2165_v43  ;;  %v2421_v62 = vmax.f32 %v2357_v28, 0.0 }
 0x1da   : > { %v2422_v33 = vmax.f32 %v2358_v9, 0.0 }
 0x1db   : > { %v2169_v39 = vpop.f32.mrb[48].mxu1 }
 0x1dc   : > { %v2170_v30 = vadd.f32 %v2169_v39, %v6028_v53  ;;  %v2171_v10 = vpop.f32.mrb[49].mxu1  ;;  %v2490_v16 = vpack.c.bf16 %v2422_v33, %v2421_v62 }
 0x1dd   : > { %v2172_v22 = vpop.f32.mrb[50].mxu1  ;;  %v6185_v10 = vpop.f32.mrb[60].mxu0 }
 0x1de   : > { %v2359_v8 = vadd.f32 %v6047_v59, %v2170_v30  ;;  %v2173_v26 = vadd.f32 %v2172_v22, %v6032_v47  ;;  %v2174_v61 = vpop.f32.mrb[51].mxu1  ;;  %3355 = vmatprep.subr.bf16.mxu0 %v2490_v16  ;;  %v6187_v22 = vpop.f32.mrb[61].mxu0 }
 0x1df   : > { %3356 = vmatpush3.bf16.msra.mxu0 %v6089_v11  ;;  %v6190_v61 = vpop.f32.mrb[62].mxu0 }
 0x1e0   : > { %v2360_v6 = vadd.f32 %v6047_v59, %v2173_v26  ;;  %v2423_v45 = vmax.f32 %v2359_v8, 0.0 }
 0x1e2   : > { %v2424_v56 = vmax.f32 %v2360_v6, 0.0  ;;  %v6192_v6 = vpop.f32.mrb[63].mxu0 }
 0x1e3   : > { %v2177_v53 = vpop.f32.mrb[52].mxu1 }
 0x1e4   : > { %v2178_v28 = vadd.f32 %v6026_v18, %v2177_v53  ;;  %v2179_v43 = vpop.f32.mrb[53].mxu1  ;;  %v2491_v58 = vpack.c.bf16 %v2424_v56, %v2423_v45 }
 0x1e5   : > { %v2180_v9 = vpop.f32.mrb[54].mxu1 }
 0x1e6   : > { %v2361_v62 = vadd.f32 %v6047_v59, %v2178_v28  ;;  %v2181_v33 = vadd.f32 %v6030_v21, %v2180_v9  ;;  %v2182_v39 = vpop.f32.mrb[55].mxu1  ;;  %3357 = vmatprep.subr.bf16.mxu0 %v2491_v58 }
 0x1e7   : > { %3358 = vmatpush3.bf16.msra.mxu0 %v6099_v7 }
 0x1e8   : > { %v2362_v47 = vadd.f32 %v6047_v59, %v2181_v33  ;;  %v2425_v11 = vmax.f32 %v2361_v62, 0.0 }
 0x1ea   : > { %v2426_v30 = vmax.f32 %v2362_v47, 0.0 }
 0x1eb   : > { %v2185_v16 = vpop.f32.mrb[56].mxu1 }
 0x1ec   : > { %v2186_v18 = vadd.f32 %v2185_v16, %v6036_v52  ;;  %v2187_v8 = vpop.f32.mrb[57].mxu1  ;;  %v2492_v26 = vpack.c.bf16 %v2426_v30, %v2425_v11 }
 0x1ed   : > { %v2188_v21 = vpop.f32.mrb[58].mxu1 }
 0x1ee   : > { %v2363_v7 = vadd.f32 %v6047_v59, %v2186_v18  ;;  %v2189_v45 = vadd.f32 %v2188_v21, %v6040_v40  ;;  %v2190_v56 = vpop.f32.mrb[59].mxu1  ;;  %3359 = vmatprep.subr.bf16.mxu0 %v2492_v26 }
 0x1ef   : > { %3360 = vmatpush3.bf16.msra.mxu0 %v6109_v4  ;;  %v7191_v56 = vld [vmem:[#allocation11_spill] sm:$0xff] }
 0x1f0   : > { %v2364_v53 = vadd.f32 %v6047_v59, %v2189_v45  ;;  %v2427_v28 = vmax.f32 %v2363_v7, 0.0  ;;  %vm7192_vm1 = vnez %v7191_v56 }
 0x1f2   : > { %v2428_v43 = vmax.f32 %v2364_v53, 0.0 }
 0x1f3   : > { %v2193_v52 = vpop.f32.mrb[60].mxu1 }
 0x1f4   : > { %v2194_v58 = vadd.f32 %v6034_v19, %v2193_v52  ;;  %v2195_v9 = vpop.f32.mrb[61].mxu1  ;;  %v2493_v62 = vpack.c.bf16 %v2428_v43, %v2427_v28  ;;  %v7193_v28 = vld [vmem:[#allocation4_spill] sm:$0xff]  ;;  %v7195_v43 = vld [vmem:[#allocation2_spill] sm:$0xff] }
 0x1f5   : > { %v2196_v33 = vpop.f32.mrb[62].mxu1  ;;  %vm7194_vm2 = vnez %v7193_v28  ;;  %vm7196_vm6 = vnez %v7195_v43 }
 0x1f6   : > { %v2365_v39 = vadd.f32 %v6047_v59, %v2194_v58  ;;  %v2197_v47 = vadd.f32 %v6038_v12, %v2196_v33  ;;  %v2198_v11 = vpop.f32.mrb[63].mxu1  ;;  %3361 = vmatprep.subr.bf16.mxu0 %v2493_v62  ;;  %vm7197_vm15 = vmpackc.low %vm7194_vm2, %vm7196_vm6 }
 0x1f7   : > { %3362 = vmatpush3.bf16.msra.mxu0 %v6119_v25  ;;  %v7189_v25 = vld [vmem:[#allocation9_spill] sm:$0xff]  ;;  %v7200_v11 = vld [vmem:[#allocation10_spill] sm:$0xff] }
 0x1f8   : > { %v2366_v40 = vadd.f32 %v6047_v59, %v2197_v47  ;;  %v2429_v4 = vmax.f32 %v2365_v39, 0.0  ;;  %vm7190_vm9 = vnez %v7189_v25  ;;  %v7198_v47 = vld [vmem:[#allocation8_spill] sm:$0xff]  ;;  %vm7201_vm4 = vnez %v7200_v11 }
 0x1f9   : > { %vm3245_vm12 = vmpackc.low %vm7192_vm1, %vm7190_vm9  ;;  %vm7199_vm3 = vnez %v7198_v47  ;;  %v7208_v25 = vld [vmem:[#allocation16_spill] sm:$0xff]  ;;  %v7216_v47 = vld [vmem:[#allocation22_spill] sm:$0xff] }
 0x1fa   : > { %v2430_v30 = vmax.f32 %v2366_v40, 0.0  ;;  %vm3247_vm0 = vmpackc.low %vm7201_vm4, %vm7199_vm3 }
 0x1fb   : > { %v2201_v16 = vpop.f32.mrb[64].mxu1 }
 0x1fc   : > { %v2202_v18 = vadd.f32 %v2201_v16, %v6049_v0  ;;  %v2203_v8 = vpop.f32.mrb[65].mxu1  ;;  %v2494_v19 = vpack.c.bf16 %v2430_v30, %v2429_v4  ;;  %v7202_v4 = vld [vmem:[#allocation15_spill] sm:$0xff]  ;;  %v7204_v30 = vld [vmem:[#allocation17_spill] sm:$0xff] }
 0x1fd   : > { %v2204_v26 = vpop.f32.mrb[66].mxu1  ;;  %vm7203_vm10 = vnez %v7202_v4  ;;  %vm7205_vm13 = vnez %v7204_v30  ;;  %v7220_v4 = vld [vmem:[#allocation29_spill] sm:$0xff] }
 0x1fe   : > { %v2367_v21 = vadd.f32 %v6047_v59, %v2202_v18  ;;  %v2205_v7 = vadd.f32 %v2204_v26, %v6054_v3  ;;  %v2206_v45 = vpop.f32.mrb[67].mxu1  ;;  %3363 = vmatprep.subr.bf16.mxu0 %v2494_v19  ;;  %vm3249_vm9 = vmpackc.low %vm7205_vm13, %vm7203_vm10 }
 0x1ff   : > { %3364 = vmatpush3.bf16.msra.mxu0 %v6129_v35 }
 0x200   : > { %v2368_v12 = vadd.f32 %v6047_v59, %v2205_v7  ;;  %v2431_v53 = vmax.f32 %v2367_v21, 0.0 }
 0x202   : > { %v2432_v0 = vmax.f32 %v2368_v12, 0.0  ;;  %3244 = vmatmul.mubr.msk.bf16.vlgmr.msra.gmra.mrb[64].mxu0 %vm7197_vm15, %v3667_v23  ;;  %v7206_v12 = vld [vmem:[#allocation14_spill] sm:$0xff] }
 0x203   : > { %v2209_v3 = vpop.f32.mrb[68].mxu1  ;;  %3246 = vmatprep.mubr.msk.bf16.mxu0 %vm3245_vm12, %v3667_v23  ;;  %vm7207_vm1 = vnez %v7206_v12  ;;  %vm7209_vm12 = vnez %v7208_v25  ;;  %v7226_v25 = vld [vmem:[#allocation33_spill] sm:$0xff] }
 0x204   : > { %v6219_v35 = vpack.c.bf16 %v2432_v0, %v2431_v53  ;;  %v2210_v52 = vadd.f32 %v6042_v63, %v2209_v3  ;;  %v2211_v58 = vpop.f32.mrb[69].mxu1  ;;  %vm3251_vm2 = vmpackc.low %vm7209_vm12, %vm7207_vm1  ;;  %v7210_v53 = vld [vmem:[#allocation21_spill] sm:$0xff]  ;;  %v7212_v0 = vld [vmem:[#allocation23_spill] sm:$0xff] }
 0x205   : > { %v2212_v9 = vpop.f32.mrb[70].mxu1  ;;  %vm7211_vm6 = vnez %v7210_v53  ;;  %vm7213_vm15 = vnez %v7212_v0 }
 0x206   : > { %v2369_v62 = vadd.f32 %v6047_v59, %v2210_v52  ;;  %v2213_v33 = vadd.f32 %v6052_v60, %v2212_v9  ;;  %v2214_v39 = vpop.f32.mrb[71].mxu1  ;;  %vm3253_vm3 = vmpackc.low %vm7213_vm15, %vm7211_vm6  ;;  %vm7227_vm15 = vnez %v7226_v25 }
 0x207   : > { %v7214_v39 = vld [vmem:[#allocation20_spill] sm:$0xff] }
 0x208   : > { %v2370_v40 = vadd.f32 %v6047_v59, %v2213_v33  ;;  %v2433_v63 = vmax.f32 %v2369_v62, 0.0  ;;  %vm7215_vm4 = vnez %v7214_v39  ;;  %v7234_v39 = vld [vmem:[#allocation39_spill] sm:$0xff] }
 0x20a   : > { %v2434_v16 = vmax.f32 %v2370_v40, 0.0  ;;  %3248 = vmatmul.mubr.msk.bf16.gmra.mrb[68].mxu0 %vm3247_vm0, %v3667_v23  ;;  %vm7217_vm0 = vnez %v7216_v47  ;;  %v7218_v40 = vld [vmem:[#allocation27_spill] sm:$0xff]  ;;  %v7236_v47 = vld [vmem:[#allocation42_spill] sm:$0xff] }
 0x20b   : > { %v2217_v18 = vpop.f32.mrb[72].mxu1  ;;  %3250 = vmatprep.mubr.msk.bf16.mxu0 %vm3249_vm9, %v3667_v23  ;;  %vm3255_vm10 = vmpackc.low %vm7217_vm0, %vm7215_vm4  ;;  %vm7219_vm13 = vnez %v7218_v40  ;;  %vm7221_vm9 = vnez %v7220_v4 }
 0x20c   : > { %v6235_v60 = vpack.c.bf16 %v2434_v16, %v2433_v63  ;;  %v2218_v8 = vadd.f32 %v2217_v18, %v6067_v37  ;;  %v2219_v19 = vpop.f32.mrb[73].mxu1  ;;  %vm3257_vm1 = vmpackc.low %vm7221_vm9, %vm7219_vm13  ;;  %vm7235_vm9 = vnez %v7234_v39 }
 0x20d   : > { %v2220_v26 = vpop.f32.mrb[74].mxu1 }
 0x20e   : > { %v2371_v21 = vadd.f32 %v6047_v59, %v2218_v8  ;;  %v2221_v7 = vadd.f32 %v2220_v26, %v6074_v44  ;;  %v2222_v45 = vpop.f32.mrb[75].mxu1 }
 0x20f   : > { %v7224_v45 = vld [vmem:[#allocation28_spill] sm:$0xff] }
 0x210   : > { %v2372_v56 = vadd.f32 %v6047_v59, %v2221_v7  ;;  %v2435_v37 = vmax.f32 %v2371_v21, 0.0  ;;  %v7222_v7 = vld [vmem:[#allocation26_spill] sm:$0xff] }
 0x211   : > { %vm7223_vm12 = vnez %v7222_v7 }
 0x212   : > { %v2436_v28 = vmax.f32 %v2372_v56, 0.0  ;;  %3252 = vmatmul.mubr.msk.bf16.gmra.mrb[72].mxu0 %vm3251_vm2, %v3667_v23  ;;  %vm7225_vm2 = vnez %v7224_v45  ;;  %v7228_v56 = vld [vmem:[#allocation35_spill] sm:$0xff] }
 0x213   : > { %v2225_v43 = vpop.f32.mrb[76].mxu1  ;;  %3254 = vmatprep.mubr.msk.bf16.mxu0 %vm3253_vm3, %v3667_v23  ;;  %vm3259_vm6 = vmpackc.low %vm7225_vm2, %vm7223_vm12  ;;  %vm7229_vm3 = vnez %v7228_v56 }
 0x214   : > { %v6251_v44 = vpack.c.bf16 %v2436_v28, %v2435_v37  ;;  %v2226_v3 = vadd.f32 %v6065_v17, %v2225_v43  ;;  %v2227_v52 = vpop.f32.mrb[77].mxu1  ;;  %vm3261_vm4 = vmpackc.low %vm7229_vm3, %vm7227_vm15 }
 0x215   : > { %v2228_v58 = vpop.f32.mrb[78].mxu1 }
 0x216   : > { %v2373_v9 = vadd.f32 %v6047_v59, %v2226_v3  ;;  %v2229_v62 = vadd.f32 %v6072_v41, %v2228_v58  ;;  %v2230_v33 = vpop.f32.mrb[79].mxu1 }
 0x218   : > { %v2374_v11 = vadd.f32 %v6047_v59, %v2229_v62  ;;  %v2437_v17 = vmax.f32 %v2373_v9, 0.0  ;;  %v7230_v9 = vld [vmem:[#allocation32_spill] sm:$0xff]  ;;  %v7232_v62 = vld [vmem:[#allocation34_spill] sm:$0xff] }
 0x219   : > { %vm7231_vm0 = vnez %v7230_v9 }
 0x21a   : > { %v2438_v30 = vmax.f32 %v2374_v11, 0.0  ;;  %3256 = vmatmul.mubr.msk.bf16.gmra.mrb[76].mxu0 %vm3255_vm10, %v3667_v23  ;;  %vm7233_vm10 = vnez %v7232_v62 }
 0x21b   : > { %v2233_v63 = vpop.f32.mrb[80].mxu1  ;;  %3258 = vmatprep.mubr.msk.bf16.mxu0 %vm3257_vm1, %v3667_v23  ;;  %vm3263_vm13 = vmpackc.low %vm7233_vm10, %vm7231_vm0  ;;  %vm7237_vm1 = vnez %v7236_v47 }
 0x21c   : > { %v6267_v41 = vpack.c.bf16 %v2438_v30, %v2437_v17  ;;  %v2234_v16 = vadd.f32 %v2233_v63, %v6087_v20  ;;  %v2235_v18 = vpop.f32.mrb[81].mxu1  ;;  %vm3265_vm12 = vmpackc.low %vm7237_vm1, %vm7235_vm9  ;;  %vm7248_vm1 = vnez %v7074_v15 }
 0x21d   : > { %v2236_v8 = vpop.f32.mrb[82].mxu1 }
 0x21e   : > { %v2375_v19 = vadd.f32 %v6047_v59, %v2234_v16  ;;  %v2237_v26 = vadd.f32 %v2236_v8, %v6094_v2  ;;  %v2238_v21 = vpop.f32.mrb[83].mxu1  ;;  %v7238_v8 = vld [vmem:[#allocation38_spill] sm:$0xff] }
 0x21f   : > { %vm7239_vm2 = vnez %v7238_v8  ;;  %v7242_v21 = vld [vmem:[#allocation46_spill] sm:$0xff] }
 0x220   : > { %v2376_v12 = vadd.f32 %v6047_v59, %v2237_v26  ;;  %v2439_v20 = vmax.f32 %v2375_v19, 0.0  ;;  %v7240_v19 = vld [vmem:[#allocation41_spill] sm:$0xff]  ;;  %vm7243_vm3 = vnez %v7242_v21  ;;  %v7260_v21 = vld [vmem:[#allocation83_spill] sm:$0xff] }
 0x222   : > { %v2440_v53 = vmax.f32 %v2376_v12, 0.0  ;;  %3260 = vmatmul.mubr.msk.bf16.gmra.mrb[80].mxu0 %vm3259_vm6, %v3667_v23  ;;  %vm7241_vm6 = vnez %v7240_v19 }
 0x223   : > { %v2241_v0 = vpop.f32.mrb[84].mxu1  ;;  %3262 = vmatprep.mubr.msk.bf16.mxu0 %vm3261_vm4, %v3667_v23  ;;  %vm3267_vm15 = vmpackc.low %vm7241_vm6, %vm7239_vm2  ;;  %vm7244_vm4 = vnez %v6945_v36  ;;  %v7245_v36 = vld [vmem:[#allocation45_spill] sm:$0xff] }
 0x224   : > { %v6283_v2 = vpack.c.bf16 %v2440_v53, %v2439_v20  ;;  %v2242_v37 = vadd.f32 %v6085_v29, %v2241_v0  ;;  %v2243_v28 = vpop.f32.mrb[85].mxu1  ;;  %vm3269_vm0 = vmpackc.low %vm7244_vm4, %vm7243_vm3  ;;  %vm7246_vm10 = vnez %v7245_v36  ;;  %v7265_v36 = vld [vmem:[#allocation86_spill] sm:$0xff] }
 0x225   : > { %v2244_v43 = vpop.f32.mrb[86].mxu1 }
 0x226   : > { %v2377_v3 = vadd.f32 %v6047_v59, %v2242_v37  ;;  %v2245_v52 = vadd.f32 %v6092_v51, %v2244_v43  ;;  %v2246_v58 = vpop.f32.mrb[87].mxu1  ;;  %v7249_v43 = vld [vmem:[#allocation6_spill] sm:$0xff] }
 0x227   : > { %v7251_v58 = vld [vmem:[#allocation12_spill] sm:$0xff] }
 0x228   : > { %v2378_v33 = vadd.f32 %v6047_v59, %v2245_v52  ;;  %v2441_v29 = vmax.f32 %v2377_v3, 0.0  ;;  %v7250_v3 = vld [vmem:[#allocation7_spill] sm:$0xff] }
 0x229   : > { %v2823_v52 = vadd.f32 %v4970_v27, %v7250_v3  ;;  %v7257_v27 = vld [vmem:[#allocation82_spill] sm:$0xff] }
 0x22a   : > { %v2442_v11 = vmax.f32 %v2378_v33, 0.0  ;;  %3264 = vmatmul.mubr.msk.bf16.gmra.mrb[84].mxu0 %vm3263_vm13, %v3667_v23  ;;  %vm7247_vm13 = vnez %v6941_v48  ;;  %v7252_v48 = vld [vmem:[#allocation53_spill] sm:$0xff]  ;;  %v7254_v33 = vld [vmem:[#allocation54_spill] sm:$0xff] }
 0x22b   : > { %v2249_v40 = vpop.f32.mrb[88].mxu1  ;;  %3266 = vmatprep.mubr.msk.bf16.mxu0 %vm3265_vm12, %v3667_v23  ;;  %vm3271_vm9 = vmpackc.low %vm7247_vm13, %vm7246_vm10  ;;  %v2828_v9 = vadd.f32 %v7252_v48, %v7251_v58  ;;  %v2833_v15 = vadd.f32 %v7254_v33, %v7253_v31  ;;  %v7270_v31 = vld [vmem:[#allocation90_spill] sm:$0xff] }
 0x22c   : > { %v6299_v51 = vpack.c.bf16 %v2442_v11, %v2441_v29  ;;  %v2250_v4 = vadd.f32 %v2249_v40, %v6107_v14  ;;  %v2251_v17 = vpop.f32.mrb[89].mxu1  ;;  %vm3273_vm12 = vmpackc.low %vm7248_vm1, %vm5446_vm8  ;;  %v7255_v11 = vld [vmem:[#allocation78_spill] sm:$0xff] }
 0x22d   : > { %v2252_v30 = vpop.f32.mrb[90].mxu1 }
 0x22e   : > { %v2379_v63 = vadd.f32 %v6047_v59, %v2250_v4  ;;  %v2253_v16 = vadd.f32 %v2252_v30, %v6114_v32  ;;  %v2254_v18 = vpop.f32.mrb[91].mxu1  ;;  %v2829_v30 = vadd.f32 %v7257_v27, %v2828_v9 }
 0x230   : > { %v2380_v26 = vadd.f32 %v6047_v59, %v2253_v16  ;;  %v2443_v14 = vmax.f32 %v2379_v63, 0.0  ;;  %v7258_v63 = vld [vmem:[#allocation18_spill] sm:$0xff]  ;;  %v7259_v16 = vld [vmem:[#allocation57_spill] sm:$0xff] }
 0x231   : > { %v2838_v18 = vadd.f32 %v7259_v16, %v7258_v63  ;;  %v7276_v63 = vld [vmem:[#allocation66_spill] sm:$0xff] }
 0x232   : > { %v2444_v7 = vmax.f32 %v2380_v26, 0.0  ;;  %3268 = vmatmul.mubr.msk.bf16.gmra.mrb[88].mxu0 %vm3267_vm15, %v3667_v23 }
 0x233   : > { %v2257_v45 = vpop.f32.mrb[92].mxu1  ;;  %3270 = vmatprep.mubr.msk.bf16.mxu0 %vm3269_vm0, %v3667_v23 }
 0x234   : > { %v6315_v32 = vpack.c.bf16 %v2444_v7, %v2443_v14  ;;  %v2258_v12 = vadd.f32 %v6105_v49, %v2257_v45  ;;  %v2259_v25 = vpop.f32.mrb[93].mxu1  ;;  %v7261_v14 = vld [vmem:[#allocation19_spill] sm:$0xff]  ;;  %v7262_v7 = vld [vmem:[#allocation58_spill] sm:$0xff] }
 0x235   : > { %v2260_v56 = vpop.f32.mrb[94].mxu1  ;;  %v2843_v45 = vadd.f32 %v7262_v7, %v7261_v14  ;;  %v7263_v25 = vld [vmem:[#allocation24_spill] sm:$0xff]  ;;  %v7279_v14 = vld [vmem:[#allocation69_spill] sm:$0xff] }
 0x236   : > { %v2381_v20 = vadd.f32 %v6047_v59, %v2258_v12  ;;  %v2261_v53 = vadd.f32 %v6112_v24, %v2260_v56  ;;  %v2262_v0 = vpop.f32.mrb[95].mxu1  ;;  %v2818_v24 = vadd.f32 %v4965_v5, %v7249_v43  ;;  %v7256_v5 = vld [vmem:[#allocation79_spill] sm:$0xff]  ;;  %v7264_v56 = vld [vmem:[#allocation61_spill] sm:$0xff] }
 0x237   : > { %v2824_v4 = vadd.f32 %v7256_v5, %v2823_v52  ;;  %v7267_v43 = vld [vmem:[#allocation25_spill] sm:$0xff]  ;;  %v7269_v52 = vld [vmem:[#allocation108_spill] sm:$0xff] }
 0x238   : > { %v2382_v37 = vadd.f32 %v6047_v59, %v2261_v53  ;;  %v2445_v49 = vmax.f32 %v2381_v20, 0.0  ;;  %v2819_v40 = vadd.f32 %v7255_v11, %v2818_v24  ;;  %v2848_v20 = vadd.f32 %v7264_v56, %v7263_v25  ;;  %v7268_v24 = vld [vmem:[#allocation62_spill] sm:$0xff]  ;;  %v7273_v5 = vld [vmem:[#allocation65_spill] sm:$0xff] }
 0x239   : > { %2825 = vadd.xlane.f32.xlu1 %v2824_v4  ;;  %v2853_v3 = vadd.f32 %v7268_v24, %v7267_v43  ;;  %v7281_v25 = vld [vmem:[#allocation37_spill] sm:$0xff]  ;;  %v7282_v56 = vld [vmem:[#allocation70_spill] sm:$0xff] }
 0x23a   : > { %v2446_v28 = vmax.f32 %v2382_v37, 0.0  ;;  %3272 = vmatmul.mubr.msk.bf16.gmra.mrb[92].mxu0 %vm3271_vm9, %v3667_v23  ;;  %2820 = vadd.xlane.f32.xlu0 %v2819_v40  ;;  %v2839_v37 = vadd.f32 %v7265_v36, %v2838_v18  ;;  %v2849_v33 = vadd.f32 %v7270_v31, %v2848_v20  ;;  %v7272_v40 = vld [vmem:[#allocation30_spill] sm:$0xff]  ;;  %v2873_v20 = vadd.f32 %v7282_v56, %v7281_v25 }
 0x23b   : > { %v2265_v62 = vpop.f32.mrb[96].mxu1  ;;  %3274 = vmatprep.mubr.msk.bf16.mxu0 %vm3273_vm12, %v3667_v23  ;;  %v2858_v4 = vadd.f32 %v7273_v5, %v7272_v40  ;;  %v7291_v40 = vld [vmem:[#allocation76_spill] sm:$0xff] }
 0x23c   : > { %v6339_v39 = vpack.c.bf16 %v2446_v28, %v2445_v49  ;;  %v2266_v47 = vadd.f32 %v2265_v62, %v6127_v42  ;;  %v2267_v29 = vpop.f32.mrb[97].mxu1  ;;  %v2834_v42 = vadd.f32 %v7260_v21, %v2833_v15  ;;  %v7266_v49 = vld [vmem:[#allocation87_spill] sm:$0xff] }
 0x23d   : > { %v2268_v17 = vpop.f32.mrb[98].mxu1  ;;  %v2844_v28 = vadd.f32 %v7266_v49, %v2843_v45  ;;  %v7284_v49 = vld [vmem:[#allocation40_spill] sm:$0xff] }
 0x23e   : > { %v2383_v8 = vadd.f32 %v6047_v59, %v2266_v47  ;;  %v2269_v19 = vadd.f32 %v2268_v17, %v6134_v57  ;;  %v2270_v26 = vpop.f32.mrb[99].mxu1  ;;  %2830 = vadd.xlane.f32.xlu0 %v2829_v30  ;;  %2835 = vadd.xlane.f32.xlu1 %v2834_v42  ;;  %v7271_v47 = vld [vmem:[#allocation109_spill] sm:$0xff]  ;;  %v7274_v17 = vld [vmem:[#allocation91_spill] sm:$0xff]  ;;  %v7278_v42 = vld [vmem:[#allocation36_spill] sm:$0xff] }
 0x23f   : > { %v2854_v27 = vadd.f32 %v7274_v17, %v2853_v3  ;;  %v7275_v30 = vld [vmem:[#allocation31_spill] sm:$0xff]  ;;  %v7277_v26 = vld [vmem:[#allocation94_spill] sm:$0xff]  ;;  %v2868_v7 = vadd.f32 %v7279_v14, %v7278_v42 }
 0x240   : > { %v2384_v12 = vadd.f32 %v6047_v59, %v2269_v19  ;;  %v2447_v53 = vmax.f32 %v2383_v8, 0.0  ;;  %v2863_v16 = vadd.f32 %v7276_v63, %v7275_v30  ;;  %v2859_v21 = vadd.f32 %v7277_v26, %v2858_v4  ;;  %v7292_v17 = vld [vmem:[#allocation103_spill] sm:$0xff]  ;;  %v7294_v30 = vld [vmem:[#allocation77_spill] sm:$0xff]  ;;  %v7295_v14 = vld [vmem:[#allocation106_spill] sm:$0xff] }
 0x242   : > { %v2448_v0 = vmax.f32 %v2384_v12, 0.0  ;;  %2840 = vadd.xlane.f32.xlu0 %v2839_v37  ;;  %2845 = vadd.xlane.f32.xlu1 %v2844_v28  ;;  %v7280_v12 = vld [vmem:[#allocation95_spill] sm:$0xff] }
 0x243   : > { %v2273_v57 = vpop.f32.mrb[100].mxu1 }
 0x244   : > { %v2274_v58 = vadd.f32 %v7269_v52, %v2273_v57  ;;  %v2275_v48 = vpop.f32.mrb[101].mxu1  ;;  %v2503_v9 = vpack.c.bf16 %v2448_v0, %v2447_v53  ;;  %v7283_v57 = vld [vmem:[#allocation43_spill] sm:$0xff]  ;;  %v7285_v52 = vld [vmem:[#allocation98_spill] sm:$0xff] }
 0x245   : > { %v2276_v62 = vpop.f32.mrb[102].mxu1  ;;  %v2878_v28 = vadd.f32 %v7284_v49, %v7283_v57  ;;  %v7286_v48 = vld [vmem:[#allocation99_spill] sm:$0xff] }
 0x246   : > { %v2385_v15 = vadd.f32 %v6047_v59, %v2274_v58  ;;  %v2277_v29 = vadd.f32 %v7271_v47, %v2276_v62  ;;  %v2278_v11 = vpop.f32.mrb[103].mxu1  ;;  %3413 = vmatprep.subr.bf16.mxu0 %v2503_v9  ;;  %2850 = vadd.xlane.f32.xlu0 %v2849_v33  ;;  %v2869_v58 = vadd.f32 %v7285_v52, %v2868_v7  ;;  %v7287_v9 = vld [vmem:[#allocation44_spill] sm:$0xff]  ;;  %v7288_v62 = vld [vmem:[#allocation73_spill] sm:$0xff] }
 0x247   : > { %3414 = vmatpush3.bf16.msra.mxu0 %v6219_v35  ;;  %2855 = vadd.xlane.f32.xlu1 %v2854_v27  ;;  %v2864_v35 = vadd.f32 %v7280_v12, %v2863_v16  ;;  %v2883_v31 = vadd.f32 %v7288_v62, %v7287_v9  ;;  %v7290_v11 = vld [vmem:[#allocation47_spill] sm:$0xff]  ;;  %v7293_v27 = vld [vmem:[#allocation48_spill] sm:$0xff] }
 0x248   : > { %v2386_v18 = vadd.f32 %v6047_v59, %v2277_v29  ;;  %v2449_v8 = vmax.f32 %v2385_v15, 0.0  ;;  %v7289_v29 = vld [vmem:[#allocation102_spill] sm:$0xff]  ;;  %v2888_v5 = vadd.f32 %v7291_v40, %v7290_v11  ;;  %v2893_v63 = vadd.f32 %v7294_v30, %v7293_v27 }
 0x24a   : > { %v2450_v19 = vmax.f32 %v2386_v18, 0.0  ;;  %2860 = vadd.xlane.f32.xlu0 %v2859_v21  ;;  %v2889_v7 = vadd.f32 %v7295_v14, %v2888_v5  ;;  %v7319_v14 = vld [vmem:[#allocation89_spill] sm:$0xff] }
 0x24b   : > { %v2281_v45 = vpop.f32.mrb[104].mxu1  ;;  %2865 = vadd.xlane.f32.xlu1 %v2864_v35 }
 0x24c   : > { %v2282_v53 = vadd.f32 %v2281_v45, %v6151_v38  ;;  %v2283_v0 = vpop.f32.mrb[105].mxu1  ;;  %v2504_v36 = vpack.c.bf16 %v2450_v19, %v2449_v8  ;;  %v2874_v38 = vadd.f32 %v7286_v48, %v2873_v20  ;;  %v7296_v45 = vld [vmem:[#allocation107_spill] sm:$0xff] }
 0x24d   : > { %v2284_v37 = vpop.f32.mrb[106].mxu1  ;;  %v2894_v12 = vadd.f32 %v7296_v45, %v2893_v63  ;;  %v7323_v45 = vld [vmem:[#allocation60_spill] sm:$0xff] }
 0x24e   : > { %v2387_v43 = vadd.f32 %v6047_v59, %v2282_v53  ;;  %v2285_v24 = vadd.f32 %v2284_v37, %v6156_v54  ;;  %v2286_v3 = vpop.f32.mrb[107].mxu1  ;;  %3415 = vmatprep.subr.bf16.mxu0 %v2504_v36  ;;  %2870 = vadd.xlane.f32.xlu0 %v2869_v58  ;;  %v2879_v54 = vadd.f32 %v7289_v29, %v2878_v28 }
 0x24f   : > { %3416 = vmatpush3.bf16.msra.mxu0 %v6235_v60  ;;  %2875 = vadd.xlane.f32.xlu1 %v2874_v38  ;;  %v2884_v60 = vadd.f32 %v7292_v17, %v2883_v31 }
 0x250   : > { %v2388_v33 = vadd.f32 %v6047_v59, %v2285_v24  ;;  %v2451_v15 = vmax.f32 %v2387_v43, 0.0 }
 0x252   : > { %v2452_v47 = vmax.f32 %v2388_v33, 0.0  ;;  %2880 = vadd.xlane.f32.xlu0 %v2879_v54 }
 0x253   : > { %v2289_v4 = vpop.f32.mrb[108].mxu1  ;;  %2885 = vadd.xlane.f32.xlu1 %v2884_v60 }
 0x254   : > { %v2290_v16 = vadd.f32 %v6149_v1, %v2289_v4  ;;  %v2291_v18 = vpop.f32.mrb[109].mxu1  ;;  %v2505_v8 = vpack.c.bf16 %v2452_v47, %v2451_v15 }
 0x255   : > { %v2292_v19 = vpop.f32.mrb[110].mxu1  ;;  %v7299_v18 = vld [vmem:[#allocation81_spill] sm:$0xff] }
 0x256   : > { %v2389_v26 = vadd.f32 %v6047_v59, %v2290_v16  ;;  %v2293_v21 = vadd.f32 %v6154_v55, %v2292_v19  ;;  %v2294_v42 = vpop.f32.mrb[111].mxu1  ;;  %3417 = vmatprep.subr.bf16.mxu0 %v2505_v8  ;;  %2890 = vadd.xlane.f32.xlu0 %v2889_v7  ;;  %vm7300_vm2 = vnez %v7299_v18  ;;  %v7301_v8 = vld [vmem:[#allocation50_spill] sm:$0xff]  ;;  %v7312_v19 = vld [vmem:[#allocation85_spill] sm:$0xff]  ;;  %v7321_v7 = vld [vmem:[#allocation59_spill] sm:$0xff] }
 0x257   : > { %3418 = vmatpush3.bf16.msra.mxu0 %v6251_v44  ;;  %2895 = vadd.xlane.f32.xlu1 %v2894_v12  ;;  %vm7302_vm15 = vnez %v7301_v8  ;;  %vm7313_vm1 = vnez %v7312_v19  ;;  %v7325_v12 = vld [vmem:[#allocation92_spill] sm:$0xff] }
 0x258   : > { %v2390_v35 = vadd.f32 %v6047_v59, %v2293_v21  ;;  %v2453_v1 = vmax.f32 %v2389_v26, 0.0  ;;  %v7314_v26 = vld [vmem:[#allocation55_spill] sm:$0xff]  ;;  %v7316_v21 = vld [vmem:[#allocation56_spill] sm:$0xff] }
 0x25a   : > { %v2454_v25 = vmax.f32 %v2390_v35, 0.0  ;;  %v7327_v35 = vld [vmem:[#allocation93_spill] sm:$0xff] }
 0x25b   : > { %v2297_v56 = vpop.f32.mrb[112].mxu1 }
 0x25c   : > { %v2298_v20 = vadd.f32 %v2297_v56, %v6169_v50  ;;  %v2299_v55 = vpop.f32.mrb[113].mxu1  ;;  %v2506_v53 = vpack.c.bf16 %v2454_v25, %v2453_v1  ;;  %v7329_v1 = vld [vmem:[#allocation63_spill] sm:$0xff]  ;;  %v7331_v25 = vld [vmem:[#allocation64_spill] sm:$0xff] }
 0x25d   : > { %v2300_v0 = vpop.f32.mrb[114].mxu1  ;;  %v7333_v56 = vld [vmem:[#allocation96_spill] sm:$0xff]  ;;  %v7337_v55 = vld [vmem:[#allocation67_spill] sm:$0xff] }
 0x25e   : > { %v2391_v36 = vadd.f32 %v6047_v59, %v2298_v20  ;;  %v2301_v37 = vadd.f32 %v2300_v0, %v6174_v13  ;;  %v2302_v44 = vpop.f32.mrb[115].mxu1  ;;  %3419 = vmatprep.subr.bf16.mxu0 %v2506_v53  ;;  %v7335_v20 = vld [vmem:[#allocation97_spill] sm:$0xff]  ;;  %v7339_v53 = vld [vmem:[#allocation68_spill] sm:$0xff] }
 0x25f   : > { %3420 = vmatpush3.bf16.msra.mxu0 %v6267_v41  ;;  %v7346_v44 = vld [vmem:[#allocation72_spill] sm:$0xff] }
 0x260   : > { %v2392_v57 = vadd.f32 %v6047_v59, %v2301_v37  ;;  %v2455_v49 = vmax.f32 %v2391_v36, 0.0  ;;  %v7342_v36 = vld [vmem:[#allocation101_spill] sm:$0xff]  ;;  %v7344_v37 = vld [vmem:[#allocation71_spill] sm:$0xff] }
 0x262   : > { %v2456_v28 = vmax.f32 %v2392_v57, 0.0 }
 0x263   : > { %v2305_v43 = vpop.f32.mrb[116].mxu1 }
 0x264   : > { %v2306_v24 = vadd.f32 %v6167_v34, %v2305_v43  ;;  %v2307_v3 = vpop.f32.mrb[117].mxu1  ;;  %v2507_v50 = vpack.c.bf16 %v2456_v28, %v2455_v49  ;;  %v7350_v28 = vld [vmem:[#allocation74_spill] sm:$0xff]  ;;  %v7352_v43 = vld [vmem:[#allocation75_spill] sm:$0xff] }
 0x265   : > { %v2308_v52 = vpop.f32.mrb[118].mxu1 }
 0x266   : > { %v2393_v58 = vadd.f32 %v6047_v59, %v2306_v24  ;;  %v2309_v48 = vadd.f32 %v6172_v46, %v2308_v52  ;;  %v2310_v38 = vpop.f32.mrb[119].mxu1  ;;  %3421 = vmatprep.subr.bf16.mxu0 %v2507_v50 }
 0x267   : > { %3422 = vmatpush3.bf16.msra.mxu0 %v6283_v2 }
 0x268   : > { %v2394_v13 = vadd.f32 %v6047_v59, %v2309_v48  ;;  %v2457_v41 = vmax.f32 %v2393_v58, 0.0 }
 0x26a   : > { %v2458_v9 = vmax.f32 %v2394_v13, 0.0 }
 0x26b   : > { %v2313_v62 = vpop.f32.mrb[120].mxu1 }
 0x26c   : > { %v2314_v31 = vadd.f32 %v2313_v62, %v6187_v22  ;;  %v2315_v33 = vpop.f32.mrb[121].mxu1  ;;  %v2508_v34 = vpack.c.bf16 %v2458_v9, %v2457_v41 }
 0x26d   : > { %v2316_v15 = vpop.f32.mrb[122].mxu1 }
 0x26e   : > { %v2395_v47 = vadd.f32 %v6047_v59, %v2314_v31  ;;  %v2317_v29 = vadd.f32 %v2316_v15, %v6192_v6  ;;  %v2318_v54 = vpop.f32.mrb[123].mxu1  ;;  %3423 = vmatprep.subr.bf16.mxu0 %v2508_v34 }
 0x26f   : > { %3424 = vmatpush3.bf16.msra.mxu0 %v6299_v51 }
 0x270   : > { %v2396_v46 = vadd.f32 %v6047_v59, %v2317_v29  ;;  %v2459_v2 = vmax.f32 %v2395_v47, 0.0 }
 0x272   : > { %v2460_v11 = vmax.f32 %v2396_v46, 0.0 }
 0x273   : > { %v2321_v40 = vpop.f32.mrb[124].mxu1 }
 0x274   : > { %v2322_v5 = vadd.f32 %v6185_v10, %v2321_v40  ;;  %v2323_v4 = vpop.f32.mrb[125].mxu1  ;;  %v2509_v22 = vpack.c.bf16 %v2460_v11, %v2459_v2  ;;  %v7297_v10 = vld [vmem:[#allocation80_spill] sm:$0xff] }
 0x275   : > { %v2324_v17 = vpop.f32.mrb[126].mxu1  ;;  %vm7298_vm8 = vnez %v7297_v10 }
 0x276   : > { %v2397_v60 = vadd.f32 %v6047_v59, %v2322_v5  ;;  %v2325_v27 = vadd.f32 %v6190_v61, %v2324_v17  ;;  %v2326_v30 = vpop.f32.mrb[127].mxu1  ;;  %3425 = vmatprep.subr.bf16.mxu0 %v2509_v22  ;;  %vm3277_vm6 = vmpackc.low %vm7300_vm2, %vm7298_vm8  ;;  %v7303_v61 = vld [vmem:[#allocation49_spill] sm:$0xff]  ;;  %vm7315_vm8 = vnez %v7314_v26  ;;  %vm7317_vm2 = vnez %v7316_v21 }
 0x277   : > { %3426 = vmatpush3.bf16.msra.mxu0 %v6315_v32  ;;  %vm7304_vm3 = vnez %v7303_v61  ;;  %v7308_v32 = vld [vmem:[#allocation52_spill] sm:$0xff] }
 0x278   : > { %v2398_v6 = vadd.f32 %v6047_v59, %v2325_v27  ;;  %v2461_v51 = vmax.f32 %v2397_v60, 0.0  ;;  %vm7305_vm4 = vmpackc.low %vm7302_vm15, %vm7304_vm3  ;;  %v7306_v59 = vld [vmem:[#allocation51_spill] sm:$0xff]  ;;  %vm7309_vm10 = vnez %v7308_v32 }
 0x279   : > { %vm7307_vm0 = vnez %v7306_v59  ;;  %vm3283_vm15 = vmpackc.low %vm7317_vm2, %vm7315_vm8  ;;  %vm7334_vm2 = vnez %v7333_v56 }
 0x27a   : > { %v2462_v63 = vmax.f32 %v2398_v6, 0.0  ;;  %vm3279_vm13 = vmpackc.low %vm7309_vm10, %vm7307_vm0  ;;  %vm7324_vm0 = vnez %v7323_v45 }
 0x27c   : > { %v2510_v16 = vpack.c.bf16 %v2462_v63, %v2461_v51 }
 0x27e   : > { %3427 = vmatprep.subr.bf16.mxu0 %v2510_v16 }
 0x27f   : > { %3428 = vmatpush3.bf16.msra.mxu0 %v6339_v39  ;;  %v7310_v39 = vld [vmem:[#allocation84_spill] sm:$0xff] }
 0x280   : > { %vm7311_vm9 = vnez %v7310_v39 }
 0x281   : > { %vm3281_vm12 = vmpackc.low %vm7313_vm1, %vm7311_vm9  ;;  %vm7328_vm9 = vnez %v7327_v35 }
 0x282   : > { %3276 = vmatmul.mubr.msk.bf16.vlgmr.msra.gmra.mrb[96].mxu0 %vm7305_vm4, %v3667_v23  ;;  %vm7322_vm4 = vnez %v7321_v7 }
 0x283   : > { %3278 = vmatprep.mubr.msk.bf16.mxu0 %vm3277_vm6, %v3667_v23  ;;  %vm7320_vm6 = vnez %v7319_v14  ;;  %vm3287_vm10 = vmpackc.low %vm7324_vm0, %vm7322_vm4  ;;  %vm7340_vm4 = vnez %v7339_v53 }
 0x284   : > { %vm3285_vm3 = vmpackc.low %vm7320_vm6, %vm5641_vm11  ;;  %vm7330_vm11 = vnez %v7329_v1 }
 0x28a   : > { %3280 = vmatmul.mubr.msk.bf16.gmra.mrb[100].mxu0 %vm3279_vm13, %v3667_v23  ;;  %vm7326_vm13 = vnez %v7325_v12 }
 0x28b   : > { %3282 = vmatprep.mubr.msk.bf16.mxu0 %vm3281_vm12, %v3667_v23  ;;  %vm3289_vm1 = vmpackc.low %vm7328_vm9, %vm7326_vm13  ;;  %vm7332_vm12 = vnez %v7331_v25  ;;  %vm7345_vm9 = vnez %v7344_v37 }
 0x28c   : > { %vm3291_vm8 = vmpackc.low %vm7332_vm12, %vm7330_vm11 }
 0x28d   : > { %vm3301_vm12 = vmpackc.low %vm5928_vm7, %vm5920_vm14 }
 0x292   : > { %3284 = vmatmul.mubr.msk.bf16.gmra.mrb[104].mxu0 %vm3283_vm15, %v3667_v23  ;;  %vm7336_vm15 = vnez %v7335_v20 }
 0x293   : > { %3286 = vmatprep.mubr.msk.bf16.mxu0 %vm3285_vm3, %v3667_v23  ;;  %vm3293_vm6 = vmpackc.low %vm7336_vm15, %vm7334_vm2  ;;  %vm7338_vm3 = vnez %v7337_v55 }
 0x294   : > { %vm3295_vm0 = vmpackc.low %vm7340_vm4, %vm7338_vm3 }
 0x29a   : > { %3288 = vmatmul.mubr.msk.bf16.gmra.mrb[108].mxu0 %vm3287_vm10, %v3667_v23  ;;  %vm7343_vm10 = vnez %v7342_v36 }
 0x29b   : > { %3290 = vmatprep.mubr.msk.bf16.mxu0 %vm3289_vm1, %v3667_v23  ;;  %vm3297_vm13 = vmpackc.low %vm7343_vm10, %vm5856_vm5  ;;  %vm7347_vm1 = vnez %v7346_v44  ;;  %vm7351_vm5 = vnez %v7350_v28 }
 0x29c   : > { %vm3299_vm11 = vmpackc.low %vm7347_vm1, %vm7345_vm9 }
 0x2a2   : > { %3292 = vmatmul.mubr.msk.bf16.gmra.mrb[112].mxu0 %vm3291_vm8, %v3667_v23  ;;  %vm7353_vm8 = vnez %v7352_v43 }
 0x2a3   : > { %3294 = vmatprep.mubr.msk.bf16.mxu0 %vm3293_vm6, %v3667_v23  ;;  %vm3303_vm2 = vmpackc.low %vm7353_vm8, %vm7351_vm5 }
 0x2aa   : > { %3296 = vmatmul.mubr.msk.bf16.gmra.mrb[116].mxu0 %vm3295_vm0, %v3667_v23 }
 0x2ab   : > { %3298 = vmatprep.mubr.msk.bf16.mxu0 %vm3297_vm13, %v3667_v23 }
 0x2b2   : > { %3300 = vmatmul.mubr.msk.bf16.gmra.mrb[120].mxu0 %vm3299_vm11, %v3667_v23 }
 0x2b3   : > { %3302 = vmatprep.mubr.msk.bf16.mxu0 %vm3301_vm12, %v3667_v23 }
 0x2ba   : > { %3304 = vmatmul.mubr.msk.bf16.gmra.mrb[124].mxu0 %vm3303_vm2, %v3667_v23 }
 0x2c6   : > { %v2826_v51 = vpop.xlane.xlu1 %2825 }
 0x2c7   : > { %v2821_v30 = vpop.xlane.xlu0 %2820  ;;  %2914 = vst [vmem:[%s6527_s16 + $0x8] sm:$0xff] %v2826_v51 }
 0x2c8   : > { %2913 = vst [vmem:[%s6527_s16] sm:$0xff] %v2821_v30 }
 0x2cb   : > { %v2831_v63 = vpop.xlane.xlu0 %2830  ;;  %v2836_v10 = vpop.xlane.xlu1 %2835 }
 0x2cc   : > { %2915 = vst [vmem:[%s6527_s16 + $0x10] sm:$0xff] %v2831_v63  ;;  %2916 = vst [vmem:[%s6527_s16 + $0x18] sm:$0xff] %v2836_v10 }
 0x2cf   : > { %v2841_v32 = vpop.xlane.xlu0 %2840  ;;  %v2846_v19 = vpop.xlane.xlu1 %2845 }
 0x2d0   : > { %2917 = vst [vmem:[%s6527_s16 + $0x20] sm:$0xff] %v2841_v32  ;;  %2918 = vst [vmem:[%s6527_s16 + $0x28] sm:$0xff] %v2846_v19 }
 0x2d3   : > { %v2851_v26 = vpop.xlane.xlu0 %2850 }
 0x2d4   : > { %v2856_v42 = vpop.xlane.xlu1 %2855  ;;  %2919 = vst [vmem:[%s6527_s16 + $0x30] sm:$0xff] %v2851_v26 }
 0x2d5   : > { %v3365_v24 = vpop.f32.mrb[64].mxu0  ;;  %2920 = vst [vmem:[%s6527_s16 + $0x38] sm:$0xff] %v2856_v42 }
 0x2d6   : > { %v3366_v3 = vpop.f32.mrb[65].mxu0 }
 0x2d7   : > { %v6497_v50 = vadd.f32 %v3366_v3, %v3365_v24  ;;  %v3368_v52 = vpop.f32.mrb[66].mxu0  ;;  %v2861_v35 = vpop.xlane.xlu0 %2860 }
 0x2d8   : > { %v3369_v58 = vpop.f32.mrb[67].mxu0  ;;  %v2866_v25 = vpop.xlane.xlu1 %2865  ;;  %2921 = vst [vmem:[%s6527_s16 + $0x40] sm:$0xff] %v2861_v35 }
 0x2d9   : > { %v6499_v48 = vadd.f32 %v3369_v58, %v3368_v52  ;;  %2922 = vst [vmem:[%s6527_s16 + $0x48] sm:$0xff] %v2866_v25 }
 0x2db   : > { %v2871_v56 = vpop.xlane.xlu0 %2870 }
 0x2dc   : > { %v2876_v55 = vpop.xlane.xlu1 %2875  ;;  %2923 = vst [vmem:[%s6527_s16 + $0x50] sm:$0xff] %v2871_v56 }
 0x2dd   : > { %v3371_v38 = vpop.f32.mrb[68].mxu0  ;;  %2924 = vst [vmem:[%s6527_s16 + $0x58] sm:$0xff] %v2876_v55 }
 0x2de   : > { %v3372_v13 = vpop.f32.mrb[69].mxu0 }
 0x2df   : > { %v6501_v41 = vadd.f32 %v3372_v13, %v3371_v38  ;;  %v3374_v9 = vpop.f32.mrb[70].mxu0  ;;  %v2881_v44 = vpop.xlane.xlu0 %2880 }
 0x2e0   : > { %v3375_v62 = vpop.f32.mrb[71].mxu0  ;;  %v2886_v49 = vpop.xlane.xlu1 %2885  ;;  %2925 = vst [vmem:[%s6527_s16 + $0x60] sm:$0xff] %v2881_v44 }
 0x2e1   : > { %v6503_v31 = vadd.f32 %v3375_v62, %v3374_v9  ;;  %2926 = vst [vmem:[%s6527_s16 + $0x68] sm:$0xff] %v2886_v49 }
 0x2e3   : > { %v2891_v28 = vpop.xlane.xlu0 %2890 }
 0x2e4   : > { %v2896_v43 = vpop.xlane.xlu1 %2895  ;;  %2927 = vst [vmem:[%s6527_s16 + $0x70] sm:$0xff] %v2891_v28 }
 0x2e5   : > { %v3377_v33 = vpop.f32.mrb[72].mxu0  ;;  %2928 = vst [vmem:[%s6527_s16 + $0x78] sm:$0xff] %v2896_v43 }
 0x2e6   : > { %v3378_v23 = vpop.f32.mrb[73].mxu0 }
 0x2e7   : > { %v6505_v34 = vadd.f32 %v3378_v23, %v3377_v33  ;;  %v3380_v15 = vpop.f32.mrb[74].mxu0 }
 0x2e8   : > { %v3381_v47 = vpop.f32.mrb[75].mxu0 }
 0x2e9   : > { %v6507_v29 = vadd.f32 %v3381_v47, %v3380_v15 }
 0x2ed   : > { %v3383_v54 = vpop.f32.mrb[76].mxu0 }
 0x2ee   : > { %v3384_v46 = vpop.f32.mrb[77].mxu0 }
 0x2ef   : > { %v6509_v2 = vadd.f32 %v3384_v46, %v3383_v54  ;;  %v3386_v11 = vpop.f32.mrb[78].mxu0 }
 0x2f0   : > { %v3387_v40 = vpop.f32.mrb[79].mxu0 }
 0x2f1   : > { %v6511_v5 = vadd.f32 %v3387_v40, %v3386_v11 }
 0x2f5   : > { %v3389_v4 = vpop.f32.mrb[80].mxu0 }
 0x2f6   : > { %v3390_v22 = vpop.f32.mrb[81].mxu0 }
 0x2f7   : > { %v6517_v17 = vadd.f32 %v3390_v22, %v3389_v4  ;;  %v3392_v60 = vpop.f32.mrb[82].mxu0 }
 0x2f8   : > { %v3393_v27 = vpop.f32.mrb[83].mxu0 }
 0x2f9   : > { %v6519_v6 = vadd.f32 %v3393_v27, %v3392_v60 }
 0x2fd   : > { %v3395_v16 = vpop.f32.mrb[84].mxu0 }
 0x2fe   : > { %v3396_v18 = vpop.f32.mrb[85].mxu0 }
 0x2ff   : > { %v6531_v8 = vadd.f32 %v3396_v18, %v3395_v16  ;;  %v3398_v61 = vpop.f32.mrb[86].mxu0 }
 0x300   : > { %v3399_v59 = vpop.f32.mrb[87].mxu0 }
 0x301   : > { %v6535_v39 = vadd.f32 %v3399_v59, %v3398_v61 }
 0x305   : > { %v3401_v21 = vpop.f32.mrb[88].mxu0 }
 0x306   : > { %v3402_v14 = vpop.f32.mrb[89].mxu0 }
 0x307   : > { %v6539_v7 = vadd.f32 %v3402_v14, %v3401_v21  ;;  %v3404_v45 = vpop.f32.mrb[90].mxu0 }
 0x308   : > { %v3405_v12 = vpop.f32.mrb[91].mxu0 }
 0x309   : > { %v6543_v1 = vadd.f32 %v3405_v12, %v3404_v45 }
 0x30d   : > { %v3407_v20 = vpop.f32.mrb[92].mxu0 }
 0x30e   : > { %v3408_v53 = vpop.f32.mrb[93].mxu0 }
 0x30f   : > { %v6547_v0 = vadd.f32 %v3408_v53, %v3407_v20  ;;  %v3410_v36 = vpop.f32.mrb[94].mxu0 }
 0x310   : > { %v3411_v37 = vpop.f32.mrb[95].mxu0 }
 0x311   : > { %v6551_v57 = vadd.f32 %v3411_v37, %v3410_v36 }
 0x355   : > { %v3429_v24 = vpop.f32.mrb[96].mxu0 }
 0x356   : > { %v3430_v3 = vpop.f32.mrb[97].mxu0 }
 0x357   : > { %v3431_v52 = vadd.f32 %v3430_v3, %v3429_v24  ;;  %v3432_v58 = vpop.f32.mrb[98].mxu0 }
 0x358   : > { %v3433_v38 = vpop.f32.mrb[99].mxu0 }
 0x359   : > { %v2643_v13 = vadd.f32 %v3431_v52, %v6497_v50  ;;  %v3434_v9 = vadd.f32 %v3433_v38, %v3432_v58 }
 0x35b   : > { %v2646_v62 = vadd.f32 %v3434_v9, %v6499_v48  ;;  %2721 = vst [vmem:[%s6563_s19] sm:$0xff] %v2643_v13 }
 0x35d   : > { %v3435_v33 = vpop.f32.mrb[100].mxu0  ;;  %2722 = vst [vmem:[%s6563_s19 + $0x8] sm:$0xff] %v2646_v62 }
 0x35e   : > { %v3436_v23 = vpop.f32.mrb[101].mxu0 }
 0x35f   : > { %v3437_v15 = vadd.f32 %v3436_v23, %v3435_v33  ;;  %v3438_v50 = vpop.f32.mrb[102].mxu0 }
 0x360   : > { %v3439_v47 = vpop.f32.mrb[103].mxu0 }
 0x361   : > { %v2651_v54 = vadd.f32 %v3437_v15, %v6501_v41  ;;  %v3440_v46 = vadd.f32 %v3439_v47, %v3438_v50 }
 0x363   : > { %v2654_v11 = vadd.f32 %v3440_v46, %v6503_v31  ;;  %2723 = vst [vmem:[%s6563_s19 + $0x10] sm:$0xff] %v2651_v54 }
 0x365   : > { %v3441_v40 = vpop.f32.mrb[104].mxu0  ;;  %2724 = vst [vmem:[%s6563_s19 + $0x18] sm:$0xff] %v2654_v11 }
 0x366   : > { %v3442_v4 = vpop.f32.mrb[105].mxu0 }
 0x367   : > { %v3443_v22 = vadd.f32 %v3442_v4, %v3441_v40  ;;  %v3444_v48 = vpop.f32.mrb[106].mxu0 }
 0x368   : > { %v3445_v60 = vpop.f32.mrb[107].mxu0 }
 0x369   : > { %v2659_v27 = vadd.f32 %v3443_v22, %v6505_v34  ;;  %v3446_v30 = vadd.f32 %v3445_v60, %v3444_v48 }
 0x36b   : > { %v2662_v51 = vadd.f32 %v3446_v30, %v6507_v29  ;;  %2725 = vst [vmem:[%s6563_s19 + $0x20] sm:$0xff] %v2659_v27 }
 0x36d   : > { %v3447_v41 = vpop.f32.mrb[108].mxu0  ;;  %2726 = vst [vmem:[%s6563_s19 + $0x28] sm:$0xff] %v2662_v51 }
 0x36e   : > { %v3448_v63 = vpop.f32.mrb[109].mxu0 }
 0x36f   : > { %v3449_v16 = vadd.f32 %v3448_v63, %v3447_v41  ;;  %v3450_v31 = vpop.f32.mrb[110].mxu0 }
 0x370   : > { %v3451_v10 = vpop.f32.mrb[111].mxu0 }
 0x371   : > { %v2667_v18 = vadd.f32 %v3449_v16, %v6509_v2  ;;  %v3452_v61 = vadd.f32 %v3451_v10, %v3450_v31 }
 0x373   : > { %v2670_v59 = vadd.f32 %v3452_v61, %v6511_v5  ;;  %2727 = vst [vmem:[%s6563_s19 + $0x30] sm:$0xff] %v2667_v18 }
 0x375   : > { %v3453_v34 = vpop.f32.mrb[112].mxu0  ;;  %2728 = vst [vmem:[%s6563_s19 + $0x38] sm:$0xff] %v2670_v59 }
 0x376   : > { %v3454_v32 = vpop.f32.mrb[113].mxu0 }
 0x377   : > { %v3455_v19 = vadd.f32 %v3454_v32, %v3453_v34  ;;  %v3456_v29 = vpop.f32.mrb[114].mxu0 }
 0x378   : > { %v3457_v26 = vpop.f32.mrb[115].mxu0 }
 0x379   : > { %v2675_v21 = vadd.f32 %v3455_v19, %v6517_v17  ;;  %v3458_v42 = vadd.f32 %v3457_v26, %v3456_v29 }
 0x37b   : > { %v2678_v14 = vadd.f32 %v3458_v42, %v6519_v6  ;;  %2729 = vst [vmem:[%s6563_s19 + $0x40] sm:$0xff] %v2675_v21 }
 0x37d   : > { %v3459_v2 = vpop.f32.mrb[116].mxu0  ;;  %2730 = vst [vmem:[%s6563_s19 + $0x48] sm:$0xff] %v2678_v14 }
 0x37e   : > { %v3460_v45 = vpop.f32.mrb[117].mxu0 }
 0x37f   : > { %v3461_v12 = vadd.f32 %v3460_v45, %v3459_v2  ;;  %v3462_v5 = vpop.f32.mrb[118].mxu0 }
 0x380   : > { %v3463_v35 = vpop.f32.mrb[119].mxu0 }
 0x381   : > { %v2683_v25 = vadd.f32 %v3461_v12, %v6531_v8  ;;  %v3464_v56 = vadd.f32 %v3463_v35, %v3462_v5 }
 0x383   : > { %v2686_v20 = vadd.f32 %v3464_v56, %v6535_v39  ;;  %2731 = vst [vmem:[%s6563_s19 + $0x50] sm:$0xff] %v2683_v25 }
 0x385   : > { %v3465_v17 = vpop.f32.mrb[120].mxu0  ;;  %2732 = vst [vmem:[%s6563_s19 + $0x58] sm:$0xff] %v2686_v20 }
 0x386   : > { %v3466_v55 = vpop.f32.mrb[121].mxu0 }
 0x387   : > { %v3467_v53 = vadd.f32 %v3466_v55, %v3465_v17  ;;  %v3468_v6 = vpop.f32.mrb[122].mxu0 }
 0x388   : > { %v3469_v36 = vpop.f32.mrb[123].mxu0 }
 0x389   : > { %v2691_v37 = vadd.f32 %v3467_v53, %v6539_v7  ;;  %v3470_v44 = vadd.f32 %v3469_v36, %v3468_v6 }
 0x38b   : > { %v2694_v49 = vadd.f32 %v3470_v44, %v6543_v1  ;;  %2733 = vst [vmem:[%s6563_s19 + $0x60] sm:$0xff] %v2691_v37 }
 0x38d   : > { %v3471_v8 = vpop.f32.mrb[124].mxu0  ;;  %2734 = vst [vmem:[%s6563_s19 + $0x68] sm:$0xff] %v2694_v49 }
 0x38e   : > { %v3472_v28 = vpop.f32.mrb[125].mxu0 }
 0x38f   : > { %v3473_v43 = vadd.f32 %v3472_v28, %v3471_v8  ;;  %v3474_v39 = vpop.f32.mrb[126].mxu0 }
 0x390   : > { %v3475_v24 = vpop.f32.mrb[127].mxu0 }
 0x391   : > { %v2699_v3 = vadd.f32 %v3473_v43, %v6547_v0  ;;  %v3476_v52 = vadd.f32 %v3475_v24, %v3474_v39 }
 0x393   : > { %v2702_v58 = vadd.f32 %v3476_v52, %v6551_v57  ;;  %2735 = vst [vmem:[%s6563_s19 + $0x70] sm:$0xff] %v2699_v3 }
 0x395   : > { %2736 = vst [vmem:[%s6563_s19 + $0x78] sm:$0xff] %v2702_v58 }
 0x396 PF: > { %s18_s26 = sadd.s32 1, %s3663_s26   ;;  %s7354_s24 = smov %s3659_s25 }
 0x397   : > { %p15_p7 = scmp.ge.s32.totalorder %s18_s26, 4   ;;  %s7355_s25 = smov %s7357_s27 }
 0x399   :  { %17 = sbr.rel (!%p15_p7) target bundleno = 2 (0x2), region = 96 }

</bundles_post_ra>
